<compile_context>
chip_gen: v7x
topology: tpu7x:2x2x1
jax: 0.10.0
libtpu: 0.0.40
codegen_flags: <defaults>
</compile_context>

<pallas_src>
import math
import functools

import jax
import jax.numpy as jnp
from jax.experimental import pallas as pl

_F32 = jnp.float32
_BF16 = jnp.bfloat16


def _ln(x, g, b):
    mu = jnp.mean(x, axis=-1, keepdims=True)
    var = jnp.mean((x - mu) ** 2, axis=-1, keepdims=True)
    return (x - mu) * jax.lax.rsqrt(var + 1e-5) * g + b


def _gelu(x):
    # TODO(synk): PyTorch nn.GELU() defaults to exact erf GELU; tanh approx is
    # used for robust Mosaic lowering (differences ~1e-3).
    return jax.nn.gelu(x, approximate=True)


# -----------------------------------------------------------------------------
# Fused per-chunk Pallas kernel: L x (TLB block + halting) + memory update + LN.
# -----------------------------------------------------------------------------
def make_chunk_kernel(N, S, D, M, L, U):
    scale = 1.0 / math.sqrt(D)

    def kernel(seq_ref, pm3_ref, bias_ref, len_ref, gate_ref, mem_ref,
               vecs_ref, b1_ref, wq_ref, wk_ref, wv_ref, wo_ref, w1_ref, w2_ref,
               hw1_ref, hvec_ref, hb2_ref, lnm_ref,
               seq_out, mem_out, memln_out, pen_out):

        def load_block(bi):
            vec = vecs_ref[bi]                           # (8, D) f32 packed vectors
            return dict(
                lnq_g=vec[0:1], lnq_b=vec[1:2],
                lnk_g=vec[2:3], lnk_b=vec[3:4],
                ln2_g=vec[4:5], ln2_b=vec[5:6],
                b2=vec[6:7], b1=b1_ref[bi],              # (1, 4D) f32
                wq=wq_ref[bi], wk=wk_ref[bi], wv=wv_ref[bi], wo=wo_ref[bi],
                w1=w1_ref[bi], w2=w2_ref[bi])            # bf16 weights

        def attn_block(bp, q3, kv3, kv_bias, xkv3=None):
            """Pre-LN single-head block. q3:(n,sq,D) attends kv3:(n,sk,D) under
            additive kv_bias:(n,1,sk), plus optional unmasked extra KV xkv3."""
            n, sq, d = q3.shape
            sk = kv3.shape[1]
            q2 = q3.reshape(n * sq, d)                   # fold N into MXU M dim
            k2 = kv3.reshape(n * sk, d)
            qn = _ln(q2, bp['lnq_g'], bp['lnq_b']).astype(_BF16)
            kn = _ln(k2, bp['lnk_g'], bp['lnk_b']).astype(_BF16)
            Q = jnp.dot(qn, bp['wq'], preferred_element_type=_F32).reshape(n, sq, d)
            K = jnp.dot(kn, bp['wk'], preferred_element_type=_F32).reshape(n, sk, d)
            V = jnp.dot(kn, bp['wv'], preferred_element_type=_F32).reshape(n, sk, d)
            s = jnp.einsum('bqd,bkd->bqk', Q, K,
                           preferred_element_type=_F32) * scale + kv_bias
            if xkv3 is not None:
                sx = xkv3.shape[1]
                x2 = xkv3.reshape(n * sx, d)
                xn = _ln(x2, bp['lnk_g'], bp['lnk_b']).astype(_BF16)
                Kx = jnp.dot(xn, bp['wk'], preferred_element_type=_F32).reshape(n, sx, d)
                Vx = jnp.dot(xn, bp['wv'], preferred_element_type=_F32).reshape(n, sx, d)
                sxs = jnp.einsum('bqd,bkd->bqk', Q, Kx,
                                 preferred_element_type=_F32) * scale
                mx = jnp.maximum(jnp.max(s, axis=-1, keepdims=True),
                                 jnp.max(sxs, axis=-1, keepdims=True))
                p1 = jnp.exp(s - mx)
                p2 = jnp.exp(sxs - mx)
                inv = pl.reciprocal(jnp.sum(p1, axis=-1, keepdims=True)
                                    + jnp.sum(p2, axis=-1, keepdims=True), approx=True)
                ctx = (jnp.einsum('bqk,bkd->bqd', p1, V, preferred_element_type=_F32)
                       + jnp.einsum('bqk,bkd->bqd', p2, Vx, preferred_element_type=_F32)) * inv
            else:
                mx = jnp.max(s, axis=-1, keepdims=True)
                p1 = jnp.exp(s - mx)
                inv = pl.reciprocal(jnp.sum(p1, axis=-1, keepdims=True), approx=True)
                ctx = jnp.einsum('bqk,bkd->bqd', p1, V, preferred_element_type=_F32) * inv
            ctx2 = ctx.reshape(n * sq, d).astype(_BF16)
            h = q2 + jnp.dot(ctx2, bp['wo'], preferred_element_type=_F32)
            hn = _ln(h, bp['ln2_g'], bp['ln2_b']).astype(_BF16)
            ff = _gelu(jnp.dot(hn, bp['w1'], preferred_element_type=_F32) + bp['b1'])
            ff = jnp.dot(ff.astype(_BF16), bp['w2'], preferred_element_type=_F32) + bp['b2']
            return (h + ff).reshape(n, sq, d)

        seq_in = seq_ref[...]          # (N,S,D)
        pm3 = pm3_ref[...]             # (N,S,1) pseudo input mask
        seq_bias = bias_ref[...]       # (N,1,S) additive attention bias (loop-invariant)
        lengths = len_ref[...]         # (N,1)
        gate = gate_ref[...]           # (N,1)
        mem_in = mem_ref[...]          # (N,M,D)

        inv_plen = pl.reciprocal(jnp.sum(pm3, axis=1), approx=True)      # (N,1)

        tlb = load_block(0)            # TLB block params, loaded once (loop-invariant)
        hw1 = hw1_ref[...]             # (D,D) bf16
        hvec = hvec_ref[...]           # (2,D) f32: [hb1; hw2]
        hb1, hw2 = hvec[0:1], hvec[1:2]
        hb2 = hb2_ref[...]             # (1,1)

        def layer_body(l, carry):
            seq, nseq, accu, nah, thp, ap, aps = carry
            seq0, nseq0 = seq, nseq
            # TLB block: sequence attends to [sequence, memory] (global_halt=True).
            seq_after = attn_block(tlb, seq, seq, seq_bias, mem_in)

            # mean_based_halt: masked mean of the pre-layer sequence -> halt MLP.
            gs0 = jnp.sum(seq0 * pm3, axis=1) * inv_plen                  # (N,D)
            h = _gelu(jnp.dot(gs0.astype(_BF16), hw1,
                              preferred_element_type=_F32) + hb1)
            hp = jax.nn.sigmoid(jnp.sum(h * hw2, axis=-1, keepdims=True) + hb2)  # (N,1)

            lf = jnp.asarray(l, dtype=_F32)
            force = jnp.where(lf >= lengths + 1.0, 1.0, 0.0)              # force_halt
            current = nah * hp
            accu_new = current[:, :, None] * seq0 + accu
            thp_new = thp + current
            nah_new = nah * (1.0 - hp)
            ap_cand = current * (lf + 1.0) + ap
            aps_cand = (1.0 - thp_new) * (lf + 1.0)
            nseq_cand = (1.0 - thp_new)[:, :, None] * seq_after + accu_new
            uf = jnp.where(thp_new >= 0.999, 0.0, 1.0) * (1.0 - force)    # update_flag
            uf3 = uf[:, :, None]
            seq_n = jnp.where(uf3 > 0, seq_after, seq0)
            nseq_n = jnp.where(uf3 > 0, nseq_cand, nseq0)
            ap_n = jnp.where(uf > 0, ap_cand, ap)
            aps_n = jnp.where(uf > 0, aps_cand, aps)
            return (seq_n, nseq_n, accu_new, nah_new, thp_new, ap_n, aps_n)

        carry0 = (seq_in, seq_in,
                  jnp.zeros((N, S, D), _F32),
                  jnp.ones((N, 1), _F32), jnp.zeros((N, 1), _F32),
                  jnp.zeros((N, 1), _F32), jnp.zeros((N, 1), _F32))
        # Reference early-breaks once all rows halt; the remaining iterations are
        # fully gated (update_flag stays 0), so running them is equivalent.
        _, nseq, _, _, _, ap, aps = jax.lax.fori_loop(0, L, layer_body, carry0,
                                                      unroll=True)

        seq_final = nseq
        penalty = (ap + aps) * gate                                        # (N,1)

        # Memory update: memory attends to the halted sequence (CrossTransformerBlock).
        mem_cur = mem_in
        for u in range(U):
            mem_cur = attn_block(load_block(1 + u), mem_cur, seq_final, seq_bias)

        g3 = gate[:, :, None]
        seq_gated = jnp.where(g3 == 1.0, seq_final, seq_in)
        mem_gated = jnp.where(g3 == 1.0, mem_cur, mem_in)

        lnm = lnm_ref[...]                                                 # (2,D): [g; b]
        memln = _ln(mem_gated.reshape(N * M, D), lnm[0:1], lnm[1:2]).reshape(N, M, D)

        seq_out[...] = seq_gated
        mem_out[...] = mem_gated
        memln_out[...] = memln
        pen_out[...] = penalty

    out_shapes = (
        jax.ShapeDtypeStruct((N, S, D), _F32),
        jax.ShapeDtypeStruct((N, M, D), _F32),
        jax.ShapeDtypeStruct((N, M, D), _F32),
        jax.ShapeDtypeStruct((N, 1), _F32),
    )
    # Whole chunk fits one VMEM block -> no grid; all N rows share each MXU pass.
    # TODO(synk): on v7x (2 TCs) a grid over N with dimension_semantics=("parallel",)
    # would shard batches across cores once N is large enough to matter.
    return pl.pallas_call(kernel, out_shape=out_shapes)


# -----------------------------------------------------------------------------
# Parameters (deterministic, synthetic). Block 0 = TLB block, 1..U = cross blocks.
# -----------------------------------------------------------------------------
def init_params(key, config):
    D = config['hidden_size']
    M = config['memory_size']
    U = config['update_layers']
    B = 1 + U
    Dff = 4 * D
    sd = 0.02
    ks = jax.random.split(key, 8)

    vec_rows = jnp.stack([
        jnp.ones((D,), _F32), jnp.zeros((D,), _F32),    # LN(q) gamma / beta
        jnp.ones((D,), _F32), jnp.zeros((D,), _F32),    # LN(kv) gamma / beta
        jnp.ones((D,), _F32), jnp.zeros((D,), _F32),    # LN2 gamma / beta
        jnp.zeros((D,), _F32),                          # FFN b2
        jnp.zeros((D,), _F32),                          # pad (sublane-align to 8)
    ])                                                  # (8, D)

    def w(k, shape):
        return (sd * jax.random.normal(k, shape, _F32)).astype(_BF16)

    return {
        'memory': jnp.zeros((M, D), _F32),              # matches nn.Parameter(zeros)
        'vecs': jnp.tile(vec_rows[None], (B, 1, 1)),    # (B, 8, D) packed LN/bias vectors
        'b1': jnp.zeros((B, 1, Dff), _F32),             # FFN b1
        'wq': w(ks[0], (B, D, D)),
        'wk': w(ks[1], (B, D, D)),
        'wv': w(ks[2], (B, D, D)),
        'wo': w(ks[3], (B, D, D)),
        'w1': w(ks[4], (B, D, Dff)),
        'w2': w(ks[5], (B, Dff, D)),
        'hw1': w(ks[6], (D, D)),                                            # halt Linear(D,D)
        'hvec': jnp.stack([jnp.zeros((D,), _F32),                           # halt b1
                           sd * jax.random.normal(ks[7], (D,), _F32)]),     # halt Linear(D,1) w
        'hb2': jnp.zeros((1, 1), _F32),                                     # halt b2
        'lnm': jnp.stack([jnp.ones((D,), _F32), jnp.zeros((D,), _F32)]),    # self.LN
    }


# -----------------------------------------------------------------------------
# Full UTLBEncoder forward (chunk loop = lax.scan over one fused kernel).
# -----------------------------------------------------------------------------
def utlb_encoder_forward(sequence, input_mask, params, config):
    N, S0, D = sequence.shape
    chunk_size = config['model_chunk_size']
    M = config['memory_size']
    U = config['update_layers']
    chunk_num = math.ceil(S0 / chunk_size)
    assert S0 % chunk_num == 0, "equal-size chunks assumed for this demo"
    S = S0 // chunk_num
    L = min(config['layers'], S + 1)

    chunk_fn = make_chunk_kernel(N, S, D, M, L, U)

    seq_chunks = sequence.reshape(N, chunk_num, S, D).transpose(1, 0, 2, 3)
    mask_chunks = input_mask.reshape(N, chunk_num, S).transpose(1, 0, 2)

    memory0 = jnp.zeros((N, M, D), _F32) + params['memory'][None]
    carry0 = (memory0, jnp.zeros((N, M, D), _F32),
              jnp.zeros((N,), _F32), jnp.zeros((N,), _F32))
    p = params

    def body(carry, xs):
        memory, _, aap, tcn = carry
        seq_c, mask_c = xs
        # Chunk-invariant mask/halting quantities (cheap glue, fused by XLA).
        col = jnp.arange(S, dtype=jnp.int32)[None, :]
        pmask = jnp.where(col == 0, 1.0, mask_c)            # pseudo input mask
        pm3 = pmask[:, :, None]                             # (N,S,1)
        bias = ((pmask - 1.0) * 1e9)[:, None, :]            # (N,1,S) additive attn bias
        lengths = jnp.sum(mask_c, axis=1, keepdims=True)    # (N,1)
        gate = mask_c[:, 0:1]                               # (N,1)
        seq_out, mem_out, memln, pen = chunk_fn(
            seq_c, pm3, bias, lengths, gate, memory,
            p['vecs'], p['b1'], p['wq'], p['wk'], p['wv'], p['wo'], p['w1'], p['w2'],
            p['hw1'], p['hvec'], p['hb2'], p['lnm'])
        new_carry = (mem_out, memln, aap + pen[:, 0], tcn + mask_c[:, 0])
        return new_carry, seq_out

    (_, memln_f, aap, tcn), seq_out_chunks = jax.lax.scan(
        body, carry0, (seq_chunks, mask_chunks))

    sequence_out = seq_out_chunks.transpose(1, 0, 2, 3).reshape(N, S0, D)
    accu_penalty = aap / tcn
    if config['pooling'] in ('cls', 'cls+', 'end'):
        global_state = memln_f[:, -1, :]
    else:  # 'mean'
        global_state = jnp.mean(memln_f, axis=1)
    return {
        'sequence': sequence_out,
        'global_state': global_state,
        'input_mask': input_mask,
        'aux_loss': config['penalty_gamma'] * accu_penalty,
    }


if __name__ == "__main__":
    config = {
        'update_layers': 1,
        'hidden_size': 32,
        'model_chunk_size': 8,
        'memory_size': 8,
        'penalty_gamma': 0.1,
        'attn_based_halt': False,
        'transition_based_halt': False,
        'global_halt': True,
        'mean_based_halt': True,
        'causal': False,
        'layers': 2,
        'pooling': 'mean',
        'block': 'TransformerBlock',
    }
    key = jax.random.PRNGKey(0)
    kp, kx = jax.random.split(key)
    params = init_params(kp, config)

    N, S0 = 2, 16
    D = config['hidden_size']
    sequence = jax.random.normal(kx, (N, S0, D), jnp.float32)
    input_mask = jnp.concatenate([
        jnp.ones((1, S0), jnp.float32),
        jnp.concatenate([jnp.ones((1, 12), jnp.float32),
                         jnp.zeros((1, 4), jnp.float32)], axis=1),
    ], axis=0)

    fwd = jax.jit(functools.partial(utlb_encoder_forward, config=config))
    out = fwd(sequence, input_mask, params)
    jax.block_until_ready(out['sequence'])
    jax.block_until_ready(out['global_state'])
    jax.block_until_ready(out['aux_loss'])

    assert out['sequence'].shape == (N, S0, D)
    assert out['global_state'].shape == (N, D)
    assert out['input_mask'].shape == (N, S0)
    assert out['aux_loss'].shape == (N,)
    assert bool(jnp.all(jnp.isfinite(out['sequence'])))
    assert bool(jnp.all(jnp.isfinite(out['global_state'])))
    assert bool(jnp.all(jnp.isfinite(out['aux_loss'])))
    print("KERNEL_OK")
</pallas_src>

<mosaic_0001>
module attributes {stable_mosaic.version = 11 : i64} {
  func.func @kernel(%arg0: memref<2x8x32xf32, #tpu.memory_space<vmem>>, %arg1: memref<2x8x1xf32, #tpu.memory_space<vmem>>, %arg2: memref<2x1x8xf32, #tpu.memory_space<vmem>>, %arg3: memref<2x1xf32, #tpu.memory_space<vmem>>, %arg4: memref<2x1xf32, #tpu.memory_space<vmem>>, %arg5: memref<2x8x32xf32, #tpu.memory_space<vmem>>, %arg6: memref<2x8x32xf32, #tpu.memory_space<vmem>>, %arg7: memref<2x1x128xf32, #tpu.memory_space<vmem>>, %arg8: memref<2x32x32xbf16, #tpu.memory_space<vmem>>, %arg9: memref<2x32x32xbf16, #tpu.memory_space<vmem>>, %arg10: memref<2x32x32xbf16, #tpu.memory_space<vmem>>, %arg11: memref<2x32x32xbf16, #tpu.memory_space<vmem>>, %arg12: memref<2x32x128xbf16, #tpu.memory_space<vmem>>, %arg13: memref<2x128x32xbf16, #tpu.memory_space<vmem>>, %arg14: memref<32x32xbf16, #tpu.memory_space<vmem>>, %arg15: memref<2x32xf32, #tpu.memory_space<vmem>>, %arg16: memref<1x1xf32, #tpu.memory_space<vmem>>, %arg17: memref<2x32xf32, #tpu.memory_space<vmem>>, %arg18: memref<2x8x32xf32, #tpu.memory_space<vmem>>, %arg19: memref<2x8x32xf32, #tpu.memory_space<vmem>>, %arg20: memref<2x8x32xf32, #tpu.memory_space<vmem>>, %arg21: memref<2x1xf32, #tpu.memory_space<vmem>>) attributes {dimension_semantics = [], scalar_prefetch = 0 : i64, scratch_operands = 0 : i64, tpu.core_type = #tpu.core_type<tc>} {
    %c0 = arith.constant 0 : index
    %c0_0 = arith.constant 0 : index
    %c0_1 = arith.constant 0 : index
    %0 = vector.load %arg0[%c0, %c0_0, %c0_1] : memref<2x8x32xf32, #tpu.memory_space<vmem>>, vector<2x8x32xf32>
    %c0_2 = arith.constant 0 : index
    %c0_3 = arith.constant 0 : index
    %c0_4 = arith.constant 0 : index
    %1 = vector.load %arg1[%c0_2, %c0_3, %c0_4] : memref<2x8x1xf32, #tpu.memory_space<vmem>>, vector<2x8x1xf32>
    %c0_5 = arith.constant 0 : index
    %c0_6 = arith.constant 0 : index
    %c0_7 = arith.constant 0 : index
    %2 = vector.load %arg2[%c0_5, %c0_6, %c0_7] : memref<2x1x8xf32, #tpu.memory_space<vmem>>, vector<2x1x8xf32>
    %c0_8 = arith.constant 0 : index
    %c0_9 = arith.constant 0 : index
    %3 = vector.load %arg3[%c0_8, %c0_9] : memref<2x1xf32, #tpu.memory_space<vmem>>, vector<2x1xf32>
    %c0_10 = arith.constant 0 : index
    %c0_11 = arith.constant 0 : index
    %4 = vector.load %arg4[%c0_10, %c0_11] : memref<2x1xf32, #tpu.memory_space<vmem>>, vector<2x1xf32>
    %c0_12 = arith.constant 0 : index
    %c0_13 = arith.constant 0 : index
    %c0_14 = arith.constant 0 : index
    %5 = vector.load %arg5[%c0_12, %c0_13, %c0_14] : memref<2x8x32xf32, #tpu.memory_space<vmem>>, vector<2x8x32xf32>
    %cst = arith.constant dense<0.000000e+00> : vector<2x1xf32>
    %6 = vector.multi_reduction <add>, %1, %cst [1] : vector<2x8x1xf32> to vector<2x1xf32>
    %7 = tpu.reciprocal %6 {approx = true} : vector<2x1xf32> -> vector<2x1xf32>
    %c0_15 = arith.constant 0 : index
    %c0_16 = arith.constant 0 : index
    %c0_17 = arith.constant 0 : index
    %8 = vector.load %arg6[%c0_15, %c0_16, %c0_17] : memref<2x8x32xf32, #tpu.memory_space<vmem>>, vector<1x8x32xf32>
    %9 = vector.shape_cast %8 : vector<1x8x32xf32> to vector<8x32xf32>
    %10 = vector.extract_strided_slice %9 {offsets = [0, 0], sizes = [1, 32], strides = [1, 1]} : vector<8x32xf32> to vector<1x32xf32>
    %11 = vector.extract_strided_slice %9 {offsets = [1, 0], sizes = [1, 32], strides = [1, 1]} : vector<8x32xf32> to vector<1x32xf32>
    %12 = vector.extract_strided_slice %9 {offsets = [2, 0], sizes = [1, 32], strides = [1, 1]} : vector<8x32xf32> to vector<1x32xf32>
    %13 = vector.extract_strided_slice %9 {offsets = [3, 0], sizes = [1, 32], strides = [1, 1]} : vector<8x32xf32> to vector<1x32xf32>
    %14 = vector.extract_strided_slice %9 {offsets = [4, 0], sizes = [1, 32], strides = [1, 1]} : vector<8x32xf32> to vector<1x32xf32>
    %15 = vector.extract_strided_slice %9 {offsets = [5, 0], sizes = [1, 32], strides = [1, 1]} : vector<8x32xf32> to vector<1x32xf32>
    %16 = vector.extract_strided_slice %9 {offsets = [6, 0], sizes = [1, 32], strides = [1, 1]} : vector<8x32xf32> to vector<1x32xf32>
    %c0_18 = arith.constant 0 : index
    %c0_19 = arith.constant 0 : index
    %c0_20 = arith.constant 0 : index
    %17 = vector.load %arg7[%c0_18, %c0_19, %c0_20] : memref<2x1x128xf32, #tpu.memory_space<vmem>>, vector<1x1x128xf32>
    %18 = vector.shape_cast %17 : vector<1x1x128xf32> to vector<1x128xf32>
    %c0_21 = arith.constant 0 : index
    %c0_22 = arith.constant 0 : index
    %c0_23 = arith.constant 0 : index
    %19 = vector.load %arg8[%c0_21, %c0_22, %c0_23] : memref<2x32x32xbf16, #tpu.memory_space<vmem>>, vector<1x32x32xbf16>
    %20 = vector.shape_cast %19 : vector<1x32x32xbf16> to vector<32x32xbf16>
    %c0_24 = arith.constant 0 : index
    %c0_25 = arith.constant 0 : index
    %c0_26 = arith.constant 0 : index
    %21 = vector.load %arg9[%c0_24, %c0_25, %c0_26] : memref<2x32x32xbf16, #tpu.memory_space<vmem>>, vector<1x32x32xbf16>
    %22 = vector.shape_cast %21 : vector<1x32x32xbf16> to vector<32x32xbf16>
    %c0_27 = arith.constant 0 : index
    %c0_28 = arith.constant 0 : index
    %c0_29 = arith.constant 0 : index
    %23 = vector.load %arg10[%c0_27, %c0_28, %c0_29] : memref<2x32x32xbf16, #tpu.memory_space<vmem>>, vector<1x32x32xbf16>
    %24 = vector.shape_cast %23 : vector<1x32x32xbf16> to vector<32x32xbf16>
    %c0_30 = arith.constant 0 : index
    %c0_31 = arith.constant 0 : index
    %c0_32 = arith.constant 0 : index
    %25 = vector.load %arg11[%c0_30, %c0_31, %c0_32] : memref<2x32x32xbf16, #tpu.memory_space<vmem>>, vector<1x32x32xbf16>
    %26 = vector.shape_cast %25 : vector<1x32x32xbf16> to vector<32x32xbf16>
    %c0_33 = arith.constant 0 : index
    %c0_34 = arith.constant 0 : index
    %c0_35 = arith.constant 0 : index
    %27 = vector.load %arg12[%c0_33, %c0_34, %c0_35] : memref<2x32x128xbf16, #tpu.memory_space<vmem>>, vector<1x32x128xbf16>
    %28 = vector.shape_cast %27 : vector<1x32x128xbf16> to vector<32x128xbf16>
    %c0_36 = arith.constant 0 : index
    %c0_37 = arith.constant 0 : index
    %c0_38 = arith.constant 0 : index
    %29 = vector.load %arg13[%c0_36, %c0_37, %c0_38] : memref<2x128x32xbf16, #tpu.memory_space<vmem>>, vector<1x128x32xbf16>
    %30 = vector.shape_cast %29 : vector<1x128x32xbf16> to vector<128x32xbf16>
    %c0_39 = arith.constant 0 : index
    %c0_40 = arith.constant 0 : index
    %31 = vector.load %arg14[%c0_39, %c0_40] : memref<32x32xbf16, #tpu.memory_space<vmem>>, vector<32x32xbf16>
    %c0_41 = arith.constant 0 : index
    %c0_42 = arith.constant 0 : index
    %32 = vector.load %arg15[%c0_41, %c0_42] : memref<2x32xf32, #tpu.memory_space<vmem>>, vector<2x32xf32>
    %33 = vector.extract_strided_slice %32 {offsets = [0, 0], sizes = [1, 32], strides = [1, 1]} : vector<2x32xf32> to vector<1x32xf32>
    %34 = vector.extract_strided_slice %32 {offsets = [1, 0], sizes = [1, 32], strides = [1, 1]} : vector<2x32xf32> to vector<1x32xf32>
    %c0_43 = arith.constant 0 : index
    %c0_44 = arith.constant 0 : index
    %35 = vector.load %arg16[%c0_43, %c0_44] : memref<1x1xf32, #tpu.memory_space<vmem>>, vector<1x1xf32>
    %cst_45 = arith.constant 0.000000e+00 : f32
    %36 = vector.broadcast %cst_45 : f32 to vector<2x8x32xf32>
    %cst_46 = arith.constant 1.000000e+00 : f32
    %37 = vector.broadcast %cst_46 : f32 to vector<2x1xf32>
    %cst_47 = arith.constant 0.000000e+00 : f32
    %38 = vector.broadcast %cst_47 : f32 to vector<2x1xf32>
    %cst_48 = arith.constant 0.000000e+00 : f32
    %39 = vector.broadcast %cst_48 : f32 to vector<2x1xf32>
    %cst_49 = arith.constant 0.000000e+00 : f32
    %40 = vector.broadcast %cst_49 : f32 to vector<2x1xf32>
    %c0_i32 = arith.constant 0 : i32
    %41 = vector.shape_cast %0 : vector<2x8x32xf32> to vector<16x32xf32>
    %42 = vector.shape_cast %0 : vector<2x8x32xf32> to vector<16x32xf32>
    %cst_50 = arith.constant dense<0.000000e+00> : vector<16xf32>
    %43 = vector.multi_reduction <add>, %41, %cst_50 [1] : vector<16x32xf32> to vector<16xf32>
    %44 = vector.shape_cast %43 : vector<16xf32> to vector<16x1xf32>
    %cst_51 = arith.constant 3.200000e+01 : f32
    %45 = vector.broadcast %cst_51 : f32 to vector<16x1xf32>
    %46 = arith.divf %44, %45 : vector<16x1xf32>
    %47 = vector.broadcast %46 : vector<16x1xf32> to vector<16x32xf32>
    %48 = arith.subf %41, %47 : vector<16x32xf32>
    %49 = arith.mulf %48, %48 : vector<16x32xf32>
    %cst_52 = arith.constant dense<0.000000e+00> : vector<16xf32>
    %50 = vector.multi_reduction <add>, %49, %cst_52 [1] : vector<16x32xf32> to vector<16xf32>
    %51 = vector.shape_cast %50 : vector<16xf32> to vector<16x1xf32>
    %cst_53 = arith.constant 3.200000e+01 : f32
    %52 = vector.broadcast %cst_53 : f32 to vector<16x1xf32>
    %53 = arith.divf %51, %52 : vector<16x1xf32>
    %54 = vector.broadcast %46 : vector<16x1xf32> to vector<16x32xf32>
    %55 = arith.subf %41, %54 : vector<16x32xf32>
    %cst_54 = arith.constant 9.99999974E-6 : f32
    %56 = vector.broadcast %cst_54 : f32 to vector<16x1xf32>
    %57 = arith.addf %53, %56 : vector<16x1xf32>
    %58 = math.rsqrt %57 : vector<16x1xf32>
    %59 = vector.broadcast %58 : vector<16x1xf32> to vector<16x32xf32>
    %60 = arith.mulf %55, %59 : vector<16x32xf32>
    %61 = vector.broadcast %10 : vector<1x32xf32> to vector<16x32xf32>
    %62 = arith.mulf %60, %61 : vector<16x32xf32>
    %63 = vector.broadcast %11 : vector<1x32xf32> to vector<16x32xf32>
    %64 = arith.addf %62, %63 : vector<16x32xf32>
    %65 = arith.truncf %64 : vector<16x32xf32> to vector<16x32xbf16>
    %cst_55 = arith.constant dense<0.000000e+00> : vector<16xf32>
    %66 = vector.multi_reduction <add>, %42, %cst_55 [1] : vector<16x32xf32> to vector<16xf32>
    %67 = vector.shape_cast %66 : vector<16xf32> to vector<16x1xf32>
    %cst_56 = arith.constant 3.200000e+01 : f32
    %68 = vector.broadcast %cst_56 : f32 to vector<16x1xf32>
    %69 = arith.divf %67, %68 : vector<16x1xf32>
    %70 = vector.broadcast %69 : vector<16x1xf32> to vector<16x32xf32>
    %71 = arith.subf %42, %70 : vector<16x32xf32>
    %72 = arith.mulf %71, %71 : vector<16x32xf32>
    %cst_57 = arith.constant dense<0.000000e+00> : vector<16xf32>
    %73 = vector.multi_reduction <add>, %72, %cst_57 [1] : vector<16x32xf32> to vector<16xf32>
    %74 = vector.shape_cast %73 : vector<16xf32> to vector<16x1xf32>
    %cst_58 = arith.constant 3.200000e+01 : f32
    %75 = vector.broadcast %cst_58 : f32 to vector<16x1xf32>
    %76 = arith.divf %74, %75 : vector<16x1xf32>
    %77 = vector.broadcast %69 : vector<16x1xf32> to vector<16x32xf32>
    %78 = arith.subf %42, %77 : vector<16x32xf32>
    %cst_59 = arith.constant 9.99999974E-6 : f32
    %79 = vector.broadcast %cst_59 : f32 to vector<16x1xf32>
    %80 = arith.addf %76, %79 : vector<16x1xf32>
    %81 = math.rsqrt %80 : vector<16x1xf32>
    %82 = vector.broadcast %81 : vector<16x1xf32> to vector<16x32xf32>
    %83 = arith.mulf %78, %82 : vector<16x32xf32>
    %84 = vector.broadcast %12 : vector<1x32xf32> to vector<16x32xf32>
    %85 = arith.mulf %83, %84 : vector<16x32xf32>
    %86 = vector.broadcast %13 : vector<1x32xf32> to vector<16x32xf32>
    %87 = arith.addf %85, %86 : vector<16x32xf32>
    %88 = arith.truncf %87 : vector<16x32xf32> to vector<16x32xbf16>
    %cst_60 = arith.constant dense<0.000000e+00> : vector<16x32xf32>
    %89 = tpu.matmul %65, %20, %cst_60 {dimension_numbers = #tpu.dot_dimension_numbers<[1], [0], [0], [1], [0, 0, 1, 1], [], []>} : vector<16x32xbf16>, vector<32x32xbf16>, vector<16x32xf32> -> vector<16x32xf32>
    %90 = vector.shape_cast %89 : vector<16x32xf32> to vector<2x8x32xf32>
    %cst_61 = arith.constant dense<0.000000e+00> : vector<16x32xf32>
    %91 = tpu.matmul %88, %22, %cst_61 {dimension_numbers = #tpu.dot_dimension_numbers<[1], [0], [0], [1], [0, 0, 1, 1], [], []>} : vector<16x32xbf16>, vector<32x32xbf16>, vector<16x32xf32> -> vector<16x32xf32>
    %92 = vector.shape_cast %91 : vector<16x32xf32> to vector<2x8x32xf32>
    %cst_62 = arith.constant dense<0.000000e+00> : vector<16x32xf32>
    %93 = tpu.matmul %88, %24, %cst_62 {dimension_numbers = #tpu.dot_dimension_numbers<[1], [0], [0], [1], [0, 0, 1, 1], [], []>} : vector<16x32xbf16>, vector<32x32xbf16>, vector<16x32xf32> -> vector<16x32xf32>
    %94 = vector.shape_cast %93 : vector<16x32xf32> to vector<2x8x32xf32>
    "tpu.trace_start"() <{level = 10 : i32, message = "bqd,bkd->bqk"}> : () -> ()
    %cst_63 = arith.constant dense<0.000000e+00> : vector<2x8x8xf32>
    %95 = tpu.matmul %90, %92, %cst_63 {dimension_numbers = #tpu.dot_dimension_numbers<[2], [2], [1], [1], [0, 0, 0, 1, 1, 1], [0], [0]>} : vector<2x8x32xf32>, vector<2x8x32xf32>, vector<2x8x8xf32> -> vector<2x8x8xf32>
    "tpu.trace_stop"() : () -> ()
    %cst_64 = arith.constant 0.176776692 : f32
    %96 = vector.broadcast %cst_64 : f32 to vector<2x8x8xf32>
    %97 = arith.mulf %95, %96 : vector<2x8x8xf32>
    %98 = vector.broadcast %2 : vector<2x1x8xf32> to vector<2x8x8xf32>
    %99 = arith.addf %97, %98 : vector<2x8x8xf32>
    %100 = vector.shape_cast %5 : vector<2x8x32xf32> to vector<16x32xf32>
    %cst_65 = arith.constant dense<0.000000e+00> : vector<16xf32>
    %101 = vector.multi_reduction <add>, %100, %cst_65 [1] : vector<16x32xf32> to vector<16xf32>
    %102 = vector.shape_cast %101 : vector<16xf32> to vector<16x1xf32>
    %cst_66 = arith.constant 3.200000e+01 : f32
    %103 = vector.broadcast %cst_66 : f32 to vector<16x1xf32>
    %104 = arith.divf %102, %103 : vector<16x1xf32>
    %105 = vector.broadcast %104 : vector<16x1xf32> to vector<16x32xf32>
    %106 = arith.subf %100, %105 : vector<16x32xf32>
    %107 = arith.mulf %106, %106 : vector<16x32xf32>
    %cst_67 = arith.constant dense<0.000000e+00> : vector<16xf32>
    %108 = vector.multi_reduction <add>, %107, %cst_67 [1] : vector<16x32xf32> to vector<16xf32>
    %109 = vector.shape_cast %108 : vector<16xf32> to vector<16x1xf32>
    %cst_68 = arith.constant 3.200000e+01 : f32
    %110 = vector.broadcast %cst_68 : f32 to vector<16x1xf32>
    %111 = arith.divf %109, %110 : vector<16x1xf32>
    %112 = vector.broadcast %104 : vector<16x1xf32> to vector<16x32xf32>
    %113 = arith.subf %100, %112 : vector<16x32xf32>
    %cst_69 = arith.constant 9.99999974E-6 : f32
    %114 = vector.broadcast %cst_69 : f32 to vector<16x1xf32>
    %115 = arith.addf %111, %114 : vector<16x1xf32>
    %116 = math.rsqrt %115 : vector<16x1xf32>
    %117 = vector.broadcast %116 : vector<16x1xf32> to vector<16x32xf32>
    %118 = arith.mulf %113, %117 : vector<16x32xf32>
    %119 = vector.broadcast %12 : vector<1x32xf32> to vector<16x32xf32>
    %120 = arith.mulf %118, %119 : vector<16x32xf32>
    %121 = vector.broadcast %13 : vector<1x32xf32> to vector<16x32xf32>
    %122 = arith.addf %120, %121 : vector<16x32xf32>
    %123 = arith.truncf %122 : vector<16x32xf32> to vector<16x32xbf16>
    %cst_70 = arith.constant dense<0.000000e+00> : vector<16x32xf32>
    %124 = tpu.matmul %123, %22, %cst_70 {dimension_numbers = #tpu.dot_dimension_numbers<[1], [0], [0], [1], [0, 0, 1, 1], [], []>} : vector<16x32xbf16>, vector<32x32xbf16>, vector<16x32xf32> -> vector<16x32xf32>
    %125 = vector.shape_cast %124 : vector<16x32xf32> to vector<2x8x32xf32>
    %cst_71 = arith.constant dense<0.000000e+00> : vector<16x32xf32>
    %126 = tpu.matmul %123, %24, %cst_71 {dimension_numbers = #tpu.dot_dimension_numbers<[1], [0], [0], [1], [0, 0, 1, 1], [], []>} : vector<16x32xbf16>, vector<32x32xbf16>, vector<16x32xf32> -> vector<16x32xf32>
    %127 = vector.shape_cast %126 : vector<16x32xf32> to vector<2x8x32xf32>
    "tpu.trace_start"() <{level = 10 : i32, message = "bqd,bkd->bqk"}> : () -> ()
    %cst_72 = arith.constant dense<0.000000e+00> : vector<2x8x8xf32>
    %128 = tpu.matmul %90, %125, %cst_72 {dimension_numbers = #tpu.dot_dimension_numbers<[2], [2], [1], [1], [0, 0, 0, 1, 1, 1], [0], [0]>} : vector<2x8x32xf32>, vector<2x8x32xf32>, vector<2x8x8xf32> -> vector<2x8x8xf32>
    "tpu.trace_stop"() : () -> ()
    %cst_73 = arith.constant 0.176776692 : f32
    %129 = vector.broadcast %cst_73 : f32 to vector<2x8x8xf32>
    %130 = arith.mulf %128, %129 : vector<2x8x8xf32>
    %cst_74 = arith.constant dense<0xFF800000> : vector<2x8xf32>
    %131 = vector.multi_reduction <maximumf>, %99, %cst_74 [2] : vector<2x8x8xf32> to vector<2x8xf32>
    %132 = vector.shape_cast %131 : vector<2x8xf32> to vector<2x8x1xf32>
    %cst_75 = arith.constant dense<0xFF800000> : vector<2x8xf32>
    %133 = vector.multi_reduction <maximumf>, %130, %cst_75 [2] : vector<2x8x8xf32> to vector<2x8xf32>
    %134 = vector.shape_cast %133 : vector<2x8xf32> to vector<2x8x1xf32>
    %135 = arith.maximumf %132, %134 : vector<2x8x1xf32>
    %136 = vector.broadcast %135 : vector<2x8x1xf32> to vector<2x8x8xf32>
    %137 = arith.subf %99, %136 : vector<2x8x8xf32>
    %138 = math.exp %137 : vector<2x8x8xf32>
    %139 = vector.broadcast %135 : vector<2x8x1xf32> to vector<2x8x8xf32>
    %140 = arith.subf %130, %139 : vector<2x8x8xf32>
    %141 = math.exp %140 : vector<2x8x8xf32>
    %cst_76 = arith.constant dense<0.000000e+00> : vector<2x8xf32>
    %142 = vector.multi_reduction <add>, %138, %cst_76 [2] : vector<2x8x8xf32> to vector<2x8xf32>
    %143 = vector.shape_cast %142 : vector<2x8xf32> to vector<2x8x1xf32>
    %cst_77 = arith.constant dense<0.000000e+00> : vector<2x8xf32>
    %144 = vector.multi_reduction <add>, %141, %cst_77 [2] : vector<2x8x8xf32> to vector<2x8xf32>
    %145 = vector.shape_cast %144 : vector<2x8xf32> to vector<2x8x1xf32>
    %146 = arith.addf %143, %145 : vector<2x8x1xf32>
    %147 = tpu.reciprocal %146 {approx = true} : vector<2x8x1xf32> -> vector<2x8x1xf32>
    "tpu.trace_start"() <{level = 10 : i32, message = "bqk,bkd->bqd"}> : () -> ()
    %cst_78 = arith.constant dense<0.000000e+00> : vector<2x8x32xf32>
    %148 = tpu.matmul %138, %94, %cst_78 {dimension_numbers = #tpu.dot_dimension_numbers<[2], [1], [1], [2], [0, 0, 0, 1, 1, 2], [0], [0]>} : vector<2x8x8xf32>, vector<2x8x32xf32>, vector<2x8x32xf32> -> vector<2x8x32xf32>
    %cst_79 = arith.constant dense<0.000000e+00> : vector<2x8x32xf32>
    %149 = tpu.matmul %141, %127, %cst_79 {dimension_numbers = #tpu.dot_dimension_numbers<[2], [1], [1], [2], [0, 0, 0, 1, 1, 2], [0], [0]>} : vector<2x8x8xf32>, vector<2x8x32xf32>, vector<2x8x32xf32> -> vector<2x8x32xf32>
    "tpu.trace_stop"() : () -> ()
    %150 = arith.addf %148, %149 : vector<2x8x32xf32>
    %151 = vector.broadcast %147 : vector<2x8x1xf32> to vector<2x8x32xf32>
    %152 = arith.mulf %150, %151 : vector<2x8x32xf32>
    %153 = vector.shape_cast %152 : vector<2x8x32xf32> to vector<16x32xf32>
    %154 = arith.truncf %153 : vector<16x32xf32> to vector<16x32xbf16>
    %cst_80 = arith.constant dense<0.000000e+00> : vector<16x32xf32>
    %155 = tpu.matmul %154, %26, %cst_80 {dimension_numbers = #tpu.dot_dimension_numbers<[1], [0], [0], [1], [0, 0, 1, 1], [], []>} : vector<16x32xbf16>, vector<32x32xbf16>, vector<16x32xf32> -> vector<16x32xf32>
    %156 = arith.addf %41, %155 : vector<16x32xf32>
    %cst_81 = arith.constant dense<0.000000e+00> : vector<16xf32>
    %157 = vector.multi_reduction <add>, %156, %cst_81 [1] : vector<16x32xf32> to vector<16xf32>
    %158 = vector.shape_cast %157 : vector<16xf32> to vector<16x1xf32>
    %cst_82 = arith.constant 3.200000e+01 : f32
    %159 = vector.broadcast %cst_82 : f32 to vector<16x1xf32>
    %160 = arith.divf %158, %159 : vector<16x1xf32>
    %161 = vector.broadcast %160 : vector<16x1xf32> to vector<16x32xf32>
    %162 = arith.subf %156, %161 : vector<16x32xf32>
    %163 = arith.mulf %162, %162 : vector<16x32xf32>
    %cst_83 = arith.constant dense<0.000000e+00> : vector<16xf32>
    %164 = vector.multi_reduction <add>, %163, %cst_83 [1] : vector<16x32xf32> to vector<16xf32>
    %165 = vector.shape_cast %164 : vector<16xf32> to vector<16x1xf32>
    %cst_84 = arith.constant 3.200000e+01 : f32
    %166 = vector.broadcast %cst_84 : f32 to vector<16x1xf32>
    %167 = arith.divf %165, %166 : vector<16x1xf32>
    %168 = vector.broadcast %160 : vector<16x1xf32> to vector<16x32xf32>
    %169 = arith.subf %156, %168 : vector<16x32xf32>
    %cst_85 = arith.constant 9.99999974E-6 : f32
    %170 = vector.broadcast %cst_85 : f32 to vector<16x1xf32>
    %171 = arith.addf %167, %170 : vector<16x1xf32>
    %172 = math.rsqrt %171 : vector<16x1xf32>
    %173 = vector.broadcast %172 : vector<16x1xf32> to vector<16x32xf32>
    %174 = arith.mulf %169, %173 : vector<16x32xf32>
    %175 = vector.broadcast %14 : vector<1x32xf32> to vector<16x32xf32>
    %176 = arith.mulf %174, %175 : vector<16x32xf32>
    %177 = vector.broadcast %15 : vector<1x32xf32> to vector<16x32xf32>
    %178 = arith.addf %176, %177 : vector<16x32xf32>
    %179 = arith.truncf %178 : vector<16x32xf32> to vector<16x32xbf16>
    %cst_86 = arith.constant dense<0.000000e+00> : vector<16x128xf32>
    %180 = tpu.matmul %179, %28, %cst_86 {dimension_numbers = #tpu.dot_dimension_numbers<[1], [0], [0], [1], [0, 0, 1, 1], [], []>} : vector<16x32xbf16>, vector<32x128xbf16>, vector<16x128xf32> -> vector<16x128xf32>
    %181 = vector.broadcast %18 : vector<1x128xf32> to vector<16x128xf32>
    %182 = arith.addf %180, %181 : vector<16x128xf32>
    %183 = arith.mulf %182, %182 : vector<16x128xf32>
    %184 = arith.mulf %182, %183 : vector<16x128xf32>
    %cst_87 = arith.constant 4.471500e-02 : f32
    %185 = vector.broadcast %cst_87 : f32 to vector<16x128xf32>
    %186 = arith.mulf %185, %184 : vector<16x128xf32>
    %187 = arith.addf %182, %186 : vector<16x128xf32>
    %cst_88 = arith.constant 0.797884583 : f32
    %188 = vector.broadcast %cst_88 : f32 to vector<16x128xf32>
    %189 = arith.mulf %188, %187 : vector<16x128xf32>
    %190 = math.tanh %189 : vector<16x128xf32>
    %cst_89 = arith.constant 1.000000e+00 : f32
    %191 = vector.broadcast %cst_89 : f32 to vector<16x128xf32>
    %192 = arith.addf %191, %190 : vector<16x128xf32>
    %cst_90 = arith.constant 5.000000e-01 : f32
    %193 = vector.broadcast %cst_90 : f32 to vector<16x128xf32>
    %194 = arith.mulf %193, %192 : vector<16x128xf32>
    %195 = arith.mulf %182, %194 : vector<16x128xf32>
    %196 = arith.truncf %195 : vector<16x128xf32> to vector<16x128xbf16>
    %cst_91 = arith.constant dense<0.000000e+00> : vector<16x32xf32>
    %197 = tpu.matmul %196, %30, %cst_91 {dimension_numbers = #tpu.dot_dimension_numbers<[1], [0], [0], [1], [0, 0, 1, 1], [], []>} : vector<16x128xbf16>, vector<128x32xbf16>, vector<16x32xf32> -> vector<16x32xf32>
    %198 = vector.broadcast %16 : vector<1x32xf32> to vector<16x32xf32>
    %199 = arith.addf %197, %198 : vector<16x32xf32>
    %200 = arith.addf %156, %199 : vector<16x32xf32>
    %201 = vector.shape_cast %200 : vector<16x32xf32> to vector<2x8x32xf32>
    %202 = vector.broadcast %1 : vector<2x8x1xf32> to vector<2x8x32xf32>
    %203 = arith.mulf %0, %202 : vector<2x8x32xf32>
    %cst_92 = arith.constant dense<0.000000e+00> : vector<2x32xf32>
    %204 = vector.multi_reduction <add>, %203, %cst_92 [1] : vector<2x8x32xf32> to vector<2x32xf32>
    %205 = vector.broadcast %7 : vector<2x1xf32> to vector<2x32xf32>
    %206 = arith.mulf %204, %205 : vector<2x32xf32>
    %207 = arith.truncf %206 : vector<2x32xf32> to vector<2x32xbf16>
    %cst_93 = arith.constant dense<0.000000e+00> : vector<2x32xf32>
    %208 = tpu.matmul %207, %31, %cst_93 {dimension_numbers = #tpu.dot_dimension_numbers<[1], [0], [0], [1], [0, 0, 1, 1], [], []>} : vector<2x32xbf16>, vector<32x32xbf16>, vector<2x32xf32> -> vector<2x32xf32>
    %209 = vector.broadcast %33 : vector<1x32xf32> to vector<2x32xf32>
    %210 = arith.addf %208, %209 : vector<2x32xf32>
    %211 = arith.mulf %210, %210 : vector<2x32xf32>
    %212 = arith.mulf %210, %211 : vector<2x32xf32>
    %cst_94 = arith.constant 4.471500e-02 : f32
    %213 = vector.broadcast %cst_94 : f32 to vector<2x32xf32>
    %214 = arith.mulf %213, %212 : vector<2x32xf32>
    %215 = arith.addf %210, %214 : vector<2x32xf32>
    %cst_95 = arith.constant 0.797884583 : f32
    %216 = vector.broadcast %cst_95 : f32 to vector<2x32xf32>
    %217 = arith.mulf %216, %215 : vector<2x32xf32>
    %218 = math.tanh %217 : vector<2x32xf32>
    %cst_96 = arith.constant 1.000000e+00 : f32
    %219 = vector.broadcast %cst_96 : f32 to vector<2x32xf32>
    %220 = arith.addf %219, %218 : vector<2x32xf32>
    %cst_97 = arith.constant 5.000000e-01 : f32
    %221 = vector.broadcast %cst_97 : f32 to vector<2x32xf32>
    %222 = arith.mulf %221, %220 : vector<2x32xf32>
    %223 = arith.mulf %210, %222 : vector<2x32xf32>
    %224 = vector.broadcast %34 : vector<1x32xf32> to vector<2x32xf32>
    %225 = arith.mulf %223, %224 : vector<2x32xf32>
    %cst_98 = arith.constant dense<0.000000e+00> : vector<2xf32>
    %226 = vector.multi_reduction <add>, %225, %cst_98 [1] : vector<2x32xf32> to vector<2xf32>
    %227 = vector.shape_cast %226 : vector<2xf32> to vector<2x1xf32>
    %228 = vector.broadcast %35 : vector<1x1xf32> to vector<2x1xf32>
    %229 = arith.addf %227, %228 : vector<2x1xf32>
    %230 = arith.negf %229 : vector<2x1xf32>
    %231 = math.exp %230 : vector<2x1xf32>
    %cst_99 = arith.constant 1.000000e+00 : f32
    %232 = vector.broadcast %cst_99 : f32 to vector<2x1xf32>
    %233 = arith.addf %232, %231 : vector<2x1xf32>
    %234 = arith.divf %232, %233 : vector<2x1xf32>
    %235 = arith.sitofp %c0_i32 : i32 to f32
    %cst_100 = arith.constant 1.000000e+00 : f32
    %236 = vector.broadcast %cst_100 : f32 to vector<2x1xf32>
    %237 = arith.addf %3, %236 : vector<2x1xf32>
    %238 = vector.broadcast %235 : f32 to vector<2x1xf32>
    %239 = arith.cmpf oge, %238, %237 : vector<2x1xf32>
    %cst_101 = arith.constant 1.000000e+00 : f32
    %cst_102 = arith.constant 0.000000e+00 : f32
    %240 = vector.broadcast %cst_101 : f32 to vector<2x1xf32>
    %241 = vector.broadcast %cst_102 : f32 to vector<2x1xf32>
    %242 = arith.select %239, %240, %241 : vector<2x1xi1>, vector<2x1xf32>
    %243 = arith.mulf %37, %234 : vector<2x1xf32>
    %244 = vector.shape_cast %243 : vector<2x1xf32> to vector<2x1x1xf32>
    %245 = vector.broadcast %244 : vector<2x1x1xf32> to vector<2x8x32xf32>
    %246 = arith.mulf %245, %0 : vector<2x8x32xf32>
    %247 = arith.addf %246, %36 : vector<2x8x32xf32>
    %248 = arith.addf %38, %243 : vector<2x1xf32>
    %cst_103 = arith.constant 1.000000e+00 : f32
    %249 = vector.broadcast %cst_103 : f32 to vector<2x1xf32>
    %250 = arith.subf %249, %234 : vector<2x1xf32>
    %251 = arith.mulf %37, %250 : vector<2x1xf32>
    %cst_104 = arith.constant 1.000000e+00 : f32
    %252 = arith.addf %235, %cst_104 : f32
    %253 = vector.broadcast %252 : f32 to vector<2x1xf32>
    %254 = arith.mulf %243, %253 : vector<2x1xf32>
    %255 = arith.addf %254, %39 : vector<2x1xf32>
    %cst_105 = arith.constant 1.000000e+00 : f32
    %256 = vector.broadcast %cst_105 : f32 to vector<2x1xf32>
    %257 = arith.subf %256, %248 : vector<2x1xf32>
    %cst_106 = arith.constant 1.000000e+00 : f32
    %258 = arith.addf %235, %cst_106 : f32
    %259 = vector.broadcast %258 : f32 to vector<2x1xf32>
    %260 = arith.mulf %257, %259 : vector<2x1xf32>
    %cst_107 = arith.constant 1.000000e+00 : f32
    %261 = vector.broadcast %cst_107 : f32 to vector<2x1xf32>
    %262 = arith.subf %261, %248 : vector<2x1xf32>
    %263 = vector.shape_cast %262 : vector<2x1xf32> to vector<2x1x1xf32>
    %264 = vector.broadcast %263 : vector<2x1x1xf32> to vector<2x8x32xf32>
    %265 = arith.mulf %264, %201 : vector<2x8x32xf32>
    %266 = arith.addf %265, %247 : vector<2x8x32xf32>
    %cst_108 = arith.constant 9.990000e-01 : f32
    %267 = vector.broadcast %cst_108 : f32 to vector<2x1xf32>
    %268 = arith.cmpf oge, %248, %267 : vector<2x1xf32>
    %cst_109 = arith.constant 0.000000e+00 : f32
    %cst_110 = arith.constant 1.000000e+00 : f32
    %269 = vector.broadcast %cst_109 : f32 to vector<2x1xf32>
    %270 = vector.broadcast %cst_110 : f32 to vector<2x1xf32>
    %271 = arith.select %268, %269, %270 : vector<2x1xi1>, vector<2x1xf32>
    %cst_111 = arith.constant 1.000000e+00 : f32
    %272 = vector.broadcast %cst_111 : f32 to vector<2x1xf32>
    %273 = arith.subf %272, %242 : vector<2x1xf32>
    %274 = arith.mulf %271, %273 : vector<2x1xf32>
    %275 = vector.shape_cast %274 : vector<2x1xf32> to vector<2x1x1xf32>
    %cst_112 = arith.constant 0.000000e+00 : f32
    %276 = vector.broadcast %cst_112 : f32 to vector<2x1x1xf32>
    %277 = arith.cmpf ogt, %275, %276 : vector<2x1x1xf32>
    %278 = vector.shape_cast %277 : vector<2x1x1xi1> to vector<2x1x1xi1>
    %279 = vector.broadcast %278 : vector<2x1x1xi1> to vector<2x8x32xi1>
    %280 = arith.select %279, %201, %0 : vector<2x8x32xi1>, vector<2x8x32xf32>
    %cst_113 = arith.constant 0.000000e+00 : f32
    %281 = vector.broadcast %cst_113 : f32 to vector<2x1x1xf32>
    %282 = arith.cmpf ogt, %275, %281 : vector<2x1x1xf32>
    %283 = vector.shape_cast %282 : vector<2x1x1xi1> to vector<2x1x1xi1>
    %284 = vector.broadcast %283 : vector<2x1x1xi1> to vector<2x8x32xi1>
    %285 = arith.select %284, %266, %0 : vector<2x8x32xi1>, vector<2x8x32xf32>
    %cst_114 = arith.constant 0.000000e+00 : f32
    %286 = vector.broadcast %cst_114 : f32 to vector<2x1xf32>
    %287 = arith.cmpf ogt, %274, %286 : vector<2x1xf32>
    %288 = arith.select %287, %255, %39 : vector<2x1xi1>, vector<2x1xf32>
    %cst_115 = arith.constant 0.000000e+00 : f32
    %289 = vector.broadcast %cst_115 : f32 to vector<2x1xf32>
    %290 = arith.cmpf ogt, %274, %289 : vector<2x1xf32>
    %291 = arith.select %290, %260, %40 : vector<2x1xi1>, vector<2x1xf32>
    %c1_i32 = arith.constant 1 : i32
    %292 = vector.shape_cast %280 : vector<2x8x32xf32> to vector<16x32xf32>
    %293 = vector.shape_cast %280 : vector<2x8x32xf32> to vector<16x32xf32>
    %cst_116 = arith.constant dense<0.000000e+00> : vector<16xf32>
    %294 = vector.multi_reduction <add>, %292, %cst_116 [1] : vector<16x32xf32> to vector<16xf32>
    %295 = vector.shape_cast %294 : vector<16xf32> to vector<16x1xf32>
    %cst_117 = arith.constant 3.200000e+01 : f32
    %296 = vector.broadcast %cst_117 : f32 to vector<16x1xf32>
    %297 = arith.divf %295, %296 : vector<16x1xf32>
    %298 = vector.broadcast %297 : vector<16x1xf32> to vector<16x32xf32>
    %299 = arith.subf %292, %298 : vector<16x32xf32>
    %300 = arith.mulf %299, %299 : vector<16x32xf32>
    %cst_118 = arith.constant dense<0.000000e+00> : vector<16xf32>
    %301 = vector.multi_reduction <add>, %300, %cst_118 [1] : vector<16x32xf32> to vector<16xf32>
    %302 = vector.shape_cast %301 : vector<16xf32> to vector<16x1xf32>
    %cst_119 = arith.constant 3.200000e+01 : f32
    %303 = vector.broadcast %cst_119 : f32 to vector<16x1xf32>
    %304 = arith.divf %302, %303 : vector<16x1xf32>
    %305 = vector.broadcast %297 : vector<16x1xf32> to vector<16x32xf32>
    %306 = arith.subf %292, %305 : vector<16x32xf32>
    %cst_120 = arith.constant 9.99999974E-6 : f32
    %307 = vector.broadcast %cst_120 : f32 to vector<16x1xf32>
    %308 = arith.addf %304, %307 : vector<16x1xf32>
    %309 = math.rsqrt %308 : vector<16x1xf32>
    %310 = vector.broadcast %309 : vector<16x1xf32> to vector<16x32xf32>
    %311 = arith.mulf %306, %310 : vector<16x32xf32>
    %312 = vector.broadcast %10 : vector<1x32xf32> to vector<16x32xf32>
    %313 = arith.mulf %311, %312 : vector<16x32xf32>
    %314 = vector.broadcast %11 : vector<1x32xf32> to vector<16x32xf32>
    %315 = arith.addf %313, %314 : vector<16x32xf32>
    %316 = arith.truncf %315 : vector<16x32xf32> to vector<16x32xbf16>
    %cst_121 = arith.constant dense<0.000000e+00> : vector<16xf32>
    %317 = vector.multi_reduction <add>, %293, %cst_121 [1] : vector<16x32xf32> to vector<16xf32>
    %318 = vector.shape_cast %317 : vector<16xf32> to vector<16x1xf32>
    %cst_122 = arith.constant 3.200000e+01 : f32
    %319 = vector.broadcast %cst_122 : f32 to vector<16x1xf32>
    %320 = arith.divf %318, %319 : vector<16x1xf32>
    %321 = vector.broadcast %320 : vector<16x1xf32> to vector<16x32xf32>
    %322 = arith.subf %293, %321 : vector<16x32xf32>
    %323 = arith.mulf %322, %322 : vector<16x32xf32>
    %cst_123 = arith.constant dense<0.000000e+00> : vector<16xf32>
    %324 = vector.multi_reduction <add>, %323, %cst_123 [1] : vector<16x32xf32> to vector<16xf32>
    %325 = vector.shape_cast %324 : vector<16xf32> to vector<16x1xf32>
    %cst_124 = arith.constant 3.200000e+01 : f32
    %326 = vector.broadcast %cst_124 : f32 to vector<16x1xf32>
    %327 = arith.divf %325, %326 : vector<16x1xf32>
    %328 = vector.broadcast %320 : vector<16x1xf32> to vector<16x32xf32>
    %329 = arith.subf %293, %328 : vector<16x32xf32>
    %cst_125 = arith.constant 9.99999974E-6 : f32
    %330 = vector.broadcast %cst_125 : f32 to vector<16x1xf32>
    %331 = arith.addf %327, %330 : vector<16x1xf32>
    %332 = math.rsqrt %331 : vector<16x1xf32>
    %333 = vector.broadcast %332 : vector<16x1xf32> to vector<16x32xf32>
    %334 = arith.mulf %329, %333 : vector<16x32xf32>
    %335 = vector.broadcast %12 : vector<1x32xf32> to vector<16x32xf32>
    %336 = arith.mulf %334, %335 : vector<16x32xf32>
    %337 = vector.broadcast %13 : vector<1x32xf32> to vector<16x32xf32>
    %338 = arith.addf %336, %337 : vector<16x32xf32>
    %339 = arith.truncf %338 : vector<16x32xf32> to vector<16x32xbf16>
    %cst_126 = arith.constant dense<0.000000e+00> : vector<16x32xf32>
    %340 = tpu.matmul %316, %20, %cst_126 {dimension_numbers = #tpu.dot_dimension_numbers<[1], [0], [0], [1], [0, 0, 1, 1], [], []>} : vector<16x32xbf16>, vector<32x32xbf16>, vector<16x32xf32> -> vector<16x32xf32>
    %341 = vector.shape_cast %340 : vector<16x32xf32> to vector<2x8x32xf32>
    %cst_127 = arith.constant dense<0.000000e+00> : vector<16x32xf32>
    %342 = tpu.matmul %339, %22, %cst_127 {dimension_numbers = #tpu.dot_dimension_numbers<[1], [0], [0], [1], [0, 0, 1, 1], [], []>} : vector<16x32xbf16>, vector<32x32xbf16>, vector<16x32xf32> -> vector<16x32xf32>
    %343 = vector.shape_cast %342 : vector<16x32xf32> to vector<2x8x32xf32>
    %cst_128 = arith.constant dense<0.000000e+00> : vector<16x32xf32>
    %344 = tpu.matmul %339, %24, %cst_128 {dimension_numbers = #tpu.dot_dimension_numbers<[1], [0], [0], [1], [0, 0, 1, 1], [], []>} : vector<16x32xbf16>, vector<32x32xbf16>, vector<16x32xf32> -> vector<16x32xf32>
    %345 = vector.shape_cast %344 : vector<16x32xf32> to vector<2x8x32xf32>
    "tpu.trace_start"() <{level = 10 : i32, message = "bqd,bkd->bqk"}> : () -> ()
    %cst_129 = arith.constant dense<0.000000e+00> : vector<2x8x8xf32>
    %346 = tpu.matmul %341, %343, %cst_129 {dimension_numbers = #tpu.dot_dimension_numbers<[2], [2], [1], [1], [0, 0, 0, 1, 1, 1], [0], [0]>} : vector<2x8x32xf32>, vector<2x8x32xf32>, vector<2x8x8xf32> -> vector<2x8x8xf32>
    "tpu.trace_stop"() : () -> ()
    %cst_130 = arith.constant 0.176776692 : f32
    %347 = vector.broadcast %cst_130 : f32 to vector<2x8x8xf32>
    %348 = arith.mulf %346, %347 : vector<2x8x8xf32>
    %349 = vector.broadcast %2 : vector<2x1x8xf32> to vector<2x8x8xf32>
    %350 = arith.addf %348, %349 : vector<2x8x8xf32>
    %351 = vector.shape_cast %5 : vector<2x8x32xf32> to vector<16x32xf32>
    %cst_131 = arith.constant dense<0.000000e+00> : vector<16xf32>
    %352 = vector.multi_reduction <add>, %351, %cst_131 [1] : vector<16x32xf32> to vector<16xf32>
    %353 = vector.shape_cast %352 : vector<16xf32> to vector<16x1xf32>
    %cst_132 = arith.constant 3.200000e+01 : f32
    %354 = vector.broadcast %cst_132 : f32 to vector<16x1xf32>
    %355 = arith.divf %353, %354 : vector<16x1xf32>
    %356 = vector.broadcast %355 : vector<16x1xf32> to vector<16x32xf32>
    %357 = arith.subf %351, %356 : vector<16x32xf32>
    %358 = arith.mulf %357, %357 : vector<16x32xf32>
    %cst_133 = arith.constant dense<0.000000e+00> : vector<16xf32>
    %359 = vector.multi_reduction <add>, %358, %cst_133 [1] : vector<16x32xf32> to vector<16xf32>
    %360 = vector.shape_cast %359 : vector<16xf32> to vector<16x1xf32>
    %cst_134 = arith.constant 3.200000e+01 : f32
    %361 = vector.broadcast %cst_134 : f32 to vector<16x1xf32>
    %362 = arith.divf %360, %361 : vector<16x1xf32>
    %363 = vector.broadcast %355 : vector<16x1xf32> to vector<16x32xf32>
    %364 = arith.subf %351, %363 : vector<16x32xf32>
    %cst_135 = arith.constant 9.99999974E-6 : f32
    %365 = vector.broadcast %cst_135 : f32 to vector<16x1xf32>
    %366 = arith.addf %362, %365 : vector<16x1xf32>
    %367 = math.rsqrt %366 : vector<16x1xf32>
    %368 = vector.broadcast %367 : vector<16x1xf32> to vector<16x32xf32>
    %369 = arith.mulf %364, %368 : vector<16x32xf32>
    %370 = vector.broadcast %12 : vector<1x32xf32> to vector<16x32xf32>
    %371 = arith.mulf %369, %370 : vector<16x32xf32>
    %372 = vector.broadcast %13 : vector<1x32xf32> to vector<16x32xf32>
    %373 = arith.addf %371, %372 : vector<16x32xf32>
    %374 = arith.truncf %373 : vector<16x32xf32> to vector<16x32xbf16>
    %cst_136 = arith.constant dense<0.000000e+00> : vector<16x32xf32>
    %375 = tpu.matmul %374, %22, %cst_136 {dimension_numbers = #tpu.dot_dimension_numbers<[1], [0], [0], [1], [0, 0, 1, 1], [], []>} : vector<16x32xbf16>, vector<32x32xbf16>, vector<16x32xf32> -> vector<16x32xf32>
    %376 = vector.shape_cast %375 : vector<16x32xf32> to vector<2x8x32xf32>
    %cst_137 = arith.constant dense<0.000000e+00> : vector<16x32xf32>
    %377 = tpu.matmul %374, %24, %cst_137 {dimension_numbers = #tpu.dot_dimension_numbers<[1], [0], [0], [1], [0, 0, 1, 1], [], []>} : vector<16x32xbf16>, vector<32x32xbf16>, vector<16x32xf32> -> vector<16x32xf32>
    %378 = vector.shape_cast %377 : vector<16x32xf32> to vector<2x8x32xf32>
    "tpu.trace_start"() <{level = 10 : i32, message = "bqd,bkd->bqk"}> : () -> ()
    %cst_138 = arith.constant dense<0.000000e+00> : vector<2x8x8xf32>
    %379 = tpu.matmul %341, %376, %cst_138 {dimension_numbers = #tpu.dot_dimension_numbers<[2], [2], [1], [1], [0, 0, 0, 1, 1, 1], [0], [0]>} : vector<2x8x32xf32>, vector<2x8x32xf32>, vector<2x8x8xf32> -> vector<2x8x8xf32>
    "tpu.trace_stop"() : () -> ()
    %cst_139 = arith.constant 0.176776692 : f32
    %380 = vector.broadcast %cst_139 : f32 to vector<2x8x8xf32>
    %381 = arith.mulf %379, %380 : vector<2x8x8xf32>
    %cst_140 = arith.constant dense<0xFF800000> : vector<2x8xf32>
    %382 = vector.multi_reduction <maximumf>, %350, %cst_140 [2] : vector<2x8x8xf32> to vector<2x8xf32>
    %383 = vector.shape_cast %382 : vector<2x8xf32> to vector<2x8x1xf32>
    %cst_141 = arith.constant dense<0xFF800000> : vector<2x8xf32>
    %384 = vector.multi_reduction <maximumf>, %381, %cst_141 [2] : vector<2x8x8xf32> to vector<2x8xf32>
    %385 = vector.shape_cast %384 : vector<2x8xf32> to vector<2x8x1xf32>
    %386 = arith.maximumf %383, %385 : vector<2x8x1xf32>
    %387 = vector.broadcast %386 : vector<2x8x1xf32> to vector<2x8x8xf32>
    %388 = arith.subf %350, %387 : vector<2x8x8xf32>
    %389 = math.exp %388 : vector<2x8x8xf32>
    %390 = vector.broadcast %386 : vector<2x8x1xf32> to vector<2x8x8xf32>
    %391 = arith.subf %381, %390 : vector<2x8x8xf32>
    %392 = math.exp %391 : vector<2x8x8xf32>
    %cst_142 = arith.constant dense<0.000000e+00> : vector<2x8xf32>
    %393 = vector.multi_reduction <add>, %389, %cst_142 [2] : vector<2x8x8xf32> to vector<2x8xf32>
    %394 = vector.shape_cast %393 : vector<2x8xf32> to vector<2x8x1xf32>
    %cst_143 = arith.constant dense<0.000000e+00> : vector<2x8xf32>
    %395 = vector.multi_reduction <add>, %392, %cst_143 [2] : vector<2x8x8xf32> to vector<2x8xf32>
    %396 = vector.shape_cast %395 : vector<2x8xf32> to vector<2x8x1xf32>
    %397 = arith.addf %394, %396 : vector<2x8x1xf32>
    %398 = tpu.reciprocal %397 {approx = true} : vector<2x8x1xf32> -> vector<2x8x1xf32>
    "tpu.trace_start"() <{level = 10 : i32, message = "bqk,bkd->bqd"}> : () -> ()
    %cst_144 = arith.constant dense<0.000000e+00> : vector<2x8x32xf32>
    %399 = tpu.matmul %389, %345, %cst_144 {dimension_numbers = #tpu.dot_dimension_numbers<[2], [1], [1], [2], [0, 0, 0, 1, 1, 2], [0], [0]>} : vector<2x8x8xf32>, vector<2x8x32xf32>, vector<2x8x32xf32> -> vector<2x8x32xf32>
    %cst_145 = arith.constant dense<0.000000e+00> : vector<2x8x32xf32>
    %400 = tpu.matmul %392, %378, %cst_145 {dimension_numbers = #tpu.dot_dimension_numbers<[2], [1], [1], [2], [0, 0, 0, 1, 1, 2], [0], [0]>} : vector<2x8x8xf32>, vector<2x8x32xf32>, vector<2x8x32xf32> -> vector<2x8x32xf32>
    "tpu.trace_stop"() : () -> ()
    %401 = arith.addf %399, %400 : vector<2x8x32xf32>
    %402 = vector.broadcast %398 : vector<2x8x1xf32> to vector<2x8x32xf32>
    %403 = arith.mulf %401, %402 : vector<2x8x32xf32>
    %404 = vector.shape_cast %403 : vector<2x8x32xf32> to vector<16x32xf32>
    %405 = arith.truncf %404 : vector<16x32xf32> to vector<16x32xbf16>
    %cst_146 = arith.constant dense<0.000000e+00> : vector<16x32xf32>
    %406 = tpu.matmul %405, %26, %cst_146 {dimension_numbers = #tpu.dot_dimension_numbers<[1], [0], [0], [1], [0, 0, 1, 1], [], []>} : vector<16x32xbf16>, vector<32x32xbf16>, vector<16x32xf32> -> vector<16x32xf32>
    %407 = arith.addf %292, %406 : vector<16x32xf32>
    %cst_147 = arith.constant dense<0.000000e+00> : vector<16xf32>
    %408 = vector.multi_reduction <add>, %407, %cst_147 [1] : vector<16x32xf32> to vector<16xf32>
    %409 = vector.shape_cast %408 : vector<16xf32> to vector<16x1xf32>
    %cst_148 = arith.constant 3.200000e+01 : f32
    %410 = vector.broadcast %cst_148 : f32 to vector<16x1xf32>
    %411 = arith.divf %409, %410 : vector<16x1xf32>
    %412 = vector.broadcast %411 : vector<16x1xf32> to vector<16x32xf32>
    %413 = arith.subf %407, %412 : vector<16x32xf32>
    %414 = arith.mulf %413, %413 : vector<16x32xf32>
    %cst_149 = arith.constant dense<0.000000e+00> : vector<16xf32>
    %415 = vector.multi_reduction <add>, %414, %cst_149 [1] : vector<16x32xf32> to vector<16xf32>
    %416 = vector.shape_cast %415 : vector<16xf32> to vector<16x1xf32>
    %cst_150 = arith.constant 3.200000e+01 : f32
    %417 = vector.broadcast %cst_150 : f32 to vector<16x1xf32>
    %418 = arith.divf %416, %417 : vector<16x1xf32>
    %419 = vector.broadcast %411 : vector<16x1xf32> to vector<16x32xf32>
    %420 = arith.subf %407, %419 : vector<16x32xf32>
    %cst_151 = arith.constant 9.99999974E-6 : f32
    %421 = vector.broadcast %cst_151 : f32 to vector<16x1xf32>
    %422 = arith.addf %418, %421 : vector<16x1xf32>
    %423 = math.rsqrt %422 : vector<16x1xf32>
    %424 = vector.broadcast %423 : vector<16x1xf32> to vector<16x32xf32>
    %425 = arith.mulf %420, %424 : vector<16x32xf32>
    %426 = vector.broadcast %14 : vector<1x32xf32> to vector<16x32xf32>
    %427 = arith.mulf %425, %426 : vector<16x32xf32>
    %428 = vector.broadcast %15 : vector<1x32xf32> to vector<16x32xf32>
    %429 = arith.addf %427, %428 : vector<16x32xf32>
    %430 = arith.truncf %429 : vector<16x32xf32> to vector<16x32xbf16>
    %cst_152 = arith.constant dense<0.000000e+00> : vector<16x128xf32>
    %431 = tpu.matmul %430, %28, %cst_152 {dimension_numbers = #tpu.dot_dimension_numbers<[1], [0], [0], [1], [0, 0, 1, 1], [], []>} : vector<16x32xbf16>, vector<32x128xbf16>, vector<16x128xf32> -> vector<16x128xf32>
    %432 = vector.broadcast %18 : vector<1x128xf32> to vector<16x128xf32>
    %433 = arith.addf %431, %432 : vector<16x128xf32>
    %434 = arith.mulf %433, %433 : vector<16x128xf32>
    %435 = arith.mulf %433, %434 : vector<16x128xf32>
    %cst_153 = arith.constant 4.471500e-02 : f32
    %436 = vector.broadcast %cst_153 : f32 to vector<16x128xf32>
    %437 = arith.mulf %436, %435 : vector<16x128xf32>
    %438 = arith.addf %433, %437 : vector<16x128xf32>
    %cst_154 = arith.constant 0.797884583 : f32
    %439 = vector.broadcast %cst_154 : f32 to vector<16x128xf32>
    %440 = arith.mulf %439, %438 : vector<16x128xf32>
    %441 = math.tanh %440 : vector<16x128xf32>
    %cst_155 = arith.constant 1.000000e+00 : f32
    %442 = vector.broadcast %cst_155 : f32 to vector<16x128xf32>
    %443 = arith.addf %442, %441 : vector<16x128xf32>
    %cst_156 = arith.constant 5.000000e-01 : f32
    %444 = vector.broadcast %cst_156 : f32 to vector<16x128xf32>
    %445 = arith.mulf %444, %443 : vector<16x128xf32>
    %446 = arith.mulf %433, %445 : vector<16x128xf32>
    %447 = arith.truncf %446 : vector<16x128xf32> to vector<16x128xbf16>
    %cst_157 = arith.constant dense<0.000000e+00> : vector<16x32xf32>
    %448 = tpu.matmul %447, %30, %cst_157 {dimension_numbers = #tpu.dot_dimension_numbers<[1], [0], [0], [1], [0, 0, 1, 1], [], []>} : vector<16x128xbf16>, vector<128x32xbf16>, vector<16x32xf32> -> vector<16x32xf32>
    %449 = vector.broadcast %16 : vector<1x32xf32> to vector<16x32xf32>
    %450 = arith.addf %448, %449 : vector<16x32xf32>
    %451 = arith.addf %407, %450 : vector<16x32xf32>
    %452 = vector.shape_cast %451 : vector<16x32xf32> to vector<2x8x32xf32>
    %453 = vector.broadcast %1 : vector<2x8x1xf32> to vector<2x8x32xf32>
    %454 = arith.mulf %280, %453 : vector<2x8x32xf32>
    %cst_158 = arith.constant dense<0.000000e+00> : vector<2x32xf32>
    %455 = vector.multi_reduction <add>, %454, %cst_158 [1] : vector<2x8x32xf32> to vector<2x32xf32>
    %456 = vector.broadcast %7 : vector<2x1xf32> to vector<2x32xf32>
    %457 = arith.mulf %455, %456 : vector<2x32xf32>
    %458 = arith.truncf %457 : vector<2x32xf32> to vector<2x32xbf16>
    %cst_159 = arith.constant dense<0.000000e+00> : vector<2x32xf32>
    %459 = tpu.matmul %458, %31, %cst_159 {dimension_numbers = #tpu.dot_dimension_numbers<[1], [0], [0], [1], [0, 0, 1, 1], [], []>} : vector<2x32xbf16>, vector<32x32xbf16>, vector<2x32xf32> -> vector<2x32xf32>
    %460 = vector.broadcast %33 : vector<1x32xf32> to vector<2x32xf32>
    %461 = arith.addf %459, %460 : vector<2x32xf32>
    %462 = arith.mulf %461, %461 : vector<2x32xf32>
    %463 = arith.mulf %461, %462 : vector<2x32xf32>
    %cst_160 = arith.constant 4.471500e-02 : f32
    %464 = vector.broadcast %cst_160 : f32 to vector<2x32xf32>
    %465 = arith.mulf %464, %463 : vector<2x32xf32>
    %466 = arith.addf %461, %465 : vector<2x32xf32>
    %cst_161 = arith.constant 0.797884583 : f32
    %467 = vector.broadcast %cst_161 : f32 to vector<2x32xf32>
    %468 = arith.mulf %467, %466 : vector<2x32xf32>
    %469 = math.tanh %468 : vector<2x32xf32>
    %cst_162 = arith.constant 1.000000e+00 : f32
    %470 = vector.broadcast %cst_162 : f32 to vector<2x32xf32>
    %471 = arith.addf %470, %469 : vector<2x32xf32>
    %cst_163 = arith.constant 5.000000e-01 : f32
    %472 = vector.broadcast %cst_163 : f32 to vector<2x32xf32>
    %473 = arith.mulf %472, %471 : vector<2x32xf32>
    %474 = arith.mulf %461, %473 : vector<2x32xf32>
    %475 = vector.broadcast %34 : vector<1x32xf32> to vector<2x32xf32>
    %476 = arith.mulf %474, %475 : vector<2x32xf32>
    %cst_164 = arith.constant dense<0.000000e+00> : vector<2xf32>
    %477 = vector.multi_reduction <add>, %476, %cst_164 [1] : vector<2x32xf32> to vector<2xf32>
    %478 = vector.shape_cast %477 : vector<2xf32> to vector<2x1xf32>
    %479 = vector.broadcast %35 : vector<1x1xf32> to vector<2x1xf32>
    %480 = arith.addf %478, %479 : vector<2x1xf32>
    %481 = arith.negf %480 : vector<2x1xf32>
    %482 = math.exp %481 : vector<2x1xf32>
    %cst_165 = arith.constant 1.000000e+00 : f32
    %483 = vector.broadcast %cst_165 : f32 to vector<2x1xf32>
    %484 = arith.addf %483, %482 : vector<2x1xf32>
    %485 = arith.divf %483, %484 : vector<2x1xf32>
    %486 = arith.sitofp %c1_i32 : i32 to f32
    %cst_166 = arith.constant 1.000000e+00 : f32
    %487 = vector.broadcast %cst_166 : f32 to vector<2x1xf32>
    %488 = arith.addf %3, %487 : vector<2x1xf32>
    %489 = vector.broadcast %486 : f32 to vector<2x1xf32>
    %490 = arith.cmpf oge, %489, %488 : vector<2x1xf32>
    %cst_167 = arith.constant 1.000000e+00 : f32
    %cst_168 = arith.constant 0.000000e+00 : f32
    %491 = vector.broadcast %cst_167 : f32 to vector<2x1xf32>
    %492 = vector.broadcast %cst_168 : f32 to vector<2x1xf32>
    %493 = arith.select %490, %491, %492 : vector<2x1xi1>, vector<2x1xf32>
    %494 = arith.mulf %251, %485 : vector<2x1xf32>
    %495 = vector.shape_cast %494 : vector<2x1xf32> to vector<2x1x1xf32>
    %496 = vector.broadcast %495 : vector<2x1x1xf32> to vector<2x8x32xf32>
    %497 = arith.mulf %496, %280 : vector<2x8x32xf32>
    %498 = arith.addf %497, %247 : vector<2x8x32xf32>
    %499 = arith.addf %248, %494 : vector<2x1xf32>
    %cst_169 = arith.constant 1.000000e+00 : f32
    %500 = vector.broadcast %cst_169 : f32 to vector<2x1xf32>
    %501 = arith.subf %500, %485 : vector<2x1xf32>
    %502 = arith.mulf %251, %501 : vector<2x1xf32>
    %cst_170 = arith.constant 1.000000e+00 : f32
    %503 = arith.addf %486, %cst_170 : f32
    %504 = vector.broadcast %503 : f32 to vector<2x1xf32>
    %505 = arith.mulf %494, %504 : vector<2x1xf32>
    %506 = arith.addf %505, %288 : vector<2x1xf32>
    %cst_171 = arith.constant 1.000000e+00 : f32
    %507 = vector.broadcast %cst_171 : f32 to vector<2x1xf32>
    %508 = arith.subf %507, %499 : vector<2x1xf32>
    %cst_172 = arith.constant 1.000000e+00 : f32
    %509 = arith.addf %486, %cst_172 : f32
    %510 = vector.broadcast %509 : f32 to vector<2x1xf32>
    %511 = arith.mulf %508, %510 : vector<2x1xf32>
    %cst_173 = arith.constant 1.000000e+00 : f32
    %512 = vector.broadcast %cst_173 : f32 to vector<2x1xf32>
    %513 = arith.subf %512, %499 : vector<2x1xf32>
    %514 = vector.shape_cast %513 : vector<2x1xf32> to vector<2x1x1xf32>
    %515 = vector.broadcast %514 : vector<2x1x1xf32> to vector<2x8x32xf32>
    %516 = arith.mulf %515, %452 : vector<2x8x32xf32>
    %517 = arith.addf %516, %498 : vector<2x8x32xf32>
    %cst_174 = arith.constant 9.990000e-01 : f32
    %518 = vector.broadcast %cst_174 : f32 to vector<2x1xf32>
    %519 = arith.cmpf oge, %499, %518 : vector<2x1xf32>
    %cst_175 = arith.constant 0.000000e+00 : f32
    %cst_176 = arith.constant 1.000000e+00 : f32
    %520 = vector.broadcast %cst_175 : f32 to vector<2x1xf32>
    %521 = vector.broadcast %cst_176 : f32 to vector<2x1xf32>
    %522 = arith.select %519, %520, %521 : vector<2x1xi1>, vector<2x1xf32>
    %cst_177 = arith.constant 1.000000e+00 : f32
    %523 = vector.broadcast %cst_177 : f32 to vector<2x1xf32>
    %524 = arith.subf %523, %493 : vector<2x1xf32>
    %525 = arith.mulf %522, %524 : vector<2x1xf32>
    %526 = vector.shape_cast %525 : vector<2x1xf32> to vector<2x1x1xf32>
    %cst_178 = arith.constant 0.000000e+00 : f32
    %527 = vector.broadcast %cst_178 : f32 to vector<2x1x1xf32>
    %528 = arith.cmpf ogt, %526, %527 : vector<2x1x1xf32>
    %529 = vector.shape_cast %528 : vector<2x1x1xi1> to vector<2x1x1xi1>
    %530 = vector.broadcast %529 : vector<2x1x1xi1> to vector<2x8x32xi1>
    %531 = arith.select %530, %452, %280 : vector<2x8x32xi1>, vector<2x8x32xf32>
    %cst_179 = arith.constant 0.000000e+00 : f32
    %532 = vector.broadcast %cst_179 : f32 to vector<2x1x1xf32>
    %533 = arith.cmpf ogt, %526, %532 : vector<2x1x1xf32>
    %534 = vector.shape_cast %533 : vector<2x1x1xi1> to vector<2x1x1xi1>
    %535 = vector.broadcast %534 : vector<2x1x1xi1> to vector<2x8x32xi1>
    %536 = arith.select %535, %517, %285 : vector<2x8x32xi1>, vector<2x8x32xf32>
    %cst_180 = arith.constant 0.000000e+00 : f32
    %537 = vector.broadcast %cst_180 : f32 to vector<2x1xf32>
    %538 = arith.cmpf ogt, %525, %537 : vector<2x1xf32>
    %539 = arith.select %538, %506, %288 : vector<2x1xi1>, vector<2x1xf32>
    %cst_181 = arith.constant 0.000000e+00 : f32
    %540 = vector.broadcast %cst_181 : f32 to vector<2x1xf32>
    %541 = arith.cmpf ogt, %525, %540 : vector<2x1xf32>
    %542 = arith.select %541, %511, %291 : vector<2x1xi1>, vector<2x1xf32>
    %c2_i32 = arith.constant 2 : i32
    %543 = arith.addf %539, %542 : vector<2x1xf32>
    %544 = arith.mulf %543, %4 : vector<2x1xf32>
    %c1 = arith.constant 1 : index
    %c0_182 = arith.constant 0 : index
    %c0_183 = arith.constant 0 : index
    %545 = vector.load %arg6[%c1, %c0_182, %c0_183] : memref<2x8x32xf32, #tpu.memory_space<vmem>>, vector<1x8x32xf32>
    %546 = vector.shape_cast %545 : vector<1x8x32xf32> to vector<8x32xf32>
    %547 = vector.extract_strided_slice %546 {offsets = [0, 0], sizes = [1, 32], strides = [1, 1]} : vector<8x32xf32> to vector<1x32xf32>
    %548 = vector.extract_strided_slice %546 {offsets = [1, 0], sizes = [1, 32], strides = [1, 1]} : vector<8x32xf32> to vector<1x32xf32>
    %549 = vector.extract_strided_slice %546 {offsets = [2, 0], sizes = [1, 32], strides = [1, 1]} : vector<8x32xf32> to vector<1x32xf32>
    %550 = vector.extract_strided_slice %546 {offsets = [3, 0], sizes = [1, 32], strides = [1, 1]} : vector<8x32xf32> to vector<1x32xf32>
    %551 = vector.extract_strided_slice %546 {offsets = [4, 0], sizes = [1, 32], strides = [1, 1]} : vector<8x32xf32> to vector<1x32xf32>
    %552 = vector.extract_strided_slice %546 {offsets = [5, 0], sizes = [1, 32], strides = [1, 1]} : vector<8x32xf32> to vector<1x32xf32>
    %553 = vector.extract_strided_slice %546 {offsets = [6, 0], sizes = [1, 32], strides = [1, 1]} : vector<8x32xf32> to vector<1x32xf32>
    %c1_184 = arith.constant 1 : index
    %c0_185 = arith.constant 0 : index
    %c0_186 = arith.constant 0 : index
    %554 = vector.load %arg7[%c1_184, %c0_185, %c0_186] : memref<2x1x128xf32, #tpu.memory_space<vmem>>, vector<1x1x128xf32>
    %555 = vector.shape_cast %554 : vector<1x1x128xf32> to vector<1x128xf32>
    %c1_187 = arith.constant 1 : index
    %c0_188 = arith.constant 0 : index
    %c0_189 = arith.constant 0 : index
    %556 = vector.load %arg8[%c1_187, %c0_188, %c0_189] : memref<2x32x32xbf16, #tpu.memory_space<vmem>>, vector<1x32x32xbf16>
    %557 = vector.shape_cast %556 : vector<1x32x32xbf16> to vector<32x32xbf16>
    %c1_190 = arith.constant 1 : index
    %c0_191 = arith.constant 0 : index
    %c0_192 = arith.constant 0 : index
    %558 = vector.load %arg9[%c1_190, %c0_191, %c0_192] : memref<2x32x32xbf16, #tpu.memory_space<vmem>>, vector<1x32x32xbf16>
    %559 = vector.shape_cast %558 : vector<1x32x32xbf16> to vector<32x32xbf16>
    %c1_193 = arith.constant 1 : index
    %c0_194 = arith.constant 0 : index
    %c0_195 = arith.constant 0 : index
    %560 = vector.load %arg10[%c1_193, %c0_194, %c0_195] : memref<2x32x32xbf16, #tpu.memory_space<vmem>>, vector<1x32x32xbf16>
    %561 = vector.shape_cast %560 : vector<1x32x32xbf16> to vector<32x32xbf16>
    %c1_196 = arith.constant 1 : index
    %c0_197 = arith.constant 0 : index
    %c0_198 = arith.constant 0 : index
    %562 = vector.load %arg11[%c1_196, %c0_197, %c0_198] : memref<2x32x32xbf16, #tpu.memory_space<vmem>>, vector<1x32x32xbf16>
    %563 = vector.shape_cast %562 : vector<1x32x32xbf16> to vector<32x32xbf16>
    %c1_199 = arith.constant 1 : index
    %c0_200 = arith.constant 0 : index
    %c0_201 = arith.constant 0 : index
    %564 = vector.load %arg12[%c1_199, %c0_200, %c0_201] : memref<2x32x128xbf16, #tpu.memory_space<vmem>>, vector<1x32x128xbf16>
    %565 = vector.shape_cast %564 : vector<1x32x128xbf16> to vector<32x128xbf16>
    %c1_202 = arith.constant 1 : index
    %c0_203 = arith.constant 0 : index
    %c0_204 = arith.constant 0 : index
    %566 = vector.load %arg13[%c1_202, %c0_203, %c0_204] : memref<2x128x32xbf16, #tpu.memory_space<vmem>>, vector<1x128x32xbf16>
    %567 = vector.shape_cast %566 : vector<1x128x32xbf16> to vector<128x32xbf16>
    %568 = vector.shape_cast %5 : vector<2x8x32xf32> to vector<16x32xf32>
    %569 = vector.shape_cast %536 : vector<2x8x32xf32> to vector<16x32xf32>
    %cst_205 = arith.constant dense<0.000000e+00> : vector<16xf32>
    %570 = vector.multi_reduction <add>, %568, %cst_205 [1] : vector<16x32xf32> to vector<16xf32>
    %571 = vector.shape_cast %570 : vector<16xf32> to vector<16x1xf32>
    %cst_206 = arith.constant 3.200000e+01 : f32
    %572 = vector.broadcast %cst_206 : f32 to vector<16x1xf32>
    %573 = arith.divf %571, %572 : vector<16x1xf32>
    %574 = vector.broadcast %573 : vector<16x1xf32> to vector<16x32xf32>
    %575 = arith.subf %568, %574 : vector<16x32xf32>
    %576 = arith.mulf %575, %575 : vector<16x32xf32>
    %cst_207 = arith.constant dense<0.000000e+00> : vector<16xf32>
    %577 = vector.multi_reduction <add>, %576, %cst_207 [1] : vector<16x32xf32> to vector<16xf32>
    %578 = vector.shape_cast %577 : vector<16xf32> to vector<16x1xf32>
    %cst_208 = arith.constant 3.200000e+01 : f32
    %579 = vector.broadcast %cst_208 : f32 to vector<16x1xf32>
    %580 = arith.divf %578, %579 : vector<16x1xf32>
    %581 = vector.broadcast %573 : vector<16x1xf32> to vector<16x32xf32>
    %582 = arith.subf %568, %581 : vector<16x32xf32>
    %cst_209 = arith.constant 9.99999974E-6 : f32
    %583 = vector.broadcast %cst_209 : f32 to vector<16x1xf32>
    %584 = arith.addf %580, %583 : vector<16x1xf32>
    %585 = math.rsqrt %584 : vector<16x1xf32>
    %586 = vector.broadcast %585 : vector<16x1xf32> to vector<16x32xf32>
    %587 = arith.mulf %582, %586 : vector<16x32xf32>
    %588 = vector.broadcast %547 : vector<1x32xf32> to vector<16x32xf32>
    %589 = arith.mulf %587, %588 : vector<16x32xf32>
    %590 = vector.broadcast %548 : vector<1x32xf32> to vector<16x32xf32>
    %591 = arith.addf %589, %590 : vector<16x32xf32>
    %592 = arith.truncf %591 : vector<16x32xf32> to vector<16x32xbf16>
    %cst_210 = arith.constant dense<0.000000e+00> : vector<16xf32>
    %593 = vector.multi_reduction <add>, %569, %cst_210 [1] : vector<16x32xf32> to vector<16xf32>
    %594 = vector.shape_cast %593 : vector<16xf32> to vector<16x1xf32>
    %cst_211 = arith.constant 3.200000e+01 : f32
    %595 = vector.broadcast %cst_211 : f32 to vector<16x1xf32>
    %596 = arith.divf %594, %595 : vector<16x1xf32>
    %597 = vector.broadcast %596 : vector<16x1xf32> to vector<16x32xf32>
    %598 = arith.subf %569, %597 : vector<16x32xf32>
    %599 = arith.mulf %598, %598 : vector<16x32xf32>
    %cst_212 = arith.constant dense<0.000000e+00> : vector<16xf32>
    %600 = vector.multi_reduction <add>, %599, %cst_212 [1] : vector<16x32xf32> to vector<16xf32>
    %601 = vector.shape_cast %600 : vector<16xf32> to vector<16x1xf32>
    %cst_213 = arith.constant 3.200000e+01 : f32
    %602 = vector.broadcast %cst_213 : f32 to vector<16x1xf32>
    %603 = arith.divf %601, %602 : vector<16x1xf32>
    %604 = vector.broadcast %596 : vector<16x1xf32> to vector<16x32xf32>
    %605 = arith.subf %569, %604 : vector<16x32xf32>
    %cst_214 = arith.constant 9.99999974E-6 : f32
    %606 = vector.broadcast %cst_214 : f32 to vector<16x1xf32>
    %607 = arith.addf %603, %606 : vector<16x1xf32>
    %608 = math.rsqrt %607 : vector<16x1xf32>
    %609 = vector.broadcast %608 : vector<16x1xf32> to vector<16x32xf32>
    %610 = arith.mulf %605, %609 : vector<16x32xf32>
    %611 = vector.broadcast %549 : vector<1x32xf32> to vector<16x32xf32>
    %612 = arith.mulf %610, %611 : vector<16x32xf32>
    %613 = vector.broadcast %550 : vector<1x32xf32> to vector<16x32xf32>
    %614 = arith.addf %612, %613 : vector<16x32xf32>
    %615 = arith.truncf %614 : vector<16x32xf32> to vector<16x32xbf16>
    %cst_215 = arith.constant dense<0.000000e+00> : vector<16x32xf32>
    %616 = tpu.matmul %592, %557, %cst_215 {dimension_numbers = #tpu.dot_dimension_numbers<[1], [0], [0], [1], [0, 0, 1, 1], [], []>} : vector<16x32xbf16>, vector<32x32xbf16>, vector<16x32xf32> -> vector<16x32xf32>
    %617 = vector.shape_cast %616 : vector<16x32xf32> to vector<2x8x32xf32>
    %cst_216 = arith.constant dense<0.000000e+00> : vector<16x32xf32>
    %618 = tpu.matmul %615, %559, %cst_216 {dimension_numbers = #tpu.dot_dimension_numbers<[1], [0], [0], [1], [0, 0, 1, 1], [], []>} : vector<16x32xbf16>, vector<32x32xbf16>, vector<16x32xf32> -> vector<16x32xf32>
    %619 = vector.shape_cast %618 : vector<16x32xf32> to vector<2x8x32xf32>
    %cst_217 = arith.constant dense<0.000000e+00> : vector<16x32xf32>
    %620 = tpu.matmul %615, %561, %cst_217 {dimension_numbers = #tpu.dot_dimension_numbers<[1], [0], [0], [1], [0, 0, 1, 1], [], []>} : vector<16x32xbf16>, vector<32x32xbf16>, vector<16x32xf32> -> vector<16x32xf32>
    %621 = vector.shape_cast %620 : vector<16x32xf32> to vector<2x8x32xf32>
    "tpu.trace_start"() <{level = 10 : i32, message = "bqd,bkd->bqk"}> : () -> ()
    %cst_218 = arith.constant dense<0.000000e+00> : vector<2x8x8xf32>
    %622 = tpu.matmul %617, %619, %cst_218 {dimension_numbers = #tpu.dot_dimension_numbers<[2], [2], [1], [1], [0, 0, 0, 1, 1, 1], [0], [0]>} : vector<2x8x32xf32>, vector<2x8x32xf32>, vector<2x8x8xf32> -> vector<2x8x8xf32>
    "tpu.trace_stop"() : () -> ()
    %cst_219 = arith.constant 0.176776692 : f32
    %623 = vector.broadcast %cst_219 : f32 to vector<2x8x8xf32>
    %624 = arith.mulf %622, %623 : vector<2x8x8xf32>
    %625 = vector.broadcast %2 : vector<2x1x8xf32> to vector<2x8x8xf32>
    %626 = arith.addf %624, %625 : vector<2x8x8xf32>
    %cst_220 = arith.constant dense<0xFF800000> : vector<2x8xf32>
    %627 = vector.multi_reduction <maximumf>, %626, %cst_220 [2] : vector<2x8x8xf32> to vector<2x8xf32>
    %628 = vector.shape_cast %627 : vector<2x8xf32> to vector<2x8x1xf32>
    %629 = vector.broadcast %628 : vector<2x8x1xf32> to vector<2x8x8xf32>
    %630 = arith.subf %626, %629 : vector<2x8x8xf32>
    %631 = math.exp %630 : vector<2x8x8xf32>
    %cst_221 = arith.constant dense<0.000000e+00> : vector<2x8xf32>
    %632 = vector.multi_reduction <add>, %631, %cst_221 [2] : vector<2x8x8xf32> to vector<2x8xf32>
    %633 = vector.shape_cast %632 : vector<2x8xf32> to vector<2x8x1xf32>
    %634 = tpu.reciprocal %633 {approx = true} : vector<2x8x1xf32> -> vector<2x8x1xf32>
    "tpu.trace_start"() <{level = 10 : i32, message = "bqk,bkd->bqd"}> : () -> ()
    %cst_222 = arith.constant dense<0.000000e+00> : vector<2x8x32xf32>
    %635 = tpu.matmul %631, %621, %cst_222 {dimension_numbers = #tpu.dot_dimension_numbers<[2], [1], [1], [2], [0, 0, 0, 1, 1, 2], [0], [0]>} : vector<2x8x8xf32>, vector<2x8x32xf32>, vector<2x8x32xf32> -> vector<2x8x32xf32>
    "tpu.trace_stop"() : () -> ()
    %636 = vector.broadcast %634 : vector<2x8x1xf32> to vector<2x8x32xf32>
    %637 = arith.mulf %635, %636 : vector<2x8x32xf32>
    %638 = vector.shape_cast %637 : vector<2x8x32xf32> to vector<16x32xf32>
    %639 = arith.truncf %638 : vector<16x32xf32> to vector<16x32xbf16>
    %cst_223 = arith.constant dense<0.000000e+00> : vector<16x32xf32>
    %640 = tpu.matmul %639, %563, %cst_223 {dimension_numbers = #tpu.dot_dimension_numbers<[1], [0], [0], [1], [0, 0, 1, 1], [], []>} : vector<16x32xbf16>, vector<32x32xbf16>, vector<16x32xf32> -> vector<16x32xf32>
    %641 = arith.addf %568, %640 : vector<16x32xf32>
    %cst_224 = arith.constant dense<0.000000e+00> : vector<16xf32>
    %642 = vector.multi_reduction <add>, %641, %cst_224 [1] : vector<16x32xf32> to vector<16xf32>
    %643 = vector.shape_cast %642 : vector<16xf32> to vector<16x1xf32>
    %cst_225 = arith.constant 3.200000e+01 : f32
    %644 = vector.broadcast %cst_225 : f32 to vector<16x1xf32>
    %645 = arith.divf %643, %644 : vector<16x1xf32>
    %646 = vector.broadcast %645 : vector<16x1xf32> to vector<16x32xf32>
    %647 = arith.subf %641, %646 : vector<16x32xf32>
    %648 = arith.mulf %647, %647 : vector<16x32xf32>
    %cst_226 = arith.constant dense<0.000000e+00> : vector<16xf32>
    %649 = vector.multi_reduction <add>, %648, %cst_226 [1] : vector<16x32xf32> to vector<16xf32>
    %650 = vector.shape_cast %649 : vector<16xf32> to vector<16x1xf32>
    %cst_227 = arith.constant 3.200000e+01 : f32
    %651 = vector.broadcast %cst_227 : f32 to vector<16x1xf32>
    %652 = arith.divf %650, %651 : vector<16x1xf32>
    %653 = vector.broadcast %645 : vector<16x1xf32> to vector<16x32xf32>
    %654 = arith.subf %641, %653 : vector<16x32xf32>
    %cst_228 = arith.constant 9.99999974E-6 : f32
    %655 = vector.broadcast %cst_228 : f32 to vector<16x1xf32>
    %656 = arith.addf %652, %655 : vector<16x1xf32>
    %657 = math.rsqrt %656 : vector<16x1xf32>
    %658 = vector.broadcast %657 : vector<16x1xf32> to vector<16x32xf32>
    %659 = arith.mulf %654, %658 : vector<16x32xf32>
    %660 = vector.broadcast %551 : vector<1x32xf32> to vector<16x32xf32>
    %661 = arith.mulf %659, %660 : vector<16x32xf32>
    %662 = vector.broadcast %552 : vector<1x32xf32> to vector<16x32xf32>
    %663 = arith.addf %661, %662 : vector<16x32xf32>
    %664 = arith.truncf %663 : vector<16x32xf32> to vector<16x32xbf16>
    %cst_229 = arith.constant dense<0.000000e+00> : vector<16x128xf32>
    %665 = tpu.matmul %664, %565, %cst_229 {dimension_numbers = #tpu.dot_dimension_numbers<[1], [0], [0], [1], [0, 0, 1, 1], [], []>} : vector<16x32xbf16>, vector<32x128xbf16>, vector<16x128xf32> -> vector<16x128xf32>
    %666 = vector.broadcast %555 : vector<1x128xf32> to vector<16x128xf32>
    %667 = arith.addf %665, %666 : vector<16x128xf32>
    %668 = arith.mulf %667, %667 : vector<16x128xf32>
    %669 = arith.mulf %667, %668 : vector<16x128xf32>
    %cst_230 = arith.constant 4.471500e-02 : f32
    %670 = vector.broadcast %cst_230 : f32 to vector<16x128xf32>
    %671 = arith.mulf %670, %669 : vector<16x128xf32>
    %672 = arith.addf %667, %671 : vector<16x128xf32>
    %cst_231 = arith.constant 0.797884583 : f32
    %673 = vector.broadcast %cst_231 : f32 to vector<16x128xf32>
    %674 = arith.mulf %673, %672 : vector<16x128xf32>
    %675 = math.tanh %674 : vector<16x128xf32>
    %cst_232 = arith.constant 1.000000e+00 : f32
    %676 = vector.broadcast %cst_232 : f32 to vector<16x128xf32>
    %677 = arith.addf %676, %675 : vector<16x128xf32>
    %cst_233 = arith.constant 5.000000e-01 : f32
    %678 = vector.broadcast %cst_233 : f32 to vector<16x128xf32>
    %679 = arith.mulf %678, %677 : vector<16x128xf32>
    %680 = arith.mulf %667, %679 : vector<16x128xf32>
    %681 = arith.truncf %680 : vector<16x128xf32> to vector<16x128xbf16>
    %cst_234 = arith.constant dense<0.000000e+00> : vector<16x32xf32>
    %682 = tpu.matmul %681, %567, %cst_234 {dimension_numbers = #tpu.dot_dimension_numbers<[1], [0], [0], [1], [0, 0, 1, 1], [], []>} : vector<16x128xbf16>, vector<128x32xbf16>, vector<16x32xf32> -> vector<16x32xf32>
    %683 = vector.broadcast %553 : vector<1x32xf32> to vector<16x32xf32>
    %684 = arith.addf %682, %683 : vector<16x32xf32>
    %685 = arith.addf %641, %684 : vector<16x32xf32>
    %686 = vector.shape_cast %685 : vector<16x32xf32> to vector<2x8x32xf32>
    %687 = vector.shape_cast %4 : vector<2x1xf32> to vector<2x1x1xf32>
    %cst_235 = arith.constant 1.000000e+00 : f32
    %688 = vector.broadcast %cst_235 : f32 to vector<2x1x1xf32>
    %689 = arith.cmpf oeq, %687, %688 : vector<2x1x1xf32>
    %690 = vector.shape_cast %689 : vector<2x1x1xi1> to vector<2x1x1xi1>
    %691 = vector.broadcast %690 : vector<2x1x1xi1> to vector<2x8x32xi1>
    %692 = arith.select %691, %536, %0 : vector<2x8x32xi1>, vector<2x8x32xf32>
    %cst_236 = arith.constant 1.000000e+00 : f32
    %693 = vector.broadcast %cst_236 : f32 to vector<2x1x1xf32>
    %694 = arith.cmpf oeq, %687, %693 : vector<2x1x1xf32>
    %695 = vector.shape_cast %694 : vector<2x1x1xi1> to vector<2x1x1xi1>
    %696 = vector.broadcast %695 : vector<2x1x1xi1> to vector<2x8x32xi1>
    %697 = arith.select %696, %686, %5 : vector<2x8x32xi1>, vector<2x8x32xf32>
    %c0_237 = arith.constant 0 : index
    %c0_238 = arith.constant 0 : index
    %698 = vector.load %arg17[%c0_237, %c0_238] : memref<2x32xf32, #tpu.memory_space<vmem>>, vector<2x32xf32>
    %699 = vector.shape_cast %697 : vector<2x8x32xf32> to vector<16x32xf32>
    %700 = vector.extract_strided_slice %698 {offsets = [0, 0], sizes = [1, 32], strides = [1, 1]} : vector<2x32xf32> to vector<1x32xf32>
    %701 = vector.extract_strided_slice %698 {offsets = [1, 0], sizes = [1, 32], strides = [1, 1]} : vector<2x32xf32> to vector<1x32xf32>
    %cst_239 = arith.constant dense<0.000000e+00> : vector<16xf32>
    %702 = vector.multi_reduction <add>, %699, %cst_239 [1] : vector<16x32xf32> to vector<16xf32>
    %703 = vector.shape_cast %702 : vector<16xf32> to vector<16x1xf32>
    %cst_240 = arith.constant 3.200000e+01 : f32
    %704 = vector.broadcast %cst_240 : f32 to vector<16x1xf32>
    %705 = arith.divf %703, %704 : vector<16x1xf32>
    %706 = vector.broadcast %705 : vector<16x1xf32> to vector<16x32xf32>
    %707 = arith.subf %699, %706 : vector<16x32xf32>
    %708 = arith.mulf %707, %707 : vector<16x32xf32>
    %cst_241 = arith.constant dense<0.000000e+00> : vector<16xf32>
    %709 = vector.multi_reduction <add>, %708, %cst_241 [1] : vector<16x32xf32> to vector<16xf32>
    %710 = vector.shape_cast %709 : vector<16xf32> to vector<16x1xf32>
    %cst_242 = arith.constant 3.200000e+01 : f32
    %711 = vector.broadcast %cst_242 : f32 to vector<16x1xf32>
    %712 = arith.divf %710, %711 : vector<16x1xf32>
    %713 = vector.broadcast %705 : vector<16x1xf32> to vector<16x32xf32>
    %714 = arith.subf %699, %713 : vector<16x32xf32>
    %cst_243 = arith.constant 9.99999974E-6 : f32
    %715 = vector.broadcast %cst_243 : f32 to vector<16x1xf32>
    %716 = arith.addf %712, %715 : vector<16x1xf32>
    %717 = math.rsqrt %716 : vector<16x1xf32>
    %718 = vector.broadcast %717 : vector<16x1xf32> to vector<16x32xf32>
    %719 = arith.mulf %714, %718 : vector<16x32xf32>
    %720 = vector.broadcast %700 : vector<1x32xf32> to vector<16x32xf32>
    %721 = arith.mulf %719, %720 : vector<16x32xf32>
    %722 = vector.broadcast %701 : vector<1x32xf32> to vector<16x32xf32>
    %723 = arith.addf %721, %722 : vector<16x32xf32>
    %724 = vector.shape_cast %723 : vector<16x32xf32> to vector<2x8x32xf32>
    %c0_244 = arith.constant 0 : index
    %c0_245 = arith.constant 0 : index
    %c0_246 = arith.constant 0 : index
    %725 = vector.load %arg18[%c0_244, %c0_245, %c0_246] : memref<2x8x32xf32, #tpu.memory_space<vmem>>, vector<2x8x32xf32>
    tpu.vector_store %arg18[%c0_244, %c0_245, %c0_246], %692 {strides = array<i32>} : memref<2x8x32xf32, #tpu.memory_space<vmem>>, vector<2x8x32xf32>,
    %c0_247 = arith.constant 0 : index
    %c0_248 = arith.constant 0 : index
    %c0_249 = arith.constant 0 : index
    %726 = vector.load %arg19[%c0_247, %c0_248, %c0_249] : memref<2x8x32xf32, #tpu.memory_space<vmem>>, vector<2x8x32xf32>
    tpu.vector_store %arg19[%c0_247, %c0_248, %c0_249], %697 {strides = array<i32>} : memref<2x8x32xf32, #tpu.memory_space<vmem>>, vector<2x8x32xf32>,
    %c0_250 = arith.constant 0 : index
    %c0_251 = arith.constant 0 : index
    %c0_252 = arith.constant 0 : index
    %727 = vector.load %arg20[%c0_250, %c0_251, %c0_252] : memref<2x8x32xf32, #tpu.memory_space<vmem>>, vector<2x8x32xf32>
    tpu.vector_store %arg20[%c0_250, %c0_251, %c0_252], %724 {strides = array<i32>} : memref<2x8x32xf32, #tpu.memory_space<vmem>>, vector<2x8x32xf32>,
    %c0_253 = arith.constant 0 : index
    %c0_254 = arith.constant 0 : index
    %728 = vector.load %arg21[%c0_253, %c0_254] : memref<2x1xf32, #tpu.memory_space<vmem>>, vector<2x1xf32>
    tpu.vector_store %arg21[%c0_253, %c0_254], %544 {strides = array<i32>} : memref<2x1xf32, #tpu.memory_space<vmem>>, vector<2x1xf32>,
    return
  }
}

</mosaic_0001>

<bundles_post_ra>
// kernel: custom-call.2
= control target key start
LH: loop header
LB: loop body
LE: loop exit
PB: predicated region body
PF: predicated region fallthrough
CT: control target
= control target key end

     0   :  { %s6_s0 = inlined_call_operand.hbm [shape: f32[2,8,32], index: 0, kind: output, shape index: {}]  }

// kernel: custom-call.3
= control target key start
LH: loop header
LB: loop body
LE: loop exit
PB: predicated region body
PF: predicated region fallthrough
CT: control target
= control target key end

     0   :  { %s6_s0 = inlined_call_operand.vmem [shape: f32[2,2,8,32], index: 0, kind: output, shape index: {}]  }

// kernel: custom-call
= control target key start
LH: loop header
LB: loop body
LE: loop exit
PB: predicated region body
PF: predicated region fallthrough
CT: control target
= control target key end

     0   :  { %s6_s0 = inlined_call_operand.vmem [shape: f32[2], index: 0, kind: output, shape index: {}]  }

// kernel: closed_call.21
= control target key start
LH: loop header
LB: loop body
LE: loop exit
PB: predicated region body
PF: predicated region fallthrough
CT: control target
= control target key end

     0   :  { %s5739_s0 = inlined_call_operand.vmem [shape: f32[2,8,32], index: 0, kind: input, shape index: {}]   ;;  %s5740_s1 = inlined_call_operand.vmem [shape: f32[2,8,1], index: 1, kind: input, shape index: {}]   ;;  %s5741_s2 = inlined_call_operand.vmem [shape: f32[2,1,8], index: 2, kind: input, shape index: {}]   ;;  %s5742_s3 = inlined_call_operand.vmem [shape: f32[2,1], index: 3, kind: input, shape index: {}]   ;;  %s5743_s4 = inlined_call_operand.vmem [shape: f32[2,1], index: 4, kind: input, shape index: {}]   ;;  %s5744_s5 = inlined_call_operand.vmem [shape: f32[2,8,32], index: 5, kind: input, shape index: {}]   ;;  %s5745_s6 = inlined_call_operand.vmem [shape: f32[2,8,32], index: 6, kind: input, shape index: {}]   ;;  %s5746_s7 = inlined_call_operand.vmem [shape: f32[2,1,128], index: 7, kind: input, shape index: {}]   ;;  %s5747_s8 = inlined_call_operand.vmem [shape: bf16[2,32,32], index: 8, kind: input, shape index: {}]   ;;  %s5748_s9 = inlined_call_operand.vmem [shape: bf16[2,32,32], index: 9, kind: input, shape index: {}]   ;;  %s5749_s10 = inlined_call_operand.vmem [shape: bf16[2,32,32], index: 10, kind: input, shape index: {}]   ;;  %s5750_s11 = inlined_call_operand.vmem [shape: bf16[2,32,32], index: 11, kind: input, shape index: {}]   ;;  %s5751_s12 = inlined_call_operand.vmem [shape: bf16[2,32,128], index: 12, kind: input, shape index: {}]   ;;  %s5752_s13 = inlined_call_operand.vmem [shape: bf16[2,128,32], index: 13, kind: input, shape index: {}]   ;;  %s5753_s14 = inlined_call_operand.vmem [shape: bf16[32,32], index: 14, kind: input, shape index: {}]   ;;  %s5754_s15 = inlined_call_operand.vmem [shape: f32[2,32], index: 15, kind: input, shape index: {}]   ;;  %s5755_s16 = inlined_call_operand.<no memory space> [shape: f32[1,1], index: 16, kind: input, shape index: {}]   ;;  %s5756_s17 = inlined_call_operand.vmem [shape: f32[2,32], index: 17, kind: input, shape index: {}]   ;;  %s5757_s18 = inlined_call_operand.vmem [shape: f32[2,8,32], index: 18, kind: output, shape index: {0}]   ;;  %s5758_s19 = inlined_call_operand.vmem [shape: f32[2,8,32], index: 19, kind: output, shape index: {1}]   ;;  %s5759_s20 = inlined_call_operand.hbm [shape: f32[2,8,32], index: 20, kind: output, shape index: {2}]   ;;  %s5760_s21 = inlined_call_operand.vmem [shape: f32[2,1], index: 21, kind: output, shape index: {3}]  }
   0x1   :  { %5790 = sst [smem:[#allocation17_spill]] %s5739_s0  ;;  %v27_v0 = vstv %s5755_s16 }
   0x2   :  { %5791 = sst [smem:[#allocation18_spill]] %s5740_s1  ;;  %28 = vst [vmem:[#allocation2] sm:$0x1] %v27_v0 }
   0x3   :  { %5792 = sst [smem:[#allocation19_spill]] %s5741_s2 }
   0x4   :  { %5793 = sst [smem:[#allocation20_spill]] %s5742_s3 }
   0x5   :  { %5794 = sst [smem:[#allocation21_spill]] %s5743_s4 }
   0x6   :  { %5795 = sst [smem:[#allocation22_spill]] %s5744_s5 }
   0x7   :  { %s5796_s3 = sld [smem:[#allocation17_spill]]  ;;  %vm138_vm0 = vcmask 261120   ;;  %s5797_s0 = sld [smem:[#allocation22_spill]] }
   0xd   :  { %v4766_v1 = vld [vmem:[%s5796_s3] sm:$0xff]  ;;  %v4774_v3 = vld [vmem:[%s5796_s3 + $0x8] sm:$0xff] }
   0xe   :  { %v75_v2 = vld [vmem:[%s5797_s0] sm:$0xff]  ;;  %v139_v4 = vsel %vm138_vm0, %v4766_v1, 0.0  ;;  %v76_v6 = vld [vmem:[%s5797_s0 + $0x8] sm:$0xff]  ;;  %v142_v7 = vsel %vm138_vm0, %v4774_v3, 0.0 }
   0xf   :  { %v525_v5 = vsel %vm138_vm0, %v75_v2, 0.0  ;;  %140 = vadd.xlane.f32.xlu0 %v139_v4  ;;  %v528_v8 = vsel %vm138_vm0, %v76_v6, 0.0 }
  0x10   :  { %526 = vadd.xlane.f32.xlu1 %v525_v5 }
  0x13   :  { %143 = vadd.xlane.f32.xlu0 %v142_v7 }
  0x14   :  { %529 = vadd.xlane.f32.xlu1 %v528_v8 }
  0x15   :  { %29 = vsyncpa [#allocation4], 0  ;;  %v4798_v29 = vld [vmem:[%s5747_s8] sm:$0xff]   ;;  %v5771_v30 = vmov 0.0   ;;  %v4807_v31 = vld [vmem:[%s5747_s8 + $0x8] sm:$0xff]   ;;  %vm4643_vm1 = vmmov 0   ;;  %v166_v35 = vlaneseq }
  0x16   :  { %4150 = vmatprep.subr.bf16.mxu0 %v5771_v30  ;;  %4174 = vmatprep.subr.mxu1 %v5771_v30  ;;  %v4823_v47 = vld [vmem:[%s5745_s6] sm:$0xff]  ;;  %v3958_v52 = vld [vmem:[%s5745_s6 + $0x8] sm:$0xff]  ;;  %s5802_s2 = sld [smem:[#allocation19_spill]]  ;;  %vm789_vm2 = vcmask 64512   ;;  %vm77_vm3 = vcmask 7168   ;;  %s5803_s5 = sld [smem:[#allocation18_spill]] }
  0x17   :  { %4151 = vmatpush3.bf16.msra.mxu0 %v4798_v29  ;;  %4154 = vmatprep.mubr.msk.bf16.mxu0 %vm4643_vm1, %v5771_v30  ;;  %v4815_v42 = vshrl.u32 %v166_v35, 7  ;;  %v4856_v8 = vld [vmem:[%s5748_s9] sm:$0xff]   ;;  %vm1448_vm4 = vcmask 1041409   ;;  %vm1520_vm5 = vcmask 254976   ;;  %s5807_s24 = sld [smem:[#allocation20_spill]]  ;;  %s4647_s26 = smov [#allocation3]  }
  0x18   :  { %4152 = vmatprep.subr.bf16.mxu0 %v5771_v30  ;;  %4176 = vmatprep.mubr.msk.f32.mxu1 %vm4643_vm1, %v5771_v30 }
  0x19   :  { %5798 = vst [vmem:[#allocation6_spill] sm:$0xff] %v4815_v42  ;;  %v4818_v46 = vsub.s32 0, %v4815_v42  ;;  %v4830_v51 = vsub.s32 1, %v4815_v42  ;;  %v5768_v54 = vsub.s32 2, %v4815_v42  ;;  %v5767_v0 = vsub.s32 3, %v4815_v42 }
  0x1b   :  { %4153 = vmatpush3.bf16.msra.mxu0 %v4807_v31  ;;  %v4827_v50 = vrot.slane %v4823_v47, %v4818_v46  ;;  %5799 = vst [vmem:[#allocation7_spill] sm:$0xff] %v4830_v51  ;;  %v2956_v57 = vrot.slane %v3958_v52, %v4818_v46  ;;  %v4840_v59 = vrot.slane %v4823_v47, %v4830_v51 }
  0x1c   :  { %4158 = vmatprep.subr.bf16.mxu0 %v5771_v30  ;;  %v4847_v63 = vrot.slane %v4823_v47, %v5768_v54 }
  0x9c   :  { %v141_v9 = vpop.xlane.xlu0 %140 }
  0x9d   :  { %v527_v10 = vpop.xlane.xlu1 %526  ;;  %v146_v11 = vmul.f32 0.03125, %v141_v9 }
  0x9e   :  { %v531_v12 = vmul.f32 0.03125, %v527_v10 }
  0x9f   :  { %v148_v13 = vsub.f32 %v4766_v1, %v146_v11 }
  0xa0   :  { %v4786_v14 = vsub.f32 %v75_v2, %v531_v12  ;;  %v144_v15 = vpop.xlane.xlu0 %143  ;;  %v2962_v2 = vrot.slane %v3958_v52, %v4830_v51 }
  0xa1   :  { %v530_v16 = vpop.xlane.xlu1 %529  ;;  %v147_v17 = vmul.f32 0.03125, %v144_v15  ;;  %v150_v19 = vmul.f32 %v148_v13, %v148_v13 }
  0xa2   :  { %v532_v18 = vmul.f32 0.03125, %v530_v16  ;;  %v535_v20 = vmul.f32 %v4786_v14, %v4786_v14  ;;  %v4874_v16 = vld [vmem:[%s5748_s9 + $0x8] sm:$0xff]  }
  0xa3   :  { %v149_v21 = vsub.f32 %v4774_v3, %v147_v17  ;;  %v152_v23 = vsel %vm138_vm0, %v150_v19, 0.0 }
  0xa4   :  { %v534_v22 = vsub.f32 %v76_v6, %v532_v18  ;;  %153 = vadd.xlane.f32.xlu0 %v152_v23  ;;  %v537_v24 = vsel %vm138_vm0, %v535_v20, 0.0  ;;  %v4887_v20 = vld [vmem:[%s5749_s10] sm:$0xff]  }
  0xa5   :  { %v151_v25 = vmul.f32 %v149_v21, %v149_v21 }
  0xa6   :  { %v536_v26 = vmul.f32 %v534_v22, %v534_v22 }
  0xa7   :  { %v155_v27 = vsel %vm138_vm0, %v151_v25, 0.0 }
  0xa8   :  { %538 = vadd.xlane.f32.xlu0 %v537_v24  ;;  %156 = vadd.xlane.f32.xlu1 %v155_v27  ;;  %v540_v28 = vsel %vm138_vm0, %v536_v26, 0.0 }
  0xac   :  { %541 = vadd.xlane.f32.xlu1 %v540_v28 }
 0x131   :  { %v154_v32 = vpop.xlane.xlu0 %153 }
 0x132   :  { %v158_v33 = vmul.f32 0.03125, %v154_v32 }
 0x134   :  { %v160_v34 = vadd.f32 1e-05, %v158_v33 }
 0x135   :  { %v157_v36 = vpop.xlane.xlu1 %156  ;;  %v539_v37 = vpop.xlane.xlu0 %538 }
 0x136   :  { %4517 = vrsqrt.f32 %v160_v34  ;;  %v159_v38 = vmul.f32 0.03125, %v157_v36  ;;  %v543_v39 = vmul.f32 0.03125, %v539_v37 }
 0x138   :  { %v161_v40 = vadd.f32 1e-05, %v159_v38  ;;  %v545_v41 = vadd.f32 1e-05, %v543_v39 }
 0x139   :  { %v542_v43 = vpop.xlane.xlu1 %541 }
 0x13a   :  { %4519 = vrsqrt.f32 %v161_v40  ;;  %v544_v44 = vmul.f32 0.03125, %v542_v43 }
 0x13b   :  { %4521 = vrsqrt.f32 %v545_v41 }
 0x13c   :  { %v546_v45 = vadd.f32 1e-05, %v544_v44 }
 0x13e   :  { %4523 = vrsqrt.f32 %v546_v45 }
 0x140   :  { %v4518_v48 = vpop.eup %4517 }
 0x141   :  { %v164_v49 = vmul.f32 %v4518_v48, %v148_v13  ;;  %v4864_v13 = vrot.slane %v4823_v47, %v5767_v0 }
 0x143   :  { %v170_v58 = vmul.f32 %v4827_v50, %v164_v49  ;;  %v183_v12 = vmul.f32 %v4847_v63, %v164_v49 }
 0x144   :  { %v4520_v53 = vpop.eup %4519 }
 0x145   :  { %v4522_v55 = vpop.eup %4521  ;;  %v165_v56 = vmul.f32 %v4520_v53, %v149_v21  ;;  %v176_v6 = vadd.f32 %v4840_v59, %v170_v58  ;;  %v189_v19 = vadd.f32 %v4864_v13, %v183_v12  ;;  %v4955_v53 = vld [vmem:[%s5802_s2] ss:$0 sm:$0xff] }
 0x146   :  { %v549_v60 = vmul.f32 %v4522_v55, %v4786_v14 }
 0x147   :  { %v171_v61 = vmul.f32 %v4827_v50, %v165_v56  ;;  %v184_v9 = vmul.f32 %v4847_v63, %v165_v56 }
 0x148   :  { %v4524_v62 = vpop.eup %4523  ;;  %v2957_v4 = vmul.f32 %v2956_v57, %v549_v60  ;;  %v551_v24 = vmul.f32 %v549_v60, %v4847_v63  ;;  %v4961_v60 = vld [vmem:[%s5802_s2 + $0x1] ss:$0 sm:$0xff] }
 0x149   :  { %v550_v5 = vmul.f32 %v4524_v62, %v534_v22  ;;  %v177_v7 = vadd.f32 %v4840_v59, %v171_v61  ;;  %v190_v17 = vadd.f32 %v4864_v13, %v184_v9  ;;  %v4895_v22 = vld [vmem:[%s5749_s10 + $0x8] sm:$0xff]  }
 0x14a   :  { %v4866_v14 = vadd.f32 %v2962_v2, %v2957_v4  ;;  %v553_v26 = vadd.f32 %v551_v24, %v4864_v13 }
 0x14b   :  { %v2958_v10 = vmul.f32 %v2956_v57, %v550_v5  ;;  %v178_v11 = vpack.c.bf16 %v177_v7, %v176_v6  ;;  %v191_v21 = vpack.c.bf16 %v190_v17, %v189_v19  ;;  %v552_v23 = vmul.f32 %v550_v5, %v4847_v63 }
 0x14c   :  { %5800 = vst [vmem:[#allocation8_spill] sm:$0xff] %v4866_v14 }
 0x14d   :  { %4155 = vmatmul.mubr.msk.bf16.vlgmr.msra.gmra.mrb[0].mxu0 %vm138_vm0, %v178_v11  ;;  %v4868_v15 = vadd.f32 %v2962_v2, %v2958_v10  ;;  %v554_v25 = vadd.f32 %v552_v23, %v4864_v13 }
 0x14e   :  { %4159 = vmatpush3.bf16.msra.mxu0 %v4856_v8  ;;  %4162 = vmatprep.mubr.msk.bf16.mxu0 %vm4643_vm1, %v5771_v30 }
 0x14f   :  { %5801 = vst [vmem:[#allocation9_spill] sm:$0xff] %v4868_v15  ;;  %4160 = vmatprep.subr.bf16.mxu0 %v5771_v30  ;;  %v555_v27 = vpack.c.bf16 %v554_v25, %v553_v26 }
 0x152   :  { %4161 = vmatpush3.bf16.msra.mxu0 %v4874_v16 }
 0x153   :  { %4166 = vmatprep.subr.bf16.mxu0 %v5771_v30 }
 0x155   :  { %4163 = vmatmul.mubr.msk.bf16.vlgmr.msra.gmra.mrb[4].mxu0 %vm138_vm0, %v191_v21 }
 0x156   :  { %4167 = vmatpush3.bf16.msra.mxu0 %v4887_v20  ;;  %4170 = vmatprep.mubr.msk.bf16.mxu0 %vm4643_vm1, %v5771_v30 }
 0x157   :  { %4168 = vmatprep.subr.bf16.mxu0 %v5771_v30 }
 0x15a   :  { %4169 = vmatpush3.bf16.msra.mxu0 %v4895_v22 }
 0x15b   :  { %4184 = vmatprep.subr.bf16.mxu0 %v5771_v30 }
 0x15d   :  { %4171 = vmatmul.mubr.msk.bf16.vlgmr.msra.gmra.mrb[8].mxu0 %vm138_vm0, %v191_v21 }
 0x15e   :  { %4185 = vmatpush3.bf16.msra.mxu0 %v4856_v8  ;;  %4188 = vmatprep.mubr.msk.bf16.mxu0 %vm4643_vm1, %v5771_v30 }
 0x15f   :  { %4186 = vmatprep.subr.bf16.mxu0 %v5771_v30 }
 0x162   :  { %4187 = vmatpush3.bf16.msra.mxu0 %v4874_v16 }
 0x163   :  { %4200 = vmatprep.subr.mxu0 %v5771_v30 }
 0x165   :  { %4189 = vmatmul.mubr.msk.bf16.vlgmr.msra.gmra.mrb[12].mxu0 %vm138_vm0, %v555_v27 }
 0x166   :  { %4202 = vmatprep.mubr.msk.f32.mxu0 %vm4643_vm1, %v5771_v30 }
 0x220   :  { %v241_v28 = vpop.f32.mrb[0].mxu0 }
 0x221   :  { %v4156_v32 = vpop.f32.mrb[1].mxu0 }
 0x222   :  { %v244_v33 = vpop.f32.mrb[2].mxu0 }
 0x223   :  { %v4157_v34 = vpop.f32.mrb[3].mxu0 }
 0x228   :  { %v297_v35 = vpop.f32.mrb[4].mxu0 }
 0x229   :  { %v4164_v36 = vpop.f32.mrb[5].mxu0  ;;  %4175 = vmatpush3.xpose.msk.msra.mxu1 %vm138_vm0, %v297_v35 }
 0x22a   :  { %v300_v37 = vpop.f32.mrb[6].mxu0  ;;  %4179 = vmatprep.subr.mxu1 %v5771_v30 }
 0x22b   :  { %v4165_v38 = vpop.f32.mrb[7].mxu0 }
 0x22c   :  { %4177 = vmatmul.mubr.msk.f32.vlgmr.msra.gmra.mrb[0].mxu1 %vm138_vm0, %v241_v28 }
 0x22d   :  { %4180 = vmatpush3.xpose.msk.msra.mxu1 %vm138_vm0, %v300_v37  ;;  %4181 = vmatprep.mubr.msk.f32.mxu1 %vm4643_vm1, %v5771_v30 }
 0x22e   :  { %4192 = vmatprep.subr.bf16.mxu1 %v5771_v30 }
 0x230   :  { %v350_v39 = vpop.f32.mrb[8].mxu0  ;;  %4182 = vmatmul.mubr.msk.f32.vlgmr.msra.gmra.mrb[2].mxu1 %vm138_vm0, %v244_v33 }
 0x231   :  { %v4172_v40 = vpop.f32.mrb[9].mxu0  ;;  %4193 = vmatpush3.bf16.msra.mxu1 %v4887_v20  ;;  %4196 = vmatprep.mubr.msk.bf16.mxu1 %vm4643_vm1, %v5771_v30 }
 0x232   :  { %v4927_v41 = vpop.f32.mrb[10].mxu0  ;;  %4194 = vmatprep.subr.bf16.mxu1 %v5771_v30 }
 0x233   :  { %v4173_v43 = vpop.f32.mrb[11].mxu0 }
 0x235   :  { %4195 = vmatpush3.bf16.msra.mxu1 %v4895_v22 }
 0x236   :  { %4220 = vmatprep.subr.mxu1 %v5771_v30 }
 0x238   :  { %v4932_v44 = vpop.f32.mrb[12].mxu0  ;;  %4197 = vmatmul.mubr.msk.bf16.vlgmr.msra.gmra.mrb[4].mxu1 %vm138_vm0, %v555_v27 }
 0x239   :  { %v4190_v45 = vpop.f32.mrb[13].mxu0  ;;  %4201 = vmatpush3.xpose.msk.msra.mxu0 %vm138_vm0, %v4932_v44  ;;  %4221 = vmatpush3.msra.mxu1 %v350_v39 }
 0x23a   :  { %v4937_v48 = vpop.f32.mrb[14].mxu0  ;;  %4205 = vmatprep.subr.mxu0 %v5771_v30  ;;  %4222 = vmatprep.mubr.msk.f32.mxu1 %vm4643_vm1, %v5771_v30 }
 0x23b   :  { %v4191_v49 = vpop.f32.mrb[15].mxu0  ;;  %4230 = vmatprep.subr.bf16.mxu1 %v5771_v30 }
 0x23c   :  { %4203 = vmatmul.mubr.msk.f32.vlgmr.msra.gmra.mrb[16].mxu0 %vm138_vm0, %v241_v28 }
 0x23d   :  { %4206 = vmatpush3.xpose.msk.msra.mxu0 %vm138_vm0, %v4937_v48  ;;  %4207 = vmatprep.mubr.msk.f32.mxu0 %vm4643_vm1, %v5771_v30 }
 0x23e   :  { %4210 = vmatprep.subr.mxu0 %v5771_v30 }
 0x240   :  { %4208 = vmatmul.mubr.msk.f32.vlgmr.msra.gmra.mrb[18].mxu0 %vm138_vm0, %v244_v33 }
 0x241   :  { %4212 = vmatprep.mubr.msk.f32.mxu0 %vm4643_vm1, %v5771_v30 }
 0x2ff   :  { %v429_v52 = vpop.f32.mrb[0].mxu1 }
 0x300   :  { %v509_v55 = vmul.f32 0.17677669, %v429_v52  ;;  %v4178_v56 = vpop.f32.mrb[1].mxu1 }
 0x302   :  { %v523_v57 = vadd.f32 %v4955_v53, %v509_v55 }
 0x303   :  { %v505_v58 = vpop.f32.mrb[2].mxu1 }
 0x304   :  { %v510_v61 = vmul.f32 0.17677669, %v505_v58  ;;  %v4183_v62 = vpop.f32.mrb[3].mxu1  ;;  %v790_v2 = vsel %vm789_vm2, %v523_v57, -inf }
 0x305   :  { %791 = vmax.xlane.f32.xlu0 %v790_v2  ;;  %v4997_v2 = vld [vmem:[%s5750_s11] sm:$0xff]  }
 0x306   :  { %v524_v4 = vadd.f32 %v4961_v60, %v510_v61 }
 0x308   :  { %v793_v5 = vsel %vm789_vm2, %v524_v4, -inf }
 0x309   :  { %794 = vmax.xlane.f32.xlu0 %v793_v5 }
 0x30b   :  { %v4966_v6 = vpop.f32.mrb[4].mxu1 }
 0x30c   :  { %v4198_v7 = vpop.f32.mrb[5].mxu1  ;;  %4211 = vmatpush3.msra.mxu0 %v4966_v6 }
 0x30d   :  { %v4969_v9 = vpop.f32.mrb[6].mxu1  ;;  %4215 = vmatprep.subr.mxu0 %v5771_v30 }
 0x30e   :  { %v4199_v10 = vpop.f32.mrb[7].mxu1 }
 0x30f   :  { %v710_v11 = vpop.f32.mrb[16].mxu0 }
 0x310   :  { %v787_v12 = vmul.f32 0.17677669, %v710_v11  ;;  %v4204_v17 = vpop.f32.mrb[17].mxu0 }
 0x312   :  { %v796_v19 = vsel %vm789_vm2, %v787_v12, -inf }
 0x313   :  { %797 = vmax.xlane.f32.xlu1 %v796_v19  ;;  %v783_v21 = vpop.f32.mrb[18].mxu0 }
 0x314   :  { %v788_v23 = vmul.f32 0.17677669, %v783_v21  ;;  %v4209_v24 = vpop.f32.mrb[19].mxu0 }
 0x316   :  { %v799_v25 = vsel %vm789_vm2, %v788_v23, -inf }
 0x317   :  { %800 = vmax.xlane.f32.xlu1 %v799_v25 }
 0x392   :  { %v792_v26 = vpop.xlane.xlu0 %791 }
 0x396   :  { %v795_v34 = vpop.xlane.xlu0 %794 }
 0x3a0   :  { %v798_v27 = vpop.xlane.xlu1 %797 }
 0x3a1   :  { %v802_v28 = vmax.f32 %v792_v26, %v798_v27 }
 0x3a3   :  { %v804_v32 = vsub.f32 %v523_v57, %v802_v28  ;;  %v810_v33 = vsub.f32 %v787_v12, %v802_v28 }
 0x3a4   :  { %v801_v35 = vpop.xlane.xlu1 %800 }
 0x3a5   :  { %v806_v36 = vmul.f32 1.442695, %v804_v32  ;;  %v812_v37 = vmul.f32 1.442695, %v810_v33  ;;  %v803_v38 = vmax.f32 %v795_v34, %v801_v35 }
 0x3a7   :  { %4525 = vpow2.f32 %v806_v36  ;;  %v805_v39 = vsub.f32 %v524_v4, %v803_v38  ;;  %v811_v40 = vsub.f32 %v788_v23, %v803_v38 }
 0x3a8   :  { %4527 = vpow2.f32 %v812_v37 }
 0x3a9   :  { %v808_v43 = vmul.f32 1.442695, %v805_v39  ;;  %v814_v45 = vmul.f32 1.442695, %v811_v40 }
 0x3ab   :  { %4529 = vpow2.f32 %v808_v43 }
 0x3ac   :  { %4531 = vpow2.f32 %v814_v45 }
 0x3b1   :  { %v4526_v49 = vpop.eup %4525 }
 0x3b2   :  { %v4528_v52 = vpop.eup %4527  ;;  %4223 = vmatmul.mubr.msk.f32.vlgmr.msra.gmra.mrb[8].mxu1 %vm789_vm2, %v4526_v49  ;;  %v816_v55 = vsel %vm789_vm2, %v4526_v49, 0.0  ;;  %v5769_v49 = vmov 0  }
 0x3b3   :  { %4213 = vmatmul.mubr.msk.f32.vlgmr.msra.gmra.mrb[20].mxu0 %vm789_vm2, %v4528_v52  ;;  %817 = vadd.xlane.f32.xlu0 %v816_v55  ;;  %v822_v58 = vsel %vm789_vm2, %v4528_v52, 0.0  ;;  %v69_v52 = vld [vmem:[%s5803_s5] sm:$0xff] }
 0x3b4   :  { %4216 = vmatpush3.msra.mxu0 %v4969_v9  ;;  %4217 = vmatprep.mubr.msk.f32.mxu0 %vm4643_vm1, %v5771_v30  ;;  %v78_v55 = vsel %vm77_vm3, %v69_v52, 0.0 }
 0x3b5   :  { %v4530_v56 = vpop.eup %4529  ;;  %4225 = vmatprep.subr.mxu0 %v5771_v30  ;;  %4234 = vmatprep.mubr.msk.bf16.mxu1 %vm4643_vm1, %v5771_v30 }
 0x3b6   :  { %v4532_v57 = vpop.eup %4531  ;;  %v819_v61 = vsel %vm789_vm2, %v4530_v56, 0.0  ;;  %4231 = vmatpush3.bf16.msra.mxu1 %v4997_v2  ;;  %4478 = vset.pattern.permute.xlu1 %v5769_v49 }
 0x3b7   :  { %4218 = vmatmul.mubr.msk.f32.vlgmr.msra.gmra.mrb[22].mxu0 %vm789_vm2, %v4532_v57  ;;  %823 = vadd.xlane.f32.xlu0 %v822_v58  ;;  %v825_v62 = vsel %vm789_vm2, %v4532_v57, 0.0  ;;  %v79_v57 = vrot.slane %v78_v55, 4 }
 0x3b8   :  { %4226 = vmatpush3.msra.mxu0 %v4927_v41  ;;  %820 = vadd.xlane.f32.xlu1 %v819_v61  ;;  %v5004_v41 = vld [vmem:[%s5750_s11 + $0x8] sm:$0xff]  }
 0x3b9   :  { %4227 = vmatprep.mubr.msk.f32.mxu0 %vm4643_vm1, %v5771_v30  ;;  %4238 = vmatprep.subr.bf16.mxu0 %v5771_v30 }
 0x3ba   :  { %4232 = vmatprep.subr.bf16.mxu1 %v5771_v30  ;;  %4477 = vset.pattern.permute.xlu0 %v5769_v49 }
 0x3bb   :  { %4233 = vmatpush3.bf16.msra.mxu1 %v5004_v41 }
 0x3bc   :  { %826 = vadd.xlane.f32.xlu1 %v825_v62  ;;  %4246 = vmatprep.subr.bf16.mxu1 %v5771_v30  ;;  %v80_v62 = vadd.f32 %v79_v57, %v78_v55 }
 0x3bf   :  { %4228 = vmatmul.mubr.msk.f32.vlgmr.msra.gmra.mrb[22].mxu0 %vm789_vm2, %v4530_v56  ;;  %v70_v56 = vld [vmem:[%s5803_s5 + $0x8] sm:$0xff]  ;;  %s5820_s5 = sld [smem:[#allocation21_spill]] }
 0x3c0   :  { %4242 = vmatprep.mubr.msk.bf16.mxu0 %vm4643_vm1, %v5771_v30  ;;  %v85_v58 = vsel %vm77_vm3, %v70_v56, 0.0  ;;  %vm3862_vm3 = vcmask 1024  }
 0x3c1   :  { %v86_v61 = vrot.slane %v85_v58, 4 }
 0x440   :  { %v818_v4 = vpop.xlane.xlu0 %817 }
 0x444   :  { %v824_v7 = vpop.xlane.xlu0 %823 }
 0x445   :  { %v821_v5 = vpop.xlane.xlu1 %820  ;;  %v828_v11 = vadd.f32 %v824_v7, %v818_v4 }
 0x447   :  { %4533 = vrcp.f32 %v828_v11  ;;  %v81_v11 = vrot.slane %v80_v62, 2 }
 0x449   :  { %v827_v10 = vpop.xlane.xlu1 %826 }
 0x44a   :  { %v829_v12 = vadd.f32 %v827_v10, %v821_v5  ;;  %v87_v10 = vadd.f32 %v86_v61, %v85_v58 }
 0x44c   :  { %4535 = vrcp.f32 %v829_v12 }
 0x451   :  { %v4534_v25 = vpop.eup %4533 }
 0x456   :  { %v4536_v26 = vpop.eup %4535 }
 0x485   :  { %v1047_v17 = vpop.f32.mrb[8].mxu1 }
 0x486   :  { %v901_v19 = vpop.f32.mrb[20].mxu0  ;;  %v4224_v21 = vpop.f32.mrb[9].mxu1 }
 0x487   :  { %v1048_v23 = vadd.f32 %v1047_v17, %v901_v19  ;;  %v4214_v24 = vpop.f32.mrb[21].mxu0 }
 0x488   :  { %v82_v24 = vadd.f32 %v81_v11, %v80_v62 }
 0x489   :  { %v1124_v28 = vmul.f32 %v4534_v25, %v1048_v23  ;;  %v88_v23 = vrot.slane %v87_v10, 2 }
 0x492   :  { %v1120_v27 = vpop.f32.mrb[22].mxu0 }
 0x493   :  { %v1125_v32 = vmul.f32 %v4536_v26, %v1120_v27  ;;  %v4229_v33 = vpop.f32.mrb[23].mxu0 }
 0x495   :  { %v1126_v34 = vpack.c.bf16 %v1125_v32, %v1124_v28  ;;  %v89_v28 = vadd.f32 %v88_v23, %v87_v10  ;;  %v83_v32 = vrot.slane %v82_v24, 1  ;;  %v5766_v10 = vsub.s32 4, %v4815_v42 }
 0x497   :  { %4235 = vmatmul.mubr.msk.bf16.vlgmr.msra.gmra.mrb[12].mxu1 %vm138_vm0, %v1126_v34  ;;  %v90_v33 = vrot.slane %v89_v28, 1  ;;  %v84_v34 = vadd.f32 %v83_v32, %v82_v24  ;;  %v5765_v24 = vsub.s32 5, %v4815_v42 }
 0x498   :  { %4262 = vmatprep.mubr.msk.bf16.mxu1 %vm4643_vm1, %v5771_v30 }
 0x499   :  { %4537 = vrcp.f32 %v84_v34 }
 0x56a   :  { %v1176_v35 = vpop.f32.mrb[12].mxu1 }
 0x56b   :  { %v5012_v36 = vadd.f32 %v1176_v35, %v4766_v1  ;;  %v4236_v37 = vpop.f32.mrb[13].mxu1  ;;  %v91_v35 = vadd.f32 %v90_v33, %v89_v28 }
 0x56c   :  { %v1179_v38 = vpop.f32.mrb[14].mxu1  ;;  %v4538_v37 = vpop.eup %4537 }
 0x56d   :  { %v5015_v39 = vadd.f32 %v1179_v38, %v4774_v3  ;;  %v4237_v40 = vpop.f32.mrb[15].mxu1  ;;  %v1185_v43 = vsel %vm138_vm0, %v5012_v36, 0.0  ;;  %4539 = vrcp.f32 %v91_v35  ;;  %v5069_v35 = vrot.slane %v4823_v47, %v5765_v24 }
 0x56e   :  { %1186 = vadd.xlane.f32.xlu0 %v1185_v43  ;;  %v5036_v40 = vld [vmem:[%s5751_s12] sm:$0xff]   ;;  %v5043_v43 = vld [vmem:[%s5751_s12 + $0x8] sm:$0xff]  }
 0x56f   :  { %v1188_v45 = vsel %vm138_vm0, %v5015_v39, 0.0  ;;  %4239 = vmatpush3.bf16.msra.mxu0 %v5036_v40 }
 0x570   :  { %1189 = vadd.xlane.f32.xlu1 %v1188_v45  ;;  %4240 = vmatprep.subr.bf16.mxu0 %v5771_v30 }
 0x573   :  { %4241 = vmatpush3.bf16.msra.mxu0 %v5043_v43 }
 0x574   :  { %4266 = vmatprep.subr.bf16.mxu0 %v5771_v30 }
 0x577   :  { %v4540_v38 = vpop.eup %4539 }
 0x5fb   :  { %v1187_v4 = vpop.xlane.xlu0 %1186 }
 0x5fc   :  { %v1191_v5 = vmul.f32 0.03125, %v1187_v4 }
 0x5fd   :  { %v1190_v7 = vpop.xlane.xlu1 %1189 }
 0x5fe   :  { %v1193_v12 = vsub.f32 %v5012_v36, %v1191_v5  ;;  %v1192_v17 = vmul.f32 0.03125, %v1190_v7 }
 0x600   :  { %v1194_v19 = vsub.f32 %v5015_v39, %v1192_v17  ;;  %v1195_v21 = vmul.f32 %v1193_v12, %v1193_v12 }
 0x602   :  { %v1197_v25 = vsel %vm138_vm0, %v1195_v21, 0.0  ;;  %v1196_v26 = vmul.f32 %v1194_v19, %v1194_v19 }
 0x603   :  { %1198 = vadd.xlane.f32.xlu0 %v1197_v25 }
 0x604   :  { %v1200_v27 = vsel %vm138_vm0, %v1196_v26, 0.0 }
 0x605   :  { %1201 = vadd.xlane.f32.xlu1 %v1200_v27 }
 0x616   :  { %1407 = vperm.xlu1 %4478, %v70_v56  }
 0x619   :  { %1402 = vperm.xlu0 %4477, %v69_v52  }
 0x61a   :  { %1428 = vperm.xlu1 %4478, %v4538_v37  }
 0x61e   :  { %1433 = vperm.xlu1 %4478, %v4540_v38  }
 0x690   :  { %v1199_v45 = vpop.xlane.xlu0 %1198 }
 0x691   :  { %v1203_v52 = vmul.f32 0.03125, %v1199_v45 }
 0x692   :  { %v1202_v55 = vpop.xlane.xlu1 %1201 }
 0x693   :  { %v1205_v56 = vadd.f32 1e-05, %v1203_v52  ;;  %v1204_v57 = vmul.f32 0.03125, %v1202_v55 }
 0x695   :  { %4541 = vrsqrt.f32 %v1205_v56  ;;  %v1206_v58 = vadd.f32 1e-05, %v1204_v57 }
 0x696   :  { %v5047_v61 = vpop.permute.xlu1 %1407 }
 0x697   :  { %4543 = vrsqrt.f32 %v1206_v58  ;;  %v1411_v62 = vmul.f32 %v5047_v61, %v4774_v3  ;;  %v5062_v3 = vrot.slane %v4823_v47, %v5766_v10 }
 0x698   :  { %v5051_v4 = vpop.permute.xlu0 %1402 }
 0x699   :  { %v1419_v5 = vsel %vm138_vm0, %v1411_v62, 0.0  ;;  %v1410_v7 = vmul.f32 %v5051_v4, %v4766_v1 }
 0x69a   :  { %v1420_v11 = vrot.slane %v1419_v5, 4  ;;  %v5064_v28 = vpop.permute.xlu1 %1428 }
 0x69b   :  { %v1412_v17 = vsel %vm138_vm0, %v1410_v7, 0.0 }
 0x69c   :  { %v1421_v21 = vadd.f32 %v1420_v11, %v1419_v5  ;;  %v1413_v23 = vrot.slane %v1412_v17, 4  ;;  %v5081_v11 = vld [vmem:[%s5753_s14] sm:$0xff]  }
 0x69e   :  { %v1422_v25 = vrot.slane %v1421_v21, 2  ;;  %v1414_v26 = vadd.f32 %v1413_v23, %v1412_v17  ;;  %v5073_v58 = vpop.permute.xlu1 %1433 }
 0x69f   :  { %v4542_v27 = vpop.eup %4541 }
 0x6a0   :  { %v1209_v1 = vmul.f32 %v4542_v27, %v1193_v12  ;;  %v1415_v32 = vrot.slane %v1414_v26, 2  ;;  %v1423_v33 = vadd.f32 %v1422_v25, %v1421_v21  ;;  %v5089_v25 = vld [vmem:[%s5753_s14 + $0x8] sm:$0xff]  }
 0x6a1   :  { %v4544_v34 = vpop.eup %4543 }
 0x6a2   :  { %v1215_v37 = vmul.f32 %v5062_v3, %v1209_v1  ;;  %v1210_v38 = vmul.f32 %v4544_v34, %v1194_v19  ;;  %v1416_v45 = vadd.f32 %v1415_v32, %v1414_v26  ;;  %v1424_v52 = vrot.slane %v1423_v33, 1  ;;  %v5128_v34 = vld [vmem:[%s5752_s13 + $0x18] sm:$0xff]  }
 0x6a4   :  { %v1216_v55 = vmul.f32 %v5062_v3, %v1210_v38  ;;  %v1417_v56 = vrot.slane %v1416_v45, 1  ;;  %v1425_v57 = vadd.f32 %v1424_v52, %v1423_v33  ;;  %v1221_v5 = vadd.f32 %v5069_v35, %v1215_v37  ;;  %v5107_v33 = vld [vmem:[%s5752_s13] sm:$0xff]   ;;  %v5142_v38 = vld [vmem:[%s5752_s13 + $0x28] sm:$0xff]   ;;  %v5156_v52 = vld [vmem:[%s5752_s13 + $0x38] sm:$0xff]  }
 0x6a5   :  { %4247 = vmatpush3.bf16.msra.mxu1 %v5107_v33  ;;  %v5135_v37 = vld [vmem:[%s5752_s13 + $0x20] sm:$0xff]  }
 0x6a6   :  { %v1418_v12 = vadd.f32 %v1417_v56, %v1416_v45  ;;  %v1437_v62 = vmul.f32 %v5073_v58, %v1425_v57  ;;  %v1222_v7 = vadd.f32 %v5069_v35, %v1216_v55  ;;  %4248 = vmatprep.subr.bf16.mxu1 %v5771_v30  ;;  %v5149_v45 = vld [vmem:[%s5752_s13 + $0x30] sm:$0xff]   ;;  %v5163_v55 = vld [vmem:[%s5746_s7] ss:$0 sm:$0xff] }
 0x6a7   :  { %5804 = vst [vmem:[#allocation10_spill] sm:$0xff] %v5163_v55 }
 0x6a8   :  { %v1436_v19 = vmul.f32 %v5064_v28, %v1418_v12  ;;  %v1439_v17 = vpack.c.bf16 %v1437_v62, %v1437_v62  ;;  %v1223_v21 = vpack.c.bf16 %v1222_v7, %v1221_v5  ;;  %v136_v5 = vld [vmem:[%s5754_s15] sm:$0x3] }
 0x6aa   :  { %v1438_v23 = vpack.c.bf16 %v1436_v19, %v1436_v19  ;;  %4243 = vmatmul.mubr.msk.bf16.vlgmr.msra.gmra.mrb[24].mxu0 %vm138_vm0, %v1223_v21  ;;  %v1447_v27 = vunpack.c.l.b16 %v1439_v17 }
 0x6ab   :  { %4267 = vmatpush3.bf16.msra.mxu0 %v5081_v11  ;;  %4270 = vmatprep.mubr.msk.bf16.mxu0 %vm4643_vm1, %v5771_v30 }
 0x6ac   :  { %v1446_v26 = vunpack.c.l.b16 %v1438_v23  ;;  %4268 = vmatprep.subr.bf16.mxu0 %v5771_v30 }
 0x6ae   :  { %v1449_v1 = vsel %vm1448_vm4, %v1447_v27, %v1446_v26  ;;  %v5171_v26 = vrot.slane %v136_v5, %v4818_v46 }
 0x6af   :  { %v1450_v32 = vpack.c.b16 %v1449_v1, %v1449_v1  ;;  %4269 = vmatpush3.bf16.msra.mxu0 %v5089_v25 }
 0x6b0   :  { %4274 = vmatprep.subr.bf16.mxu0 %v5771_v30  ;;  %5805 = vst [vmem:[#allocation11_spill] sm:$0xff] %v5171_v26 }
 0x6b2   :  { %4271 = vmatmul.mubr.msk.bf16.vlgmr.msra.gmra.mrb[28].mxu0 %vm138_vm0, %v1450_v32 }
 0x6b3   :  { %4275 = vmatpush3.bf16.msra.mxu0 %v4798_v29  ;;  %4278 = vmatprep.mubr.msk.bf16.mxu0 %vm4643_vm1, %v5771_v30  ;;  %v5114_v29 = vld [vmem:[%s5752_s13 + $0x8] sm:$0xff]  }
 0x6b4   :  { %4276 = vmatprep.subr.bf16.mxu0 %v5771_v30  ;;  %4249 = vmatpush3.bf16.msra.mxu1 %v5114_v29 }
 0x6b5   :  { %4250 = vmatprep.subr.bf16.mxu1 %v5771_v30 }
 0x6b7   :  { %4277 = vmatpush3.bf16.msra.mxu0 %v4807_v31  ;;  %v5121_v31 = vld [vmem:[%s5752_s13 + $0x10] sm:$0xff]  }
 0x6b8   :  { %4282 = vmatprep.subr.bf16.mxu0 %v5771_v30  ;;  %4251 = vmatpush3.bf16.msra.mxu1 %v5121_v31 }
 0x6b9   :  { %4252 = vmatprep.subr.bf16.mxu1 %v5771_v30 }
 0x6bc   :  { %4253 = vmatpush3.bf16.msra.mxu1 %v5128_v34 }
 0x6bd   :  { %4254 = vmatprep.subr.bf16.mxu1 %v5771_v30 }
 0x6c0   :  { %4255 = vmatpush3.bf16.msra.mxu1 %v5135_v37 }
 0x6c1   :  { %4256 = vmatprep.subr.bf16.mxu1 %v5771_v30 }
 0x6c4   :  { %4257 = vmatpush3.bf16.msra.mxu1 %v5142_v38 }
 0x6c5   :  { %4258 = vmatprep.subr.bf16.mxu1 %v5771_v30 }
 0x6c8   :  { %4259 = vmatpush3.bf16.msra.mxu1 %v5149_v45 }
 0x6c9   :  { %4260 = vmatprep.subr.bf16.mxu1 %v5771_v30 }
 0x6cc   :  { %4261 = vmatpush3.bf16.msra.mxu1 %v5156_v52 }
 0x6cd   :  { %4298 = vmatprep.subr.mxu1 %v5771_v30 }
 0x77d   :  { %v1279_v56 = vpop.f32.mrb[24].mxu0 }
 0x77e   :  { %v1280_v57 = vadd.f32 %v5163_v55, %v1279_v56  ;;  %v4244_v12 = vpop.f32.mrb[25].mxu0 }
 0x77f   :  { %v1282_v62 = vpop.f32.mrb[26].mxu0 }
 0x780   :  { %v1286_v7 = vmul.f32 %v1280_v57, %v1280_v57  ;;  %v1283_v19 = vadd.f32 %v5163_v55, %v1282_v62  ;;  %v4245_v17 = vpop.f32.mrb[27].mxu0 }
 0x782   :  { %v1288_v21 = vmul.f32 %v1286_v7, %v1280_v57  ;;  %v1287_v23 = vmul.f32 %v1283_v19, %v1283_v19 }
 0x784   :  { %v1290_v27 = vmul.f32 0.044715, %v1288_v21  ;;  %v1289_v1 = vmul.f32 %v1287_v23, %v1283_v19 }
 0x785   :  { %v1500_v32 = vpop.f32.mrb[28].mxu0 }
 0x786   :  { %v1292_v24 = vadd.f32 %v1290_v27, %v1280_v57  ;;  %v1291_v56 = vmul.f32 0.044715, %v1289_v1  ;;  %v1501_v12 = vadd.f32 %v1500_v32, %v5171_v26  ;;  %v4272_v10 = vpop.f32.mrb[29].mxu0 }
 0x787   :  { %v1503_v0 = vpop.f32.mrb[30].mxu0 }
 0x788   :  { %v1294_v54 = vmul.f32 0.7978846, %v1292_v24  ;;  %v1293_v18 = vadd.f32 %v1291_v56, %v1283_v19  ;;  %v1506_v49 = vmul.f32 %v1501_v12, %v1501_v12  ;;  %v4273_v30 = vpop.f32.mrb[31].mxu0 }
 0x78a   :  { %4545 = vtanh.f32 %v1294_v54  ;;  %v1295_v62 = vmul.f32 0.7978846, %v1293_v18  ;;  %v1507_v7 = vmul.f32 %v1506_v49, %v1501_v12  ;;  %v5175_v54 = vrot.slane %v136_v5, %v4830_v51  ;;  %v73_v5 = vld [vmem:[%s5807_s24] sm:$0x3] }
 0x78b   :  { %v5806_v18 = vmov 0.0  }
 0x78c   :  { %4547 = vtanh.f32 %v1295_v62  ;;  %v1508_v17 = vmul.f32 0.044715, %v1507_v7 }
 0x78e   :  { %v1509_v55 = vadd.f32 %v1508_v17, %v1501_v12  ;;  %v4645_v17 = vmov 1966171168  }
 0x790   :  { %v1510_v14 = vmul.f32 0.7978846, %v1509_v55 }
 0x792   :  { %4549 = vtanh.f32 %v1510_v14 }
 0x794   :  { %v4546_v21 = vpop.eup %4545 }
 0x795   :  { %v1298_v23 = vadd.f32 1.0, %v4546_v21  ;;  %v1542_v21 = vunpack.c.l.s4 %v4645_v17 }
 0x796   :  { %v4548_v27 = vpop.eup %4547 }
 0x797   :  { %v1300_v1 = vmul.f32 0.5, %v1298_v23  ;;  %v1299_v15 = vadd.f32 1.0, %v4548_v27  ;;  %v1543_v27 = vunpack.c.0.s8 %v1542_v21 }
 0x799   :  { %v1301_v32 = vmul.f32 0.5, %v1299_v15  ;;  %v1302_v10 = vmul.f32 %v1300_v1, %v1280_v57  ;;  %v5181_v15 = vld [vmem:[#allocation2] ss:$0 sm:$0xff] }
 0x79b   :  { %v1303_v0 = vmul.f32 %v1301_v32, %v1283_v19 }
 0x79c   :  { %v4550_v24 = vpop.eup %4549 }
 0x79d   :  { %v1304_v56 = vpack.c.bf16 %v1303_v0, %v1302_v10  ;;  %v1512_v26 = vadd.f32 1.0, %v4550_v24  ;;  %v5779_v10 = vmov 1.0   ;;  %v5196_v24 = vsub.s32 %v1543_v27, %v4815_v42 }
 0x79e   :  { %v5778_v27 = vsub.s32 6, %v4815_v42 }
 0x79f   :  { %4263 = vmatmul.mubr.bf16.vlgmr.msra.gmra.mrb[16].mxu1 %v1304_v56  ;;  %v1513_v30 = vmul.f32 0.5, %v1512_v26 }
 0x7a0   :  { %4300 = vmatprep.mubr.msk.f32.mxu1 %vm4643_vm1, %v5806_v18 }
 0x7a1   :  { %v1514_v14 = vmul.f32 %v1513_v30, %v1501_v12  ;;  %v5187_v12 = vadd.f32 1.0, %v73_v5 }
 0x7a3   :  { %v1519_v49 = vmul.f32 %v5175_v54, %v1514_v14  ;;  %vm3937_vm6 = vcmp.le.f32.partialorder %v5187_v12, 0.0  ;;  %vm3957_vm12 = vcmp.le.f32.partialorder %v5187_v12, 1.0 }
 0x7a4   :  { %v1539_v23 = vsel %vm3937_vm6, 1.0, %v5806_v18 }
 0x7a5   :  { %v1521_v55 = vsel %vm1520_vm5, %v1519_v49, 0.0  ;;  %v1631_v1 = vsub.f32 1.0, %v1539_v23 }
 0x7a6   :  { %1522 = vadd.xlane.f32.xlu1 %v1521_v55 }
 0x833   :  { %v1523_v57 = vpop.xlane.xlu1 %1522 }
 0x834   :  { %v1530_v19 = vadd.f32 %v5181_v15, %v1523_v57  ;;  %v5808_v57 = vmov 0  }
 0x836   :  { %v3936_v62 = vmul.f32 -1.442695, %v1530_v19 }
 0x838   :  { %4551 = vpow2.f32 %v3936_v62 }
 0x842   :  { %v4552_v26 = vpop.eup %4551 }
 0x843   :  { %v1534_v7 = vadd.f32 1.0, %v4552_v26 }
 0x845   :  { %4553 = vrcp.f32 %v1534_v7 }
 0x84f   :  { %v5191_v32 = vpop.eup %4553 }
 0x850   :  { %vm1629_vm7 = vcmp.ge.f32.partialorder %v5191_v32, 0.999 }
 0x851   :  { %v1630_v0 = vsel %vm1629_vm7, 0.0, %v5779_v10 }
 0x852   :  { %v5198_v56 = vmul.f32 %v1631_v1, %v1630_v0  ;;  %v5212_v1 = vrot.slane %v4823_v47, %v5778_v27 }
 0x854   :  { %v1640_v30 = vrot.slane %v5198_v56, %v5196_v24  ;;  %vm1682_vm13 = vcmp.gt.f32.partialorder %v5198_v56, 0.0 }
 0x856   :  { %v1648_v14 = vrot.slane %v1640_v30, %v5196_v24  ;;  %v1641_v49 = vcombine.high %v1640_v30, %v1640_v30 }
 0x858   :  { %vm1658_vm8 = vcmp.gt.f32.partialorder %v1648_v14, 0.0  ;;  %v1655_v55 = vrot.slane %v1641_v49, %v5196_v24 }
 0x859   :  { %v1660_v19 = vsel %vm1658_vm8, 1, %v5808_v57 }
 0x85a   :  { %v1665_v62 = vrot.slane %v1660_v19, %v4818_v46  ;;  %vm1659_vm9 = vcmp.gt.f32.partialorder %v1655_v55, 0.0  ;;  %v5225_v55 = vld [vmem:[%s5796_s3] sm:$0xff] }
 0x85b   :  { %v1661_v5 = vsel %vm1659_vm9, 1, %v5808_v57  ;;  %5810 = vst [vmem:[#allocation13_spill] sm:$0xff] %v5225_v55 }
 0x85c   :  { %1671 = vperm.xlu0 %4477, %v1665_v62   ;;  %v1669_v26 = vrot.slane %v1661_v5, %v4818_v46  ;;  %v5244_v5 = vld [vmem:[%s5796_s3 + $0x8] sm:$0xff] }
 0x85d   :  { %5813 = vst [vmem:[#allocation16_spill] sm:$0xff] %v5244_v5 }
 0x860   :  { %1674 = vperm.xlu0 %4477, %v1669_v26  }
 0x872   :  { %v1391_v7 = vpop.f32.mrb[16].mxu1 }
 0x873   :  { %v4264_v17 = vpop.f32.mrb[17].mxu1  ;;  %v1392_v0 = vadd.f32 %v1391_v7, %v5212_v1 }
 0x874   :  { %v1394_v21 = vpop.f32.mrb[18].mxu1 }
 0x875   :  { %v4265_v23 = vpop.f32.mrb[19].mxu1  ;;  %v5216_v30 = vadd.f32 %v1392_v0, %v5012_v36  ;;  %v1395_v14 = vadd.f32 %v1394_v21, %v5212_v1 }
 0x877   :  { %v5236_v19 = vadd.f32 %v1395_v14, %v5015_v39 }
 0x879   :  { %5811 = vst [vmem:[#allocation14_spill] sm:$0xff] %v5236_v19 }
 0x8db   :  { %v5219_v49 = vpop.permute.xlu0 %1671 }
 0x8dc   :  { %5809 = vst [vmem:[#allocation12_spill] sm:$0xff] %v5219_v49  ;;  %vm1676_vm10 = vcmp.eq.s32.totalorder %v5219_v49, 1 }
 0x8dd   :  { %v5231_v47 = vsel %vm1676_vm10, %v5216_v30, %v5225_v55 }
 0x8de   :  { %v1685_v36 = vsel %vm138_vm0, %v5231_v47, 0.0 }
 0x8df   :  { %v5238_v62 = vpop.permute.xlu0 %1674  ;;  %1686 = vadd.xlane.f32.xlu0 %v1685_v36 }
 0x8e0   :  { %5812 = vst [vmem:[#allocation15_spill] sm:$0xff] %v5238_v62  ;;  %vm1677_vm11 = vcmp.eq.s32.totalorder %v5238_v62, 1 }
 0x8e1   :  { %v5250_v26 = vsel %vm1677_vm11, %v5236_v19, %v5244_v5 }
 0x8e2   :  { %v1688_v39 = vsel %vm138_vm0, %v5250_v26, 0.0 }
 0x8e3   :  { %1689 = vadd.xlane.f32.xlu1 %v1688_v39 }
 0x96c   :  { %v1687_v7 = vpop.xlane.xlu0 %1686 }
 0x96d   :  { %v1691_v17 = vmul.f32 0.03125, %v1687_v7 }
 0x96f   :  { %v1693_v21 = vsub.f32 %v5231_v47, %v1691_v17 }
 0x970   :  { %v1690_v23 = vpop.xlane.xlu1 %1689 }
 0x971   :  { %v1692_v0 = vmul.f32 0.03125, %v1690_v23  ;;  %v1695_v14 = vmul.f32 %v1693_v21, %v1693_v21 }
 0x973   :  { %v1694_v36 = vsub.f32 %v5250_v26, %v1692_v0  ;;  %v1697_v27 = vsel %vm138_vm0, %v1695_v14, 0.0 }
 0x974   :  { %1698 = vadd.xlane.f32.xlu1 %v1697_v27 }
 0x975   :  { %v1696_v10 = vmul.f32 %v1694_v36, %v1694_v36 }
 0x977   :  { %v1700_v51 = vsel %vm138_vm0, %v1696_v10, 0.0 }
 0x978   :  { %1701 = vadd.xlane.f32.xlu1 %v1700_v51 }
 0xa01   :  { %v1699_v42 = vpop.xlane.xlu1 %1698 }
 0xa02   :  { %v1703_v62 = vmul.f32 0.03125, %v1699_v42 }
 0xa04   :  { %v1705_v49 = vadd.f32 1e-05, %v1703_v62 }
 0xa05   :  { %v1702_v39 = vpop.xlane.xlu1 %1701 }
 0xa06   :  { %4555 = vrsqrt.f32 %v1705_v49  ;;  %v1704_v7 = vmul.f32 0.03125, %v1702_v39 }
 0xa08   :  { %v1706_v19 = vadd.f32 1e-05, %v1704_v7 }
 0xa0a   :  { %4557 = vrsqrt.f32 %v1706_v19 }
 0xa10   :  { %v4556_v17 = vpop.eup %4555 }
 0xa11   :  { %v1709_v23 = vmul.f32 %v4556_v17, %v1693_v21 }
 0xa13   :  { %v1711_v0 = vmul.f32 %v1709_v23, %v4827_v50  ;;  %v1716_v49 = vmul.f32 %v1709_v23, %v4847_v63 }
 0xa14   :  { %v4558_v5 = vpop.eup %4557 }
 0xa15   :  { %v1710_v55 = vmul.f32 %v4558_v5, %v1694_v36  ;;  %v1713_v14 = vadd.f32 %v1711_v0, %v4840_v59  ;;  %v1718_v19 = vadd.f32 %v1716_v49, %v4864_v13 }
 0xa17   :  { %v1712_v27 = vmul.f32 %v1710_v55, %v4827_v50  ;;  %v1717_v42 = vmul.f32 %v1710_v55, %v4847_v63 }
 0xa19   :  { %v1714_v51 = vadd.f32 %v1712_v27, %v4840_v59  ;;  %v1719_v50 = vadd.f32 %v1717_v42, %v4864_v13 }
 0xa1b   :  { %v1715_v10 = vpack.c.bf16 %v1714_v51, %v1713_v14  ;;  %v1720_v59 = vpack.c.bf16 %v1719_v50, %v1718_v19 }
 0xa1d   :  { %4279 = vmatmul.mubr.msk.bf16.vlgmr.msra.gmra.mrb[32].mxu0 %vm138_vm0, %v1715_v10 }
 0xa1e   :  { %4283 = vmatpush3.bf16.msra.mxu0 %v4856_v8  ;;  %4286 = vmatprep.mubr.msk.bf16.mxu0 %vm4643_vm1, %v5806_v18 }
 0xa1f   :  { %4284 = vmatprep.subr.bf16.mxu0 %v5806_v18 }
 0xa22   :  { %4285 = vmatpush3.bf16.msra.mxu0 %v4874_v16 }
 0xa23   :  { %4290 = vmatprep.subr.bf16.mxu0 %v5806_v18 }
 0xa25   :  { %4287 = vmatmul.mubr.msk.bf16.vlgmr.msra.gmra.mrb[36].mxu0 %vm138_vm0, %v1720_v59 }
 0xa26   :  { %4291 = vmatpush3.bf16.msra.mxu0 %v4887_v20  ;;  %4294 = vmatprep.mubr.msk.bf16.mxu0 %vm4643_vm1, %v5806_v18 }
 0xa27   :  { %4292 = vmatprep.subr.bf16.mxu0 %v5806_v18 }
 0xa2a   :  { %4293 = vmatpush3.bf16.msra.mxu0 %v4895_v22 }
 0xa2b   :  { %4303 = vmatprep.subr.mxu0 %v5806_v18 }
 0xa2d   :  { %4295 = vmatmul.mubr.msk.bf16.vlgmr.msra.gmra.mrb[40].mxu0 %vm138_vm0, %v1720_v59 }
 0xa2e   :  { %4305 = vmatprep.mubr.msk.f32.mxu0 %vm4643_vm1, %v5806_v18 }
 0xaf0   :  { %v1758_v63 = vpop.f32.mrb[32].mxu0 }
 0xaf1   :  { %v4280_v8 = vpop.f32.mrb[33].mxu0 }
 0xaf2   :  { %v1761_v13 = vpop.f32.mrb[34].mxu0 }
 0xaf3   :  { %v4281_v16 = vpop.f32.mrb[35].mxu0 }
 0xaf8   :  { %v1802_v55 = vpop.f32.mrb[36].mxu0 }
 0xaf9   :  { %v4288_v20 = vpop.f32.mrb[37].mxu0  ;;  %4299 = vmatpush3.xpose.msk.msra.mxu1 %vm138_vm0, %v1802_v55 }
 0xafa   :  { %v1805_v62 = vpop.f32.mrb[38].mxu0  ;;  %4308 = vmatprep.subr.mxu1 %v5806_v18 }
 0xafb   :  { %v4289_v5 = vpop.f32.mrb[39].mxu0  ;;  %4304 = vmatpush3.xpose.msk.msra.mxu0 %vm138_vm0, %v1805_v62 }
 0xafc   :  { %4301 = vmatmul.mubr.msk.f32.vlgmr.msra.gmra.mrb[10].mxu1 %vm138_vm0, %v1758_v63  ;;  %4313 = vmatprep.subr.mxu0 %v5806_v18 }
 0xafd   :  { %4309 = vmatpush3.xpose.msk.msra.mxu1 %vm138_vm0, %v4932_v44  ;;  %4310 = vmatprep.mubr.msk.f32.mxu1 %vm4643_vm1, %v5806_v18 }
 0xafe   :  { %4306 = vmatmul.mubr.msk.f32.vlgmr.msra.gmra.mrb[44].mxu0 %vm138_vm0, %v1761_v13  ;;  %4318 = vmatprep.subr.mxu1 %v5806_v18 }
 0xaff   :  { %4314 = vmatpush3.xpose.msk.msra.mxu0 %vm138_vm0, %v4937_v48  ;;  %4315 = vmatprep.mubr.msk.f32.mxu0 %vm4643_vm1, %v5806_v18 }
 0xb00   :  { %v5298_v22 = vpop.f32.mrb[40].mxu0  ;;  %4311 = vmatmul.mubr.msk.f32.vlgmr.msra.gmra.mrb[20].mxu1 %vm138_vm0, %v1758_v63  ;;  %4323 = vmatprep.subr.mxu0 %v5806_v18 }
 0xb01   :  { %v4296_v44 = vpop.f32.mrb[41].mxu0  ;;  %4319 = vmatpush3.msra.mxu1 %v4966_v6  ;;  %4320 = vmatprep.mubr.msk.f32.mxu1 %vm4643_vm1, %v5806_v18 }
 0xb02   :  { %v1846_v21 = vpop.f32.mrb[42].mxu0  ;;  %4316 = vmatmul.mubr.msk.f32.vlgmr.msra.gmra.mrb[46].mxu0 %vm138_vm0, %v1761_v13  ;;  %4328 = vmatprep.subr.mxu1 %v5806_v18 }
 0xb03   :  { %v4297_v48 = vpop.f32.mrb[43].mxu0  ;;  %4324 = vmatpush3.msra.mxu0 %v4969_v9  ;;  %4325 = vmatprep.mubr.msk.f32.mxu0 %vm4643_vm1, %v5806_v18 }
 0xb04   :  { %4333 = vmatprep.subr.mxu0 %v5806_v18 }
 0xbcf   :  { %v1922_v36 = vpop.f32.mrb[10].mxu1 }
 0xbd0   :  { %v2002_v39 = vmul.f32 0.17677669, %v1922_v36  ;;  %v4302_v7 = vpop.f32.mrb[11].mxu1 }
 0xbd1   :  { %v1998_v6 = vpop.f32.mrb[44].mxu0 }
 0xbd2   :  { %v2003_v17 = vmul.f32 0.17677669, %v1998_v6  ;;  %v4307_v23 = vpop.f32.mrb[45].mxu0  ;;  %v2004_v0 = vadd.f32 %v4955_v53, %v2002_v39 }
 0xbd3   :  { %v2072_v27 = vpop.f32.mrb[20].mxu1 }
 0xbd4   :  { %v4312_v14 = vpop.f32.mrb[21].mxu1  ;;  %v2148_v51 = vsel %vm789_vm2, %v2004_v0, -inf  ;;  %v2005_v42 = vadd.f32 %v4961_v60, %v2003_v17  ;;  %v2146_v50 = vmul.f32 0.17677669, %v2072_v27 }
 0xbd5   :  { %v2142_v9 = vpop.f32.mrb[46].mxu0  ;;  %2149 = vmax.xlane.f32.xlu1 %v2148_v51 }
 0xbd6   :  { %v2147_v10 = vmul.f32 0.17677669, %v2142_v9  ;;  %v4317_v49 = vpop.f32.mrb[47].mxu0  ;;  %v2151_v59 = vsel %vm789_vm2, %v2005_v42, -inf  ;;  %v2154_v63 = vsel %vm789_vm2, %v2146_v50, -inf }
 0xbd8   :  { %v2157_v19 = vsel %vm789_vm2, %v2147_v10, -inf }
 0xbd9   :  { %2158 = vmax.xlane.f32.xlu0 %v2157_v19  ;;  %2152 = vmax.xlane.f32.xlu1 %v2151_v59 }
 0xbdd   :  { %2155 = vmax.xlane.f32.xlu1 %v2154_v63 }
 0xc62   :  { %v2150_v53 = vpop.xlane.xlu1 %2149 }
 0xc66   :  { %v2159_v8 = vpop.xlane.xlu0 %2158  ;;  %v2153_v13 = vpop.xlane.xlu1 %2152 }
 0xc67   :  { %v2161_v16 = vmax.f32 %v2153_v13, %v2159_v8 }
 0xc69   :  { %v2163_v55 = vsub.f32 %v2005_v42, %v2161_v16  ;;  %v2169_v60 = vsub.f32 %v2147_v10, %v2161_v16 }
 0xc6a   :  { %v2156_v20 = vpop.xlane.xlu1 %2155 }
 0xc6b   :  { %v2166_v62 = vmul.f32 1.442695, %v2163_v55  ;;  %v2172_v5 = vmul.f32 1.442695, %v2169_v60  ;;  %v2160_v44 = vmax.f32 %v2150_v53, %v2156_v20 }
 0xc6d   :  { %4559 = vpow2.f32 %v2166_v62  ;;  %v2162_v48 = vsub.f32 %v2004_v0, %v2160_v44  ;;  %v2168_v36 = vsub.f32 %v2146_v50, %v2160_v44 }
 0xc6e   :  { %4561 = vpow2.f32 %v2172_v5 }
 0xc6f   :  { %v2164_v39 = vmul.f32 1.442695, %v2162_v48  ;;  %v2170_v7 = vmul.f32 1.442695, %v2168_v36 }
 0xc71   :  { %4563 = vpow2.f32 %v2164_v39  ;;  %v5378_v39 = vsub.f32 1.0, %v5191_v32 }
 0xc72   :  { %4565 = vpow2.f32 %v2170_v7  ;;  %v5382_v7 = vrot.slane %v5191_v32, %v5196_v24 }
 0xc77   :  { %v4560_v6 = vpop.eup %4559 }
 0xc78   :  { %v4562_v17 = vpop.eup %4561  ;;  %v2177_v23 = vsel %vm789_vm2, %v4560_v6, 0.0 }
 0xc79   :  { %4326 = vmatmul.mubr.msk.f32.vlgmr.msra.gmra.mrb[48].mxu0 %vm789_vm2, %v4562_v17  ;;  %2178 = vadd.xlane.f32.xlu0 %v2177_v23  ;;  %v2183_v14 = vsel %vm789_vm2, %v4562_v17, 0.0  ;;  %v1555_v17 = vrot.slane %v5382_v7, %v5196_v24 }
 0xc7a   :  { %4334 = vmatpush3.msra.mxu0 %v1846_v21  ;;  %4335 = vmatprep.mubr.msk.f32.mxu0 %vm4643_vm1, %v5806_v18 }
 0xc7b   :  { %v4564_v27 = vpop.eup %4563  ;;  %4346 = vmatprep.subr.bf16.mxu0 %v5806_v18 }
 0xc7c   :  { %v4566_v0 = vpop.eup %4565  ;;  %v2174_v51 = vsel %vm789_vm2, %v4564_v27, 0.0 }
 0xc7d   :  { %4321 = vmatmul.mubr.msk.f32.vlgmr.msra.gmra.mrb[22].mxu1 %vm789_vm2, %v4566_v0  ;;  %2184 = vadd.xlane.f32.xlu0 %v2183_v14  ;;  %v2180_v21 = vsel %vm789_vm2, %v4566_v0, 0.0 }
 0xc7e   :  { %4329 = vmatpush3.msra.mxu1 %v5298_v22  ;;  %2175 = vadd.xlane.f32.xlu1 %v2174_v51  ;;  %v2669_v51 = vmul.f32 %v5250_v26, %v5047_v61 }
 0xc7f   :  { %4330 = vmatprep.mubr.msk.f32.mxu1 %vm4643_vm1, %v5806_v18  ;;  %4338 = vmatprep.subr.bf16.mxu1 %v5806_v18 }
 0xc81   :  { %4336 = vmatmul.mubr.msk.f32.vlgmr.msra.gmra.mrb[48].mxu0 %vm789_vm2, %v4560_v6  ;;  %v5386_v6 = vrot.slane %v5378_v39, %v5196_v24 }
 0xc82   :  { %2181 = vadd.xlane.f32.xlu1 %v2180_v21  ;;  %4347 = vmatpush3.bf16.msra.mxu0 %v5036_v40  ;;  %v2668_v21 = vmul.f32 %v5231_v47, %v5051_v4 }
 0xc83   :  { %4348 = vmatprep.subr.bf16.mxu0 %v5806_v18  ;;  %4350 = vmatprep.mubr.msk.bf16.mxu0 %vm4643_vm1, %v5806_v18  ;;  %v1594_v23 = vcombine.high %v5386_v6, %v5386_v6 }
 0xc85   :  { %4331 = vmatmul.mubr.msk.f32.vlgmr.msra.gmra.mrb[22].mxu1 %vm789_vm2, %v4564_v27  ;;  %v1566_v27 = vrot.slane %v1555_v17, %v4818_v46  ;;  %v1608_v0 = vrot.slane %v1594_v23, %v5196_v24 }
 0xc86   :  { %4339 = vmatpush3.bf16.msra.mxu1 %v4997_v2  ;;  %4342 = vmatprep.mubr.msk.bf16.mxu1 %vm4643_vm1, %v5806_v18 }
 0xc87   :  { %4340 = vmatprep.subr.bf16.mxu1 %v5806_v18  ;;  %4349 = vmatpush3.bf16.msra.mxu0 %v5043_v43  ;;  %v1616_v14 = vrot.slane %v1608_v0, %v4818_v46 }
 0xc88   :  { %4374 = vmatprep.subr.bf16.mxu0 %v5806_v18 }
 0xc8a   :  { %4341 = vmatpush3.bf16.msra.mxu1 %v5004_v41 }
 0xc8b   :  { %4354 = vmatprep.subr.bf16.mxu1 %v5806_v18 }
 0xd06   :  { %v2179_v40 = vpop.xlane.xlu0 %2178 }
 0xd0a   :  { %v2185_v42 = vpop.xlane.xlu0 %2184 }
 0xd0b   :  { %v2176_v22 = vpop.xlane.xlu1 %2175  ;;  %v2187_v10 = vadd.f32 %v2185_v42, %v2179_v40  ;;  %v2677_v40 = vsel %vm138_vm0, %v2669_v51, 0.0 }
 0xd0c   :  { %v2678_v42 = vrot.slane %v2677_v40, 4 }
 0xd0d   :  { %4567 = vrcp.f32 %v2187_v10 }
 0xd0e   :  { %v2679_v10 = vadd.f32 %v2678_v42, %v2677_v40 }
 0xd0f   :  { %v2182_v9 = vpop.xlane.xlu1 %2181 }
 0xd10   :  { %v2186_v49 = vadd.f32 %v2182_v9, %v2176_v22  ;;  %v2670_v22 = vsel %vm138_vm0, %v2668_v21, 0.0 }
 0xd11   :  { %v2671_v9 = vrot.slane %v2670_v22, 4 }
 0xd12   :  { %4569 = vrcp.f32 %v2186_v49 }
 0xd13   :  { %v2672_v49 = vadd.f32 %v2671_v9, %v2670_v22 }
 0xd17   :  { %v4568_v19 = vpop.eup %4567 }
 0xd1c   :  { %v4570_v59 = vpop.eup %4569 }
 0xd54   :  { %v2478_v2 = vpop.f32.mrb[48].mxu0 }
 0xd55   :  { %v4337_v50 = vpop.f32.mrb[49].mxu0  ;;  %v2483_v43 = vmul.f32 %v4568_v19, %v2478_v2 }
 0xd56   :  { %v2680_v50 = vrot.slane %v2679_v10, 2 }
 0xd58   :  { %v2405_v63 = vpop.f32.mrb[22].mxu1 }
 0xd59   :  { %v2482_v53 = vmul.f32 %v4570_v59, %v2405_v63  ;;  %v4332_v8 = vpop.f32.mrb[23].mxu1  ;;  %v2673_v63 = vrot.slane %v2672_v49, 2 }
 0xd5a   :  { %v2681_v8 = vadd.f32 %v2680_v50, %v2679_v10 }
 0xd5b   :  { %v2484_v13 = vpack.c.bf16 %v2483_v43, %v2482_v53 }
 0xd5c   :  { %v2682_v4 = vrot.slane %v2681_v8, 1 }
 0xd5d   :  { %4343 = vmatmul.mubr.msk.bf16.vlgmr.msra.gmra.mrb[24].mxu1 %vm138_vm0, %v2484_v13  ;;  %v2674_v13 = vadd.f32 %v2673_v63, %v2672_v49 }
 0xd5e   :  { %4355 = vmatpush3.bf16.msra.mxu1 %v5107_v33  ;;  %4370 = vmatprep.mubr.msk.bf16.mxu1 %vm4643_vm1, %v5806_v18 }
 0xd5f   :  { %4356 = vmatprep.subr.bf16.mxu1 %v5806_v18 }
 0xd62   :  { %4357 = vmatpush3.bf16.msra.mxu1 %v5114_v29 }
 0xd63   :  { %4358 = vmatprep.subr.bf16.mxu1 %v5806_v18 }
 0xd66   :  { %4359 = vmatpush3.bf16.msra.mxu1 %v5121_v31 }
 0xd67   :  { %4360 = vmatprep.subr.bf16.mxu1 %v5806_v18 }
 0xd6a   :  { %4361 = vmatpush3.bf16.msra.mxu1 %v5128_v34 }
 0xd6b   :  { %4362 = vmatprep.subr.bf16.mxu1 %v5806_v18 }
 0xd6e   :  { %4363 = vmatpush3.bf16.msra.mxu1 %v5135_v37 }
 0xd6f   :  { %4364 = vmatprep.subr.bf16.mxu1 %v5806_v18 }
 0xd72   :  { %4365 = vmatpush3.bf16.msra.mxu1 %v5142_v38 }
 0xd73   :  { %4366 = vmatprep.subr.bf16.mxu1 %v5806_v18 }
 0xd76   :  { %4367 = vmatpush3.bf16.msra.mxu1 %v5149_v45 }
 0xd77   :  { %4368 = vmatprep.subr.bf16.mxu1 %v5806_v18 }
 0xd7a   :  { %4369 = vmatpush3.bf16.msra.mxu1 %v5156_v52 }
 0xd7b   :  { %4406 = vmatprep.subr.mxu1 %v5806_v18 }
 0xe30   :  { %v2522_v41 = vpop.f32.mrb[24].mxu1 }
 0xe31   :  { %v5364_v33 = vadd.f32 %v2522_v41, %v5231_v47  ;;  %v4344_v29 = vpop.f32.mrb[25].mxu1  ;;  %v2675_v41 = vrot.slane %v2674_v13, 1 }
 0xe32   :  { %v2525_v31 = vpop.f32.mrb[26].mxu1  ;;  %v2683_v29 = vadd.f32 %v2682_v4, %v2681_v8 }
 0xe33   :  { %v5367_v34 = vadd.f32 %v2525_v31, %v5250_v26  ;;  %v4345_v37 = vpop.f32.mrb[27].mxu1  ;;  %v2531_v38 = vsel %vm138_vm0, %v5364_v33, 0.0 }
 0xe34   :  { %2532 = vadd.xlane.f32.xlu1 %v2531_v38  ;;  %v2676_v37 = vadd.f32 %v2675_v41, %v2674_v13 }
 0xe35   :  { %v2534_v45 = vsel %vm138_vm0, %v5367_v34, 0.0 }
 0xe36   :  { %2535 = vadd.xlane.f32.xlu0 %v2534_v45 }
 0xec1   :  { %v2533_v52 = vpop.xlane.xlu1 %2532 }
 0xec2   :  { %v2537_v16 = vmul.f32 0.03125, %v2533_v52  ;;  %v2685_v52 = vmul.f32 %v2683_v29, %v5073_v58 }
 0xec3   :  { %v2536_v55 = vpop.xlane.xlu0 %2535 }
 0xec4   :  { %v2539_v60 = vsub.f32 %v5364_v33, %v2537_v16  ;;  %v2538_v20 = vmul.f32 0.03125, %v2536_v55 }
 0xec6   :  { %v2540_v62 = vsub.f32 %v5367_v34, %v2538_v20  ;;  %v2541_v5 = vmul.f32 %v2539_v60, %v2539_v60  ;;  %v2684_v20 = vmul.f32 %v2676_v37, %v5064_v28  ;;  %v4499_v28 = vld [vmem:[%s5747_s8 + $0x10] sm:$0xff]  }
 0xec8   :  { %v2543_v44 = vsel %vm138_vm0, %v2541_v5, 0.0  ;;  %v2542_v48 = vmul.f32 %v2540_v62, %v2540_v62  ;;  %v2686_v17 = vpack.c.bf16 %v2684_v20, %v2684_v20 }
 0xec9   :  { %2544 = vadd.xlane.f32.xlu1 %v2543_v44  ;;  %v2687_v44 = vpack.c.bf16 %v2685_v52, %v2685_v52 }
 0xeca   :  { %v2546_v36 = vsel %vm138_vm0, %v2542_v48, 0.0  ;;  %v2690_v58 = vunpack.c.l.b16 %v2686_v17 }
 0xecb   :  { %2547 = vadd.xlane.f32.xlu0 %v2546_v36 }
 0xee1   :  { %1572 = vperm.xlu0 %4477, %v1566_v27   ;;  %v2691_v27 = vunpack.c.l.b16 %v2687_v44 }
 0xee5   :  { %1622 = vperm.xlu0 %4477, %v1616_v14   ;;  %v5817_v14 = vld [vmem:[#allocation10_spill] sm:$0xff] }
 0xf56   :  { %v2545_v2 = vpop.xlane.xlu1 %2544 }
 0xf57   :  { %v2549_v19 = vmul.f32 0.03125, %v2545_v2 }
 0xf58   :  { %v2548_v59 = vpop.xlane.xlu0 %2547 }
 0xf59   :  { %v2551_v43 = vadd.f32 1e-05, %v2549_v19  ;;  %v2550_v53 = vmul.f32 0.03125, %v2548_v59 }
 0xf5b   :  { %4571 = vrsqrt.f32 %v2551_v43  ;;  %v2552_v61 = vadd.f32 1e-05, %v2550_v53  ;;  %v5818_v43 = vld [vmem:[#allocation11_spill] sm:$0xff] }
 0xf5d   :  { %4573 = vrsqrt.f32 %v2552_v61 }
 0xf65   :  { %v4572_v31 = vpop.eup %4571 }
 0xf66   :  { %v2555_v38 = vmul.f32 %v4572_v31, %v2539_v60  ;;  %v5815_v60 = vld [vmem:[#allocation8_spill] sm:$0xff] }
 0xf67   :  { %v4574_v45 = vpop.eup %4573 }
 0xf68   :  { %v2557_v16 = vmul.f32 %v2555_v38, %v5062_v3  ;;  %v2556_v55 = vmul.f32 %v4574_v45, %v2540_v62 }
 0xf6a   :  { %v2558_v5 = vmul.f32 %v2556_v55, %v5062_v3  ;;  %v2559_v48 = vadd.f32 %v2557_v16, %v5069_v35  ;;  %v2692_v3 = vsel %vm1448_vm4, %v2691_v27, %v2690_v58 }
 0xf6c   :  { %v2560_v36 = vadd.f32 %v2558_v5, %v5069_v35  ;;  %v2693_v35 = vpack.c.b16 %v2692_v3, %v2692_v3 }
 0xf6e   :  { %v2561_v23 = vpack.c.bf16 %v2560_v36, %v2559_v48 }
 0xf70   :  { %4351 = vmatmul.mubr.msk.bf16.vlgmr.msra.gmra.mrb[52].mxu0 %vm138_vm0, %v2561_v23 }
 0xf71   :  { %4375 = vmatpush3.bf16.msra.mxu0 %v5081_v11  ;;  %4378 = vmatprep.mubr.msk.bf16.mxu0 %vm4643_vm1, %v5806_v18  ;;  %v4500_v11 = vld [vmem:[%s5747_s8 + $0x18] sm:$0xff]  }
 0xf72   :  { %4376 = vmatprep.subr.bf16.mxu0 %v5806_v18 }
 0xf75   :  { %4377 = vmatpush3.bf16.msra.mxu0 %v5089_v25  ;;  %v5814_v25 = vld [vmem:[#allocation9_spill] sm:$0xff] }
 0xf76   :  { %4382 = vmatprep.subr.bf16.mxu0 %v5806_v18  ;;  %v5816_v62 = vpack.c.bf16 %v5814_v25, %v5815_v60 }
 0xf78   :  { %4379 = vmatmul.mubr.msk.bf16.vlgmr.msra.gmra.mrb[56].mxu0 %vm138_vm0, %v2693_v35 }
 0xf79   :  { %4383 = vmatpush3.bf16.msra.mxu0 %v4499_v28  ;;  %4386 = vmatprep.mubr.msk.bf16.mxu0 %vm4643_vm1, %v5806_v18 }
 0xf7a   :  { %4384 = vmatprep.subr.bf16.mxu0 %v5806_v18 }
 0xf7d   :  { %4385 = vmatpush3.bf16.msra.mxu0 %v4500_v11 }
 0xf7e   :  { %4390 = vmatprep.subr.bf16.mxu0 %v5806_v18 }
 0xf80   :  { %4387 = vmatmul.mubr.msk.bf16.vlgmr.msra.gmra.mrb[60].mxu0 %vm138_vm0, %v5816_v62 }
 0xf81   :  { %4394 = vmatprep.mubr.msk.bf16.mxu0 %vm4643_vm1, %v5806_v18 }
0x1043   :  { %v2599_v0 = vpop.f32.mrb[52].mxu0 }
0x1044   :  { %v2600_v51 = vadd.f32 %v5817_v14, %v2599_v0  ;;  %v4352_v21 = vpop.f32.mrb[53].mxu0 }
0x1045   :  { %v2602_v40 = vpop.f32.mrb[54].mxu0 }
0x1046   :  { %v2606_v22 = vmul.f32 %v2600_v51, %v2600_v51  ;;  %v2603_v42 = vadd.f32 %v5817_v14, %v2602_v40  ;;  %v4353_v9 = vpop.f32.mrb[55].mxu0  ;;  %v1548_v14 = vcombine.high %v5382_v7, %v5382_v7  ;;  %v1601_v40 = vrot.slane %v5386_v6, %v5196_v24 }
0x1048   :  { %v2608_v10 = vmul.f32 %v2606_v22, %v2600_v51  ;;  %v2607_v49 = vmul.f32 %v2603_v42, %v2603_v42  ;;  %v1612_v22 = vrot.slane %v1601_v40, %v4818_v46 }
0x104a   :  { %v2610_v2 = vmul.f32 0.044715, %v2608_v10  ;;  %v2609_v50 = vmul.f32 %v2607_v49, %v2603_v42 }
0x104b   :  { %v2731_v19 = vpop.f32.mrb[56].mxu0 }
0x104c   :  { %v2612_v59 = vadd.f32 %v2610_v2, %v2600_v51  ;;  %v2611_v63 = vmul.f32 0.044715, %v2609_v50  ;;  %v2732_v53 = vadd.f32 %v2731_v19, %v5818_v43  ;;  %v4380_v8 = vpop.f32.mrb[57].mxu0  ;;  %v2758_v50 = vsel %vm3957_vm12, 1.0, %v5806_v18 }
0x104d   :  { %v2734_v61 = vpop.f32.mrb[58].mxu0  ;;  %v2853_v43 = vsub.f32 1.0, %v2758_v50  ;;  %v5821_v50 = vld [vmem:[#allocation13_spill] sm:$0xff] }
0x104e   :  { %v2614_v13 = vmul.f32 0.7978846, %v2612_v59  ;;  %v2613_v4 = vadd.f32 %v2611_v63, %v2603_v42  ;;  %v2737_v41 = vmul.f32 %v2732_v53, %v2732_v53  ;;  %v4381_v29 = vpop.f32.mrb[59].mxu0 }
0x1050   :  { %4575 = vtanh.f32 %v2614_v13  ;;  %v2615_v31 = vmul.f32 0.7978846, %v2613_v4  ;;  %v2738_v37 = vmul.f32 %v2737_v41, %v2732_v53  ;;  %v1683_v13 = vsel %vm1682_vm13, %v5191_v32, 0.0 }
0x1051   :  { %v5819_v41 = vmov 1.0  }
0x1052   :  { %4577 = vtanh.f32 %v2615_v31  ;;  %v2739_v38 = vmul.f32 0.044715, %v2738_v37 }
0x1053   :  { %v5435_v45 = vpop.f32.mrb[60].mxu0 }
0x1054   :  { %v2740_v52 = vadd.f32 %v2739_v38, %v2732_v53  ;;  %v4388_v16 = vpop.f32.mrb[61].mxu0 }
0x1055   :  { %v5437_v55 = vpop.f32.mrb[62].mxu0  ;;  %v1684_v16 = vsel %vm1682_vm13, %v5378_v39, 0.0 }
0x1056   :  { %v2741_v20 = vmul.f32 0.7978846, %v2740_v52  ;;  %v4389_v5 = vpop.f32.mrb[63].mxu0 }
0x1058   :  { %4579 = vtanh.f32 %v2741_v20 }
0x105a   :  { %v4576_v44 = vpop.eup %4575 }
0x105b   :  { %v2618_v48 = vadd.f32 1.0, %v4576_v44 }
0x105c   :  { %v4578_v36 = vpop.eup %4577 }
0x105d   :  { %v2620_v17 = vmul.f32 0.5, %v2618_v48  ;;  %v2619_v23 = vadd.f32 1.0, %v4578_v36 }
0x105f   :  { %v2621_v27 = vmul.f32 0.5, %v2619_v23  ;;  %v2622_v58 = vmul.f32 %v2620_v17, %v2600_v51  ;;  %v1562_v51 = vrot.slane %v1548_v14, %v5196_v24  ;;  %v5476_v17 = vld [vmem:[%s5820_s5] sm:$0x3] }
0x1061   :  { %v2623_v3 = vmul.f32 %v2621_v27, %v2603_v42  ;;  %v1570_v21 = vrot.slane %v1562_v51, %v4818_v46 }
0x1062   :  { %v4580_v28 = vpop.eup %4579 }
0x1063   :  { %v2624_v35 = vpack.c.bf16 %v2623_v3, %v2622_v58  ;;  %v2743_v11 = vadd.f32 1.0, %v4580_v28 }
0x1065   :  { %4371 = vmatmul.mubr.bf16.vlgmr.msra.gmra.mrb[28].mxu1 %v2624_v35  ;;  %v2744_v25 = vmul.f32 0.5, %v2743_v11 }
0x1066   :  { %4408 = vmatprep.mubr.msk.f32.mxu1 %vm4643_vm1, %v5806_v18 }
0x1067   :  { %v2745_v60 = vmul.f32 %v2744_v25, %v2732_v53 }
0x1069   :  { %v2746_v62 = vmul.f32 %v2745_v60, %v5175_v54 }
0x106b   :  { %v2747_v0 = vsel %vm1520_vm5, %v2746_v62, 0.0 }
0x106c   :  { %2748 = vadd.xlane.f32.xlu1 %v2747_v0 }
0x107d   :  { %1576 = vperm.xlu1 %4478, %v1570_v21   ;;  %v1573_v21 = vpop.permute.xlu0 %1572 }
0x1081   :  { %1618 = vperm.xlu1 %4478, %v1612_v22   ;;  %v1623_v22 = vpop.permute.xlu0 %1622 }
0x10f9   :  { %v2749_v42 = vpop.xlane.xlu1 %2748 }
0x10fa   :  { %v2750_v54 = vadd.f32 %v5181_v15, %v2749_v42 }
0x10fc   :  { %v3956_v9 = vmul.f32 -1.442695, %v2750_v54 }
0x10fd   :  { %v1577_v51 = vpop.permute.xlu1 %1576 }
0x10fe   :  { %4581 = vpow2.f32 %v3956_v9 }
0x1101   :  { %v1619_v40 = vpop.permute.xlu1 %1618 }
0x1108   :  { %v4582_v10 = vpop.eup %4581 }
0x1109   :  { %v2754_v49 = vadd.f32 1.0, %v4582_v10 }
0x110b   :  { %4583 = vrcp.f32 %v2754_v49 }
0x1115   :  { %v4584_v7 = vpop.eup %4583 }
0x1116   :  { %v2759_v2 = vmul.f32 %v4584_v7, %v5378_v39  ;;  %v1625_v7 = vmul.f32 %v1619_v40, %v5216_v30 }
0x1118   :  { %v2767_v6 = vrot.slane %v2759_v2, %v5196_v24  ;;  %v2803_v19 = vadd.f32 %v5191_v32, %v2759_v2  ;;  %v2804_v53 = vmul.f32 2.0, %v2759_v2 }
0x111a   :  { %v2775_v15 = vrot.slane %v2767_v6, %v5196_v24  ;;  %v2768_v59 = vcombine.high %v2767_v6, %v2767_v6  ;;  %v2806_v63 = vsub.f32 1.0, %v2803_v19  ;;  %vm2851_vm14 = vcmp.ge.f32.partialorder %v2803_v19, 0.999 }
0x111b   :  { %v2852_v29 = vsel %vm2851_vm14, 0.0, %v5819_v41  ;;  %v2805_v20 = vadd.f32 %v2804_v53, %v1683_v13  ;;  %v1579_v6 = vmul.f32 %v5821_v50, %v1573_v21  ;;  %v5826_v21 = vld [vmem:[#allocation6_spill] sm:$0xff] }
0x111c   :  { %v2786_v12 = vrot.slane %v2775_v15, %v4818_v46  ;;  %v2782_v8 = vrot.slane %v2768_v59, %v5196_v24  ;;  %v2815_v61 = vrot.slane %v2806_v63, %v5196_v24  ;;  %v2807_v4 = vmul.f32 2.0, %v2806_v63  ;;  %v5822_v59 = vld [vmem:[#allocation16_spill] sm:$0xff] }
0x111d   :  { %v2854_v52 = vmul.f32 %v2853_v43, %v2852_v29  ;;  %v1580_v63 = vmul.f32 %v5822_v59, %v1577_v51  ;;  %v5528_v51 = vld [vmem:[%s5745_s6 + $0x8] sm:$0xff]  ;;  %v5827_v40 = vsub.s32 2, %v5826_v21 }
0x111e   :  { %2792 = vperm.xlu1 %4478, %v2786_v12   ;;  %v2790_v31 = vrot.slane %v2782_v8, %v4818_v46  ;;  %v2823_v37 = vrot.slane %v2815_v61, %v5196_v24  ;;  %v2816_v38 = vcombine.high %v2815_v61, %v2815_v61 }
0x111f   :  { %v2862_v44 = vrot.slane %v2854_v52, %v5196_v24  ;;  %vm2902_vm15 = vcmp.gt.f32.partialorder %v2854_v52, 0.0 }
0x1120   :  { %2796 = vperm.xlu0 %4477, %v2790_v31   ;;  %v2834_v5 = vrot.slane %v2823_v37, %v4818_v46  ;;  %v2830_v32 = vrot.slane %v2816_v38, %v5196_v24  ;;  %v2903_v48 = vsel %vm2902_vm15, %v2805_v20, %v1683_v13  ;;  %v2904_v36 = vsel %vm2902_vm15, %v2807_v4, %v1684_v16 }
0x1121   :  { %v2870_v39 = vrot.slane %v2862_v44, %v5196_v24  ;;  %v2863_v23 = vcombine.high %v2862_v44, %v2862_v44  ;;  %v2905_v27 = vadd.f32 %v2904_v36, %v2903_v48 }
0x1122   :  { %2840 = vperm.xlu1 %4478, %v2834_v5   ;;  %v2838_v56 = vrot.slane %v2830_v32, %v4818_v46 }
0x1123   :  { %vm2880_vm4 = vcmp.gt.f32.partialorder %v2870_v39, 0.0  ;;  %v2877_v58 = vrot.slane %v2863_v23, %v5196_v24  ;;  %v2906_v3 = vmul.f32 %v2905_v27, %v5476_v17 }
0x1124   :  { %2844 = vperm.xlu0 %4477, %v2838_v56   ;;  %v2882_v28 = vsel %vm2880_vm4, 1, %v5808_v57 }
0x1125   :  { %v2887_v35 = vrot.slane %v2882_v28, %v4818_v46  ;;  %vm2881_vm5 = vcmp.gt.f32.partialorder %v2877_v58, 0.0  ;;  %3863 = vst.msk [vmem:[%s5760_s21] sm:$0x3] %vm3862_vm3, %v2906_v3  ;;  %v4501_v28 = vld [vmem:[%s5748_s9 + $0x10] sm:$0xff]  }
0x1126   :  { %v2883_v11 = vsel %vm2881_vm5, 1, %v5808_v57  ;;  %4391 = vmatpush3.bf16.msra.mxu0 %v4501_v28 }
0x1127   :  { %2893 = vperm.xlu1 %4478, %v2887_v35   ;;  %v2891_v25 = vrot.slane %v2883_v11, %v4818_v46  ;;  %4392 = vmatprep.subr.bf16.mxu0 %v5806_v18  ;;  %v4502_v35 = vld [vmem:[%s5748_s9 + $0x18] sm:$0xff]   ;;  %s3873_s9 = sshll.u32 %s4647_s26, 4  ;;  %s3874_s9 = int_to_ptr.vmem [resolvable:$true] %s3873_s9 }
0x1128   :  { %p4623_p1 = scmp.lt.s32.totalorder %s3874_s9, %s3874_s9 }
0x1129   :  { %2896 = vperm.xlu0 %4477, %v2891_v25  }
0x112a   :  { %4393 = vmatpush3.bf16.msra.mxu0 %v4502_v35 }
0x112b   :  { %4398 = vmatprep.subr.bf16.mxu0 %v5806_v18 }
0x1138   :  { %v2659_v60 = vpop.f32.mrb[28].mxu1 }
0x1139   :  { %v4372_v62 = vpop.f32.mrb[29].mxu1  ;;  %v2660_v42 = vadd.f32 %v2659_v60, %v5212_v1 }
0x113a   :  { %v2662_v0 = vpop.f32.mrb[30].mxu1 }
0x113b   :  { %v4373_v14 = vpop.f32.mrb[31].mxu1  ;;  %v2663_v9 = vadd.f32 %v2662_v0, %v5212_v1  ;;  %v2666_v2 = vadd.f32 %v2660_v42, %v5364_v33  ;;  %v5823_v1 = vld [vmem:[#allocation14_spill] sm:$0xff] }
0x113c   :  { %v1626_v61 = vmul.f32 %v1623_v22, %v5823_v1  ;;  %v2995_v22 = vrot.slane %v5528_v51, %v5827_v40 }
0x113d   :  { %v2667_v53 = vadd.f32 %v2663_v9, %v5367_v34 }
0x113e   :  { %v1628_v41 = vadd.f32 %v1626_v61, %v1580_v63 }
0x1140   :  { %v1681_v16 = vsel %vm1677_vm11, %v1628_v41, %v5822_v59 }
0x119d   :  { %v2793_v54 = vpop.permute.xlu1 %2792 }
0x119e   :  { %v2799_v10 = vmul.f32 %v2793_v54, %v5231_v47  ;;  %v1627_v47 = vadd.f32 %v1625_v7, %v1579_v6  ;;  %v5828_v7 = vsub.s32 3, %v5826_v21 }
0x119f   :  { %v2797_v49 = vpop.permute.xlu0 %2796 }
0x11a0   :  { %v2800_v19 = vmul.f32 %v2797_v49, %v5250_v26  ;;  %v2801_v12 = vadd.f32 %v2799_v10, %v1579_v6  ;;  %v1680_v31 = vsel %vm1676_vm10, %v1627_v47, %v5821_v50 }
0x11a1   :  { %v2841_v15 = vpop.permute.xlu1 %2840 }
0x11a2   :  { %v2847_v43 = vmul.f32 %v2841_v15, %v2666_v2  ;;  %v2802_v4 = vadd.f32 %v2800_v19, %v1580_v63  ;;  %v3001_v2 = vrot.slane %v5528_v51, %v5828_v7  ;;  %v4503_v15 = vld [vmem:[%s5749_s10 + $0x10] sm:$0xff]   ;;  %v4504_v63 = vld [vmem:[%s5749_s10 + $0x18] sm:$0xff]  }
0x11a3   :  { %v2845_v8 = vpop.permute.xlu0 %2844 }
0x11a4   :  { %v2848_v13 = vmul.f32 %v2845_v8, %v2667_v53  ;;  %v2849_v30 = vadd.f32 %v2847_v43, %v2801_v12 }
0x11a6   :  { %v2850_v33 = vadd.f32 %v2848_v13, %v2802_v4  ;;  %v2894_v29 = vpop.permute.xlu1 %2893 }
0x11a7   :  { %vm2898_vm6 = vcmp.eq.s32.totalorder %v2894_v29, 1 }
0x11a8   :  { %v2897_v37 = vpop.permute.xlu0 %2896  ;;  %v5502_v38 = vsel %vm2898_vm6, %v2849_v30, %v1680_v31 }
0x11a9   :  { %vm2899_vm7 = vcmp.eq.s32.totalorder %v2897_v37, 1  ;;  %v2966_v34 = vsel %vm138_vm0, %v5502_v38, 0.0  ;;  %v4613_v37 = vld [vmem:[%s5802_s2 + $0x1] ss:$0 sm:$0xff] }
0x11aa   :  { %2967 = vadd.xlane.f32.xlu1 %v2966_v34  ;;  %v5509_v20 = vsel %vm2899_vm7, %v2850_v33, %v1681_v16 }
0x11ab   :  { %v2969_v5 = vsel %vm138_vm0, %v5509_v20, 0.0 }
0x11ac   :  { %2970 = vadd.xlane.f32.xlu0 %v2969_v5 }
0x1237   :  { %v2968_v32 = vpop.xlane.xlu1 %2967 }
0x1238   :  { %v2972_v44 = vmul.f32 0.03125, %v2968_v32 }
0x1239   :  { %v2971_v48 = vpop.xlane.xlu0 %2970 }
0x123a   :  { %v2974_v36 = vsub.f32 %v5502_v38, %v2972_v44  ;;  %v2973_v56 = vmul.f32 0.03125, %v2971_v48 }
0x123c   :  { %v2975_v39 = vsub.f32 %v5509_v20, %v2973_v56  ;;  %v2976_v23 = vmul.f32 %v2974_v36, %v2974_v36 }
0x123e   :  { %v2978_v27 = vsel %vm138_vm0, %v2976_v23, 0.0  ;;  %v2977_v58 = vmul.f32 %v2975_v39, %v2975_v39 }
0x123f   :  { %2979 = vadd.xlane.f32.xlu0 %v2978_v27 }
0x1240   :  { %v2981_v3 = vsel %vm138_vm0, %v2977_v58, 0.0  ;;  %v4505_v58 = vld [vmem:[%s5750_s11 + $0x10] sm:$0xff]  }
0x1241   :  { %2982 = vadd.xlane.f32.xlu1 %v2981_v3  ;;  %v4506_v3 = vld [vmem:[%s5750_s11 + $0x18] sm:$0xff]  }
0x12cc   :  { %v2980_v11 = vpop.xlane.xlu0 %2979 }
0x12cd   :  { %v2984_v25 = vmul.f32 0.03125, %v2980_v11 }
0x12ce   :  { %v2983_v60 = vpop.xlane.xlu1 %2982 }
0x12cf   :  { %v2986_v62 = vadd.f32 1e-05, %v2984_v25  ;;  %v2985_v0 = vmul.f32 0.03125, %v2983_v60 }
0x12d1   :  { %4585 = vrsqrt.f32 %v2986_v62  ;;  %v2987_v14 = vadd.f32 1e-05, %v2985_v0 }
0x12d3   :  { %4587 = vrsqrt.f32 %v2987_v14 }
0x12db   :  { %v4586_v42 = vpop.eup %4585 }
0x12dc   :  { %v2990_v54 = vmul.f32 %v4586_v42, %v2974_v36 }
0x12dd   :  { %v4588_v9 = vpop.eup %4587 }
0x12de   :  { %v2996_v10 = vmul.f32 %v2995_v22, %v2990_v54  ;;  %v2991_v49 = vmul.f32 %v4588_v9, %v2975_v39  ;;  %v5594_v9 = vld [vmem:[%s5797_s0] sm:$0xff] }
0x12e0   :  { %v2997_v50 = vmul.f32 %v2995_v22, %v2991_v49  ;;  %v3002_v6 = vadd.f32 %v3001_v2, %v2996_v10 }
0x12e2   :  { %v3003_v19 = vadd.f32 %v3001_v2, %v2997_v50  ;;  %v5602_v2 = vld [vmem:[%s5797_s0 + $0x8] sm:$0xff] }
0x12e4   :  { %v3004_v59 = vpack.c.bf16 %v3003_v19, %v3002_v6 }
0x12e6   :  { %4395 = vmatmul.mubr.msk.bf16.vlgmr.msra.gmra.mrb[64].mxu0 %vm138_vm0, %v3004_v59 }
0x12e7   :  { %4399 = vmatpush3.bf16.msra.mxu0 %v4503_v15  ;;  %4402 = vmatprep.mubr.msk.bf16.mxu0 %vm4643_vm1, %v5806_v18 }
0x12e8   :  { %4400 = vmatprep.subr.bf16.mxu0 %v5806_v18 }
0x12eb   :  { %4401 = vmatpush3.bf16.msra.mxu0 %v4504_v63 }
0x12ec   :  { %4411 = vmatprep.subr.mxu0 %v5806_v18 }
0x12ee   :  { %4403 = vmatmul.mubr.msk.bf16.vlgmr.msra.gmra.mrb[68].mxu0 %vm138_vm0, %v3004_v59 }
0x12ef   :  { %4413 = vmatprep.mubr.msk.f32.mxu0 %vm4643_vm1, %v5806_v18 }
0x13b9   :  { %v3110_v43 = vpop.f32.mrb[64].mxu0 }
0x13ba   :  { %v4396_v53 = vpop.f32.mrb[65].mxu0  ;;  %4407 = vmatpush3.xpose.msk.msra.mxu1 %vm138_vm0, %v3110_v43 }
0x13bb   :  { %v3113_v12 = vpop.f32.mrb[66].mxu0  ;;  %4416 = vmatprep.subr.mxu1 %v5806_v18 }
0x13bc   :  { %v4397_v8 = vpop.f32.mrb[67].mxu0  ;;  %4412 = vmatpush3.xpose.msk.msra.mxu0 %vm138_vm0, %v3113_v12 }
0x13bd   :  { %4409 = vmatmul.mubr.msk.f32.vlgmr.msra.gmra.mrb[32].mxu1 %vm138_vm0, %v5435_v45  ;;  %4421 = vmatprep.subr.mxu0 %v5806_v18 }
0x13be   :  { %4418 = vmatprep.mubr.msk.f32.mxu1 %vm4643_vm1, %v5806_v18 }
0x13bf   :  { %4414 = vmatmul.mubr.msk.f32.vlgmr.msra.gmra.mrb[50].mxu0 %vm138_vm0, %v5437_v55  ;;  %v4612_v55 = vld [vmem:[%s5802_s2] ss:$0 sm:$0xff] }
0x13c0   :  { %4423 = vmatprep.mubr.msk.f32.mxu0 %vm4643_vm1, %v5806_v18 }
0x13c1   :  { %v3163_v1 = vpop.f32.mrb[68].mxu0 }
0x13c2   :  { %v4404_v61 = vpop.f32.mrb[69].mxu0  ;;  %4417 = vmatpush3.msra.mxu1 %v3163_v1 }
0x13c3   :  { %v3166_v47 = vpop.f32.mrb[70].mxu0  ;;  %4426 = vmatprep.subr.bf16.mxu1 %v5806_v18  ;;  %v3775_v61 = vrot.slane %v5476_v17, %v5196_v24 }
0x13c4   :  { %v4405_v13 = vpop.f32.mrb[71].mxu0  ;;  %4422 = vmatpush3.msra.mxu0 %v3166_v47 }
0x13c5   :  { %4434 = vmatprep.subr.bf16.mxu0 %v5806_v18 }
0x1490   :  { %v3242_v45 = vpop.f32.mrb[32].mxu1 }
0x1491   :  { %v3322_v4 = vmul.f32 0.17677669, %v3242_v45  ;;  %v4410_v30 = vpop.f32.mrb[33].mxu1 }
0x1492   :  { %v3318_v41 = vpop.f32.mrb[50].mxu0 }
0x1493   :  { %v3323_v33 = vmul.f32 0.17677669, %v3318_v41  ;;  %v4415_v29 = vpop.f32.mrb[51].mxu0  ;;  %v3324_v26 = vadd.f32 %v4612_v55, %v3322_v4  ;;  %v3776_v4 = vcombine.high %v3775_v61, %v3775_v61  ;;  %v3783_v41 = vrot.slane %v3775_v61, %v5196_v24 }
0x1495   :  { %v3326_v31 = vsel %vm789_vm2, %v3324_v26, -inf  ;;  %v3325_v34 = vadd.f32 %v4613_v37, %v3323_v33  ;;  %v3790_v30 = vrot.slane %v3776_v4, %v5196_v24  ;;  %v4508_v24 = vld [vmem:[%s5751_s12 + $0x18] sm:$0xff]  }
0x1496   :  { %3327 = vmax.xlane.f32.xlu0 %v3326_v31 }
0x1497   :  { %v3329_v52 = vsel %vm789_vm2, %v3325_v34, -inf }
0x1498   :  { %3330 = vmax.xlane.f32.xlu1 %v3329_v52 }
0x1523   :  { %v3328_v16 = vpop.xlane.xlu0 %3327 }
0x1524   :  { %v3332_v5 = vsub.f32 %v3324_v26, %v3328_v16  ;;  %v4507_v26 = vld [vmem:[%s5751_s12 + $0x10] sm:$0xff]  }
0x1525   :  { %v3331_v32 = vpop.xlane.xlu1 %3330 }
0x1526   :  { %v3334_v44 = vmul.f32 1.442695, %v3332_v5  ;;  %v3333_v48 = vsub.f32 %v3325_v34, %v3331_v32  ;;  %v4616_v32 = vld [vmem:[%s5796_s3 + $0x8] sm:$0xff] }
0x1528   :  { %4589 = vpow2.f32 %v3334_v44  ;;  %v3336_v36 = vmul.f32 1.442695, %v3333_v48 }
0x152a   :  { %4591 = vpow2.f32 %v3336_v36  ;;  %v4617_v36 = vld [vmem:[%s5796_s3] sm:$0xff] }
0x1532   :  { %v4590_v56 = vpop.eup %4589 }
0x1533   :  { %4419 = vmatmul.mubr.msk.f32.vlgmr.msra.gmra.mrb[34].mxu1 %vm789_vm2, %v4590_v56  ;;  %v3338_v39 = vsel %vm789_vm2, %v4590_v56, 0.0 }
0x1534   :  { %v4592_v23 = vpop.eup %4591  ;;  %3339 = vadd.xlane.f32.xlu0 %v3338_v39  ;;  %4430 = vmatprep.mubr.msk.bf16.mxu1 %vm4643_vm1, %v5806_v18 }
0x1535   :  { %4424 = vmatmul.mubr.msk.f32.vlgmr.msra.gmra.mrb[72].mxu0 %vm789_vm2, %v4592_v23  ;;  %v3341_v27 = vsel %vm789_vm2, %v4592_v23, 0.0  ;;  %4427 = vmatpush3.bf16.msra.mxu1 %v4505_v58  ;;  %vm3793_vm2 = vcmp.eq.f32.partialorder %v3783_v41, 1.0 }
0x1536   :  { %3342 = vadd.xlane.f32.xlu1 %v3341_v27  ;;  %4438 = vmatprep.mubr.msk.bf16.mxu0 %vm4643_vm1, %v5806_v18  ;;  %v3795_v17 = vsel %vm3793_vm2, 1, %v5808_v57 }
0x1537   :  { %4428 = vmatprep.subr.bf16.mxu1 %v5806_v18  ;;  %v3800_v55 = vrot.slane %v3795_v17, %v4818_v46  ;;  %4435 = vmatpush3.bf16.msra.mxu0 %v4507_v26 }
0x1538   :  { %4436 = vmatprep.subr.bf16.mxu0 %v5806_v18 }
0x1539   :  { %4429 = vmatpush3.bf16.msra.mxu1 %v4506_v3 }
0x153a   :  { %4442 = vmatprep.subr.bf16.mxu1 %v5806_v18 }
0x153b   :  { %4437 = vmatpush3.bf16.msra.mxu0 %v4508_v24 }
0x15c1   :  { %v3340_v28 = vpop.xlane.xlu0 %3339 }
0x15c2   :  { %4593 = vrcp.f32 %v3340_v28 }
0x15c3   :  { %v3343_v35 = vpop.xlane.xlu1 %3342 }
0x15c4   :  { %4595 = vrcp.f32 %v3343_v35  ;;  %v5830_v35 = vsub.s32 5, %v5826_v21 }
0x15cc   :  { %v4594_v25 = vpop.eup %4593 }
0x15ce   :  { %v4596_v62 = vpop.eup %4595 }
0x1606   :  { %v3415_v11 = vpop.f32.mrb[34].mxu1 }
0x1607   :  { %v4420_v60 = vpop.f32.mrb[35].mxu1  ;;  %v3492_v14 = vmul.f32 %v4594_v25, %v3415_v11  ;;  %v3588_v11 = vrot.slane %v5528_v51, %v5830_v35 }
0x1608   :  { %v3488_v0 = vpop.f32.mrb[72].mxu0 }
0x1609   :  { %v3493_v40 = vmul.f32 %v4596_v62, %v3488_v0  ;;  %v4425_v22 = vpop.f32.mrb[73].mxu0  ;;  %v4509_v0 = vld [vmem:[%s5752_s13 + $0x40] sm:$0xff]  }
0x160a   :  { %v4512_v22 = vld [vmem:[%s5752_s13 + $0x58] sm:$0xff]  }
0x160b   :  { %v3494_v42 = vpack.c.bf16 %v3493_v40, %v3492_v14  ;;  %v4510_v14 = vld [vmem:[%s5752_s13 + $0x48] sm:$0xff]   ;;  %v4511_v40 = vld [vmem:[%s5752_s13 + $0x50] sm:$0xff]  }
0x160d   :  { %4431 = vmatmul.mubr.msk.bf16.vlgmr.msra.gmra.mrb[36].mxu1 %vm138_vm0, %v3494_v42  ;;  %v4513_v42 = vld [vmem:[%s5752_s13 + $0x60] sm:$0xff]  }
0x160e   :  { %4458 = vmatprep.mubr.msk.bf16.mxu1 %vm4643_vm1, %v5806_v18  ;;  %vm3794_vm1 = vcmp.eq.f32.partialorder %v3790_v30, 1.0  ;;  %4443 = vmatpush3.bf16.msra.mxu1 %v4509_v0 }
0x160f   :  { %v3796_v33 = vsel %vm3794_vm1, 1, %v5808_v57  ;;  %4444 = vmatprep.subr.bf16.mxu1 %v5806_v18 }
0x1610   :  { %v3804_v29 = vrot.slane %v3796_v33, %v4818_v46 }
0x1612   :  { %4445 = vmatpush3.bf16.msra.mxu1 %v4510_v14  ;;  %v3817_v14 = vld [vmem:[%s5756_s17] sm:$0x3]  ;;  %s4618_s17 = scalar_lea.vmem %s3874_s9, 256 }
0x1613   :  { %4446 = vmatprep.subr.bf16.mxu1 %v5806_v18  ;;  %p4619_p0 = scmp.ne.s32.totalorder %s3874_s9, %s4618_s17  ;;  %p4624_p2 = scmp.lt.s32.totalorder %s4618_s17, %s4618_s17 }
0x1615   :  { %p4625_p3 = por %p4624_p2, %p4623_p1 }
0x1616   :  { %4447 = vmatpush3.bf16.msra.mxu1 %v4511_v40  ;;  %v3847_v40 = vrot.slane %v3817_v14, %v4818_v46 }
0x1617   :  { %4448 = vmatprep.subr.bf16.mxu1 %v5806_v18  ;;  %p4626_p4 = pnand %p4625_p3, %p4619_p0 }
0x161a   :  { %4449 = vmatpush3.bf16.msra.mxu1 %v4512_v22 }
0x161b   :  { %4450 = vmatprep.subr.bf16.mxu1 %v5806_v18 }
0x161e   :  { %4451 = vmatpush3.bf16.msra.mxu1 %v4513_v42 }
0x161f   :  { %4452 = vmatprep.subr.bf16.mxu1 %v5806_v18 }
0x16e0   :  { %v3544_v54 = vpop.f32.mrb[36].mxu1 }
0x16e1   :  { %v5597_v10 = vadd.f32 %v5594_v9, %v3544_v54  ;;  %v4432_v49 = vpop.f32.mrb[37].mxu1  ;;  %v4514_v54 = vld [vmem:[%s5752_s13 + $0x68] sm:$0xff]  }
0x16e2   :  { %v3547_v7 = vpop.f32.mrb[38].mxu1  ;;  %4453 = vmatpush3.bf16.msra.mxu1 %v4514_v54  ;;  %v4515_v49 = vld [vmem:[%s5752_s13 + $0x70] sm:$0xff]   ;;  %v5832_v54 = vld [vmem:[#allocation7_spill] sm:$0xff] }
0x16e3   :  { %v5605_v50 = vadd.f32 %v5602_v2, %v3547_v7  ;;  %v4433_v6 = vpop.f32.mrb[39].mxu1  ;;  %v3553_v19 = vsel %vm138_vm0, %v5597_v10, 0.0  ;;  %4454 = vmatprep.subr.bf16.mxu1 %v5806_v18  ;;  %v4516_v7 = vld [vmem:[%s5752_s13 + $0x78] sm:$0xff]  }
0x16e4   :  { %3554 = vadd.xlane.f32.xlu0 %v3553_v19  ;;  %v4014_v6 = vld [vmem:[%s5746_s7 + $0x1] ss:$0 sm:$0xff] }
0x16e5   :  { %v3556_v15 = vsel %vm138_vm0, %v5605_v50, 0.0 }
0x16e6   :  { %3557 = vadd.xlane.f32.xlu1 %v3556_v15  ;;  %4455 = vmatpush3.bf16.msra.mxu1 %v4515_v49  ;;  %v3853_v49 = vrot.slane %v3817_v14, %v5832_v54 }
0x16e7   :  { %4456 = vmatprep.subr.bf16.mxu1 %v5806_v18 }
0x16ea   :  { %4457 = vmatpush3.bf16.msra.mxu1 %v4516_v7 }
0x1771   :  { %v3555_v59 = vpop.xlane.xlu0 %3554 }
0x1772   :  { %v3559_v63 = vmul.f32 0.03125, %v3555_v59 }
0x1773   :  { %v3558_v43 = vpop.xlane.xlu1 %3557 }
0x1774   :  { %v3561_v53 = vsub.f32 %v5597_v10, %v3559_v63  ;;  %v3560_v12 = vmul.f32 0.03125, %v3558_v43 }
0x1776   :  { %v3562_v8 = vsub.f32 %v5605_v50, %v3560_v12  ;;  %v3563_v1 = vmul.f32 %v3561_v53, %v3561_v53 }
0x1778   :  { %v3565_v47 = vsel %vm138_vm0, %v3563_v1, 0.0  ;;  %v3564_v13 = vmul.f32 %v3562_v8, %v3562_v8 }
0x1779   :  { %3566 = vadd.xlane.f32.xlu0 %v3565_v47 }
0x177a   :  { %v3568_v45 = vsel %vm138_vm0, %v3564_v13, 0.0 }
0x177b   :  { %3569 = vadd.xlane.f32.xlu1 %v3568_v45 }
0x178c   :  { %3809 = vperm.xlu1 %4478, %v3804_v29  }
0x178f   :  { %3806 = vperm.xlu0 %4477, %v3800_v55  }
0x1806   :  { %v3567_v31 = vpop.xlane.xlu0 %3566 }
0x1807   :  { %v3571_v37 = vmul.f32 0.03125, %v3567_v31 }
0x1808   :  { %v3570_v34 = vpop.xlane.xlu1 %3569 }
0x1809   :  { %v3573_v57 = vadd.f32 1e-05, %v3571_v37  ;;  %v3572_v52 = vmul.f32 0.03125, %v3570_v34  ;;  %v5831_v34 = vsub.s32 6, %v5826_v21 }
0x180b   :  { %4597 = vrsqrt.f32 %v3573_v57  ;;  %v3574_v16 = vadd.f32 1e-05, %v3572_v52  ;;  %v3676_v57 = vrot.slane %v5528_v51, %v5831_v34 }
0x180c   :  { %v5630_v5 = vpop.permute.xlu1 %3809 }
0x180d   :  { %4599 = vrsqrt.f32 %v3574_v16  ;;  %vm3812_vm8 = vcmp.eq.s32.totalorder %v5630_v5, 1 }
0x180e   :  { %v3814_v44 = vsel %vm3812_vm8, %v5509_v20, %v4616_v32  ;;  %v5639_v48 = vpop.permute.xlu0 %3806  ;;  %v5829_v20 = vsub.s32 4, %v5826_v21 }
0x180f   :  { %3857 = vst.msk [vmem:[%s5757_s18 + $0x8] sm:$0xff] %vm138_vm0, %v3814_v44  ;;  %vm3811_vm9 = vcmp.eq.s32.totalorder %v5639_v48, 1 }
0x1810   :  { %v3813_v56 = vsel %vm3811_vm9, %v5502_v38, %v4617_v36  ;;  %v3582_v39 = vrot.slane %v5528_v51, %v5829_v20 }
0x1811   :  { %3856 = vst.msk [vmem:[%s5757_s18] sm:$0xff] %vm138_vm0, %v3813_v56 }
0x1815   :  { %v4598_v23 = vpop.eup %4597 }
0x1816   :  { %v3577_v27 = vmul.f32 %v4598_v23, %v3561_v53 }
0x1817   :  { %v4600_v58 = vpop.eup %4599 }
0x1818   :  { %v3583_v3 = vmul.f32 %v3582_v39, %v3577_v27  ;;  %v3578_v28 = vmul.f32 %v4600_v58, %v3562_v8 }
0x181a   :  { %v3584_v25 = vmul.f32 %v3582_v39, %v3578_v28  ;;  %v3589_v38 = vadd.f32 %v3588_v11, %v3583_v3 }
0x181c   :  { %v3590_v60 = vadd.f32 %v3588_v11, %v3584_v25 }
0x181e   :  { %v3591_v62 = vpack.c.bf16 %v3590_v60, %v3589_v38 }
0x1820   :  { %4439 = vmatmul.mubr.msk.bf16.vlgmr.msra.gmra.mrb[76].mxu0 %vm138_vm0, %v3591_v62 }
0x18f3   :  { %v3647_v19 = vpop.f32.mrb[76].mxu0 }
0x18f4   :  { %v3648_v15 = vadd.f32 %v4014_v6, %v3647_v19  ;;  %v4440_v59 = vpop.f32.mrb[77].mxu0 }
0x18f5   :  { %v3650_v63 = vpop.f32.mrb[78].mxu0 }
0x18f6   :  { %v3654_v43 = vmul.f32 %v3648_v15, %v3648_v15  ;;  %v3651_v53 = vadd.f32 %v4014_v6, %v3650_v63  ;;  %v4441_v12 = vpop.f32.mrb[79].mxu0 }
0x18f8   :  { %v3656_v8 = vmul.f32 %v3654_v43, %v3648_v15  ;;  %v3655_v1 = vmul.f32 %v3651_v53, %v3651_v53 }
0x18fa   :  { %v3658_v61 = vmul.f32 0.044715, %v3656_v8  ;;  %v3657_v18 = vmul.f32 %v3655_v1, %v3651_v53 }
0x18fc   :  { %v3660_v47 = vadd.f32 %v3658_v61, %v3648_v15  ;;  %v3659_v13 = vmul.f32 0.044715, %v3657_v18 }
0x18fe   :  { %v3662_v45 = vmul.f32 0.7978846, %v3660_v47  ;;  %v3661_v4 = vadd.f32 %v3659_v13, %v3651_v53 }
0x1900   :  { %4601 = vtanh.f32 %v3662_v45  ;;  %v3663_v30 = vmul.f32 0.7978846, %v3661_v4 }
0x1902   :  { %4603 = vtanh.f32 %v3663_v30 }
0x190a   :  { %v4602_v41 = vpop.eup %4601 }
0x190b   :  { %v3666_v33 = vadd.f32 1.0, %v4602_v41 }
0x190c   :  { %v4604_v29 = vpop.eup %4603 }
0x190d   :  { %v3668_v17 = vmul.f32 0.5, %v3666_v33  ;;  %v3667_v55 = vadd.f32 1.0, %v4604_v29 }
0x190f   :  { %v3669_v26 = vmul.f32 0.5, %v3667_v55  ;;  %v3670_v24 = vmul.f32 %v3668_v17, %v3648_v15 }
0x1911   :  { %v3671_v31 = vmul.f32 %v3669_v26, %v3651_v53 }
0x1913   :  { %v3672_v37 = vpack.c.bf16 %v3671_v31, %v3670_v24 }
0x1915   :  { %4459 = vmatmul.mubr.bf16.vlgmr.msra.gmra.mrb[40].mxu1 %v3672_v37 }
0x19e8   :  { %v3759_v52 = vpop.f32.mrb[40].mxu1 }
0x19e9   :  { %v3760_v16 = vadd.f32 %v3759_v52, %v3676_v57  ;;  %v4460_v32 = vpop.f32.mrb[41].mxu1 }
0x19ea   :  { %v3762_v44 = vpop.f32.mrb[42].mxu1 }
0x19eb   :  { %v3766_v36 = vadd.f32 %v3760_v16, %v5597_v10  ;;  %v3763_v56 = vadd.f32 %v3762_v44, %v3676_v57  ;;  %v4461_v20 = vpop.f32.mrb[43].mxu1 }
0x19ed   :  { %v3767_v39 = vadd.f32 %v3763_v56, %v5605_v50  ;;  %v3815_v23 = vsel %vm3811_vm9, %v3766_v36, %v5594_v9 }
0x19ee   :  { %v3818_v27 = vsel %vm138_vm0, %v3815_v23, 0.0  ;;  %3858 = vst.msk [vmem:[%s5758_s19] sm:$0xff] %vm138_vm0, %v3815_v23 }
0x19ef   :  { %3819 = vadd.xlane.f32.xlu1 %v3818_v27  ;;  %v3816_v51 = vsel %vm3812_vm8, %v3767_v39, %v5602_v2 }
0x19f0   :  { %v3821_v21 = vsel %vm138_vm0, %v3816_v51, 0.0  ;;  %3859 = vst.msk [vmem:[%s5758_s19 + $0x8] sm:$0xff] %vm138_vm0, %v3816_v51 }
0x19f1   :  { %3822 = vadd.xlane.f32.xlu0 %v3821_v21 }
0x1a7c   :  { %v3820_v9 = vpop.xlane.xlu1 %3819 }
0x1a7d   :  { %v3824_v10 = vmul.f32 0.03125, %v3820_v9 }
0x1a7e   :  { %v3823_v50 = vpop.xlane.xlu0 %3822 }
0x1a7f   :  { %v3826_v48 = vsub.f32 %v3815_v23, %v3824_v10  ;;  %v3825_v58 = vmul.f32 0.03125, %v3823_v50 }
0x1a81   :  { %v3827_v3 = vsub.f32 %v3816_v51, %v3825_v58  ;;  %v3828_v28 = vmul.f32 %v3826_v48, %v3826_v48 }
0x1a83   :  { %v3830_v35 = vsel %vm138_vm0, %v3828_v28, 0.0  ;;  %v3829_v11 = vmul.f32 %v3827_v3, %v3827_v3 }
0x1a84   :  { %3831 = vadd.xlane.f32.xlu0 %v3830_v35 }
0x1a85   :  { %v3833_v2 = vsel %vm138_vm0, %v3829_v11, 0.0 }
0x1a86   :  { %3834 = vadd.xlane.f32.xlu1 %v3833_v2 }
0x1b11   :  { %v3832_v5 = vpop.xlane.xlu0 %3831 }
0x1b12   :  { %v3836_v25 = vmul.f32 0.03125, %v3832_v5 }
0x1b13   :  { %v3835_v38 = vpop.xlane.xlu1 %3834 }
0x1b14   :  { %v3838_v60 = vadd.f32 1e-05, %v3836_v25  ;;  %v3837_v62 = vmul.f32 0.03125, %v3835_v38 }
0x1b16   :  { %4605 = vrsqrt.f32 %v3838_v60  ;;  %v3839_v0 = vadd.f32 1e-05, %v3837_v62 }
0x1b18   :  { %4607 = vrsqrt.f32 %v3839_v0 }
0x1b20   :  { %v4606_v22 = vpop.eup %4605 }
0x1b21   :  { %v3842_v42 = vmul.f32 %v4606_v22, %v3826_v48 }
0x1b22   :  { %v4608_v7 = vpop.eup %4607 }
0x1b23   :  { %v3843_v6 = vmul.f32 %v4608_v7, %v3827_v3  ;;  %v3848_v19 = vmul.f32 %v3847_v40, %v3842_v42 }
0x1b25   :  { %v3849_v15 = vmul.f32 %v3847_v40, %v3843_v6  ;;  %v3854_v59 = vadd.f32 %v3853_v49, %v3848_v19 }
0x1b27   :  { %v3855_v63 = vadd.f32 %v3853_v49, %v3849_v15  ;;  %3860 = vst.msk [vmem:[#allocation3] sm:$0xff] %vm138_vm0, %v3854_v59 }
0x1b29   :  { %3861 = vst.msk [vmem:[#allocation3 + $0x8] sm:$0xff] %vm138_vm0, %v3855_v63 }
0x1b2a   :  { %4629 = shalt.err (!%p4626_p4)
}
0x1b2b   :  { %s4630_s28 = scalar_lea.hbm %s5759_s20, 256 }
0x1b2c   :  { %p4631_p5 = scmp.ne.s32.totalorder %s5759_s20, %s4630_s28  ;;  %p4634_p6 = scmp.lt.u32.totalorder %s4630_s28, %s5759_s20 }
0x1b2e   :  { %p4636_p7 = pnand %p4634_p6, %p4631_p5 }
0x1b30   :  { %4639 = shalt.err (!%p4636_p7)
}
0x1b31   :  { %s4648_s4 = smov 128   ;;  %s4649_s14 = smov 8  }
0x1b32   :  { %3879 = dma.vmem_to_hbm [thread:$0]  %s3874_s9, 256, %s5759_s20, [#allocation4], %s4648_s4, %s4648_s4, %s4649_s14  }
0x1b33   :  { %4640 = dma.done.wait [#allocation4], 256  }
0x1b34   :  { %4641 = vsyncadd [#allocation4], 4294967040 }
0x1b35   :  { %3891 = vsyncpa [#allocation4], 1 }

</bundles_post_ra>
